<compile_context>
chip_gen: v7x
topology: tpu7x:2x2x1
jax: 0.10.0
libtpu: 0.0.40
codegen_flags: <defaults>
</compile_context>

<pallas_src>
import functools

import jax
import jax.numpy as jnp
from jax.experimental import pallas as pl
from jax.experimental.pallas import tpu as pltpu


# ----------------------------------------------------------------------------
# Generic row-tiled linear kernel: y = x @ W + b   (used for the input
# projection and for the hoisted per-layer gate precompute x @ W_ih + b).
# ----------------------------------------------------------------------------
def _linear_kernel(x_ref, w_ref, b_ref, o_ref):
    x = x_ref[...].astype(w_ref.dtype)           # cast to matmul dtype (bf16)
    o_ref[...] = (
        jnp.dot(x, w_ref[...], preferred_element_type=jnp.float32)
        + b_ref[...]
    ).astype(o_ref.dtype)


def tiled_linear(x2d, w, b, *, row_block=256):
    R, K = x2d.shape
    N = w.shape[1]
    rb = min(row_block, R)
    return pl.pallas_call(
        _linear_kernel,
        out_shape=jax.ShapeDtypeStruct((R, N), jnp.float32),
        grid=(pl.cdiv(R, rb),),
        in_specs=[
            pl.BlockSpec((rb, K), lambda i: (i, 0)),
            pl.BlockSpec((K, N), lambda i: (0, 0)),
            pl.BlockSpec((1, N), lambda i: (0, 0)),
        ],
        out_specs=pl.BlockSpec((rb, N), lambda i: (i, 0)),
        compiler_params=pltpu.CompilerParams(
            dimension_semantics=("parallel",),
        ),
    )(x2d, w, b.reshape(1, N))


# ----------------------------------------------------------------------------
# Recurrent kernel: one residual LSTM layer.
# Grid = (batch_tiles ["parallel"], time_chunks ["arbitrary"]).
# Each grid step runs TT timesteps with an unrolled fori_loop; h/c are carried
# in locals inside the chunk and in VMEM scratch across chunks.
# The x @ W_ih + bias part arrives precomputed as gates_x (T, B, 4H).
# ----------------------------------------------------------------------------
def _lstm_chunk_kernel(lens_ref, gx_ref, res_ref, h0_ref, c0_ref, whh_ref,
                       out_ref, hT_ref, cT_ref, h_sc, c_sc):
    t_idx = pl.program_id(1)
    TT = gx_ref.shape[0]
    H = h0_ref.shape[-1]

    @pl.when(t_idx == 0)
    def _():
        h_sc[...] = h0_ref[...]
        c_sc[...] = c0_ref[...]

    lens = lens_ref[...]                 # (TB, 1) int32 — hoisted out of loop
    mm_dtype = whh_ref.dtype
    t_base = t_idx * TT

    def step(tt, carry):
        h, c = carry                     # f32 (TB, H)
        # gates_x already contains x @ W_ih + (b_ih + b_hh); only the
        # recurrent matmul stays on the serial critical path.
        g = gx_ref[tt] + jnp.dot(h.astype(mm_dtype), whh_ref[...],
                                 preferred_element_type=jnp.float32)
        i_g = jax.nn.sigmoid(g[:, 0 * H:1 * H])
        f_g = jax.nn.sigmoid(g[:, 1 * H:2 * H])
        g_g = jnp.tanh(g[:, 2 * H:3 * H])
        o_g = jax.nn.sigmoid(g[:, 3 * H:4 * H])
        c_new = f_g * c + i_g * g_g
        h_new = o_g * jnp.tanh(c_new)

        valid = (t_base + tt) < lens     # (TB, 1) packed-sequence mask
        h = jnp.where(valid, h_new, h)   # freeze state on padded steps
        c = jnp.where(valid, c_new, c)
        # Padded steps: LSTM output is 0, residual (layer input) still added.
        out_ref[tt] = (res_ref[tt]
                       + jnp.where(valid, h_new, 0.0)).astype(out_ref.dtype)
        return h, c

    h, c = jax.lax.fori_loop(0, TT, step, (h_sc[...], c_sc[...]), unroll=True)
    h_sc[...] = h
    c_sc[...] = c

    @pl.when(t_idx == pl.num_programs(1) - 1)
    def _():
        hT_ref[...] = h
        cT_ref[...] = c


def lstm_layer_residual(gates_x, resid, lens_col, h0, c0, w_hh, *, tt, tb):
    T_pad, B, _ = gates_x.shape
    H = resid.shape[-1]
    n_b = B // tb
    n_t = T_pad // tt
    return pl.pallas_call(
        _lstm_chunk_kernel,
        out_shape=(
            jax.ShapeDtypeStruct((T_pad, B, H), jnp.float32),
            jax.ShapeDtypeStruct((B, H), jnp.float32),
            jax.ShapeDtypeStruct((B, H), jnp.float32),
        ),
        grid_spec=pltpu.PrefetchScalarGridSpec(
            num_scalar_prefetch=0,
            grid=(n_b, n_t),
            in_specs=[
                pl.BlockSpec((tb, 1), lambda b, t: (b, 0)),            # lens
                pl.BlockSpec((tt, tb, 4 * H), lambda b, t: (t, b, 0)),  # gates_x
                pl.BlockSpec((tt, tb, H), lambda b, t: (t, b, 0)),      # residual
                pl.BlockSpec((tb, H), lambda b, t: (b, 0)),             # h0
                pl.BlockSpec((tb, H), lambda b, t: (b, 0)),             # c0
                pl.BlockSpec((H, 4 * H), lambda b, t: (0, 0)),          # W_hh
            ],
            out_specs=[
                pl.BlockSpec((tt, tb, H), lambda b, t: (t, b, 0)),      # output
                pl.BlockSpec((tb, H), lambda b, t: (b, 0)),             # h_n
                pl.BlockSpec((tb, H), lambda b, t: (b, 0)),             # c_n
            ],
            scratch_shapes=[
                pltpu.VMEM((tb, H), jnp.float32),
                pltpu.VMEM((tb, H), jnp.float32),
            ],
        ),
        compiler_params=pltpu.CompilerParams(
            dimension_semantics=("parallel", "arbitrary"),
        ),
    )(lens_col, gates_x, resid, h0, c0, w_hh)


# ----------------------------------------------------------------------------
# Module: parameters + forward
# ----------------------------------------------------------------------------
def init_residual_gru_params(key, input_size, hidden_size, num_layers,
                             compute_dtype=jnp.bfloat16):
    keys = jax.random.split(key, 2 + 4 * num_layers)
    kp = 1.0 / jnp.sqrt(input_size)
    kl = 1.0 / jnp.sqrt(hidden_size)
    params = {
        "proj_w": jax.random.uniform(
            keys[0], (input_size, hidden_size), jnp.float32, -kp, kp
        ).astype(compute_dtype),
        "proj_b": jax.random.uniform(
            keys[1], (hidden_size,), jnp.float32, -kp, kp),
        "w_ih": [], "w_hh": [], "bias": [],
    }
    for i in range(num_layers):
        k0, k1, k2, k3 = keys[2 + 4 * i: 6 + 4 * i]
        params["w_ih"].append(jax.random.uniform(
            k0, (hidden_size, 4 * hidden_size), jnp.float32, -kl, kl
        ).astype(compute_dtype))
        params["w_hh"].append(jax.random.uniform(
            k1, (hidden_size, 4 * hidden_size), jnp.float32, -kl, kl
        ).astype(compute_dtype))
        b_ih = jax.random.uniform(k2, (4 * hidden_size,), jnp.float32, -kl, kl)
        b_hh = jax.random.uniform(k3, (4 * hidden_size,), jnp.float32, -kl, kl)
        params["bias"].append(b_ih + b_hh)       # combined bias, float32
    return params


def residual_gru_forward(params, x, lens, h0, c0, num_layers, dropout=0.0,
                         time_chunk=16):
    """x: (T, B, input_size); lens: (B,); h0/c0: (num_layers, B, H).

    Returns: (padded output (T, B, H), lens, h_n (L, B, H), c_n (L, B, H)).
    """
    T, B, _ = x.shape
    H = params["proj_w"].shape[1]
    lens_col = lens.reshape(-1, 1).astype(jnp.int32)

    # Input projection: one tiled matmul over all T*B rows.
    cur = tiled_linear(x.reshape(T * B, -1),
                       params["proj_w"], params["proj_b"]).reshape(T, B, H)

    # Pad T to a multiple of the time chunk; padded steps are masked
    # (t >= lens freezes state, zero output) and sliced off at the end.
    tt = min(time_chunk, T)
    T_pad = pl.cdiv(T, tt) * tt
    if T_pad != T:
        cur = jnp.concatenate(
            [cur, jnp.zeros((T_pad - T, B, H), cur.dtype)], axis=0)

    tb = 128 if (B >= 128 and B % 128 == 0) else B   # batch tile (megacore axis)

    h_finals, c_finals = [], []
    for i in range(num_layers):
        # Hoisted input-to-hidden matmul + bias for all timesteps at once.
        gates_x = tiled_linear(
            cur.reshape(T_pad * B, H), params["w_ih"][i], params["bias"][i],
        ).reshape(T_pad, B, 4 * H)
        out, hT, cT = lstm_layer_residual(
            gates_x, cur, lens_col, h0[i], c0[i], params["w_hh"][i],
            tt=tt, tb=tb)
        h_finals.append(hT)
        c_finals.append(cT)
        cur = out
        # dropout between layers: p=0.0 here (inference-style) -> no-op
    return cur[:T], lens, jnp.stack(h_finals), jnp.stack(c_finals)


if __name__ == "__main__":
    T, B = 8, 8
    INPUT_SIZE, HIDDEN_SIZE, NUM_LAYERS = 16, 128, 2

    key = jax.random.PRNGKey(0)
    kx, kh, kc, kp = jax.random.split(key, 4)

    x = jax.random.normal(kx, (T, B, INPUT_SIZE), jnp.float32)
    lens = jnp.array([8, 5, 8, 3, 6, 8, 2, 7], dtype=jnp.int32)  # ragged batch
    h0 = jax.random.normal(kh, (NUM_LAYERS, B, HIDDEN_SIZE), jnp.float32)
    c0 = jax.random.normal(kc, (NUM_LAYERS, B, HIDDEN_SIZE), jnp.float32)

    params = init_residual_gru_params(kp, INPUT_SIZE, HIDDEN_SIZE, NUM_LAYERS)

    fwd = jax.jit(functools.partial(residual_gru_forward,
                                    num_layers=NUM_LAYERS))
    out, out_lens, h_n, c_n = fwd(params, x, lens, h0, c0)
    jax.block_until_ready((out, h_n, c_n))

    assert out.shape == (T, B, HIDDEN_SIZE)
    assert h_n.shape == (NUM_LAYERS, B, HIDDEN_SIZE)
    assert c_n.shape == (NUM_LAYERS, B, HIDDEN_SIZE)
    assert bool(jnp.all(jnp.isfinite(out)))
    print("KERNEL_OK")
</pallas_src>

<mosaic_0001>
module attributes {stable_mosaic.version = 11 : i64} {
  func.func @_linear_kernel(%arg0: i32, %arg1: memref<64x16xf32, #tpu.memory_space<vmem>>, %arg2: memref<16x128xbf16, #tpu.memory_space<vmem>>, %arg3: memref<1x128xf32, #tpu.memory_space<vmem>>, %arg4: memref<64x128xf32, #tpu.memory_space<vmem>>) attributes {dimension_semantics = [#tpu.dimension_semantics<parallel>], iteration_bounds = array<i64: 1>, scalar_prefetch = 0 : i64, scratch_operands = 0 : i64, tpu.core_type = #tpu.core_type<tc>, window_params = [{transform_indices = @transform_0, window_bounds = array<i64: 64, 16>}, {pipeline_mode = #tpu.pipeline_mode<synchronous>, transform_indices = @transform_1, window_bounds = array<i64: 16, 128>}, {pipeline_mode = #tpu.pipeline_mode<synchronous>, transform_indices = @transform_2, window_bounds = array<i64: 1, 128>}, {transform_indices = @transform_3, window_bounds = array<i64: 64, 128>}]} {
    %c0 = arith.constant 0 : index
    %c0_0 = arith.constant 0 : index
    %0 = vector.load %arg1[%c0, %c0_0] : memref<64x16xf32, #tpu.memory_space<vmem>>, vector<64x16xf32>
    %1 = arith.truncf %0 : vector<64x16xf32> to vector<64x16xbf16>
    %c0_1 = arith.constant 0 : index
    %c0_2 = arith.constant 0 : index
    %2 = vector.load %arg2[%c0_1, %c0_2] : memref<16x128xbf16, #tpu.memory_space<vmem>>, vector<16x128xbf16>
    %cst = arith.constant dense<0.000000e+00> : vector<64x128xf32>
    %3 = tpu.matmul %1, %2, %cst {dimension_numbers = #tpu.dot_dimension_numbers<[1], [0], [0], [1], [0, 0, 1, 1], [], []>} : vector<64x16xbf16>, vector<16x128xbf16>, vector<64x128xf32> -> vector<64x128xf32>
    %c0_3 = arith.constant 0 : index
    %c0_4 = arith.constant 0 : index
    %4 = vector.load %arg3[%c0_3, %c0_4] : memref<1x128xf32, #tpu.memory_space<vmem>>, vector<1x128xf32>
    %5 = vector.broadcast %4 : vector<1x128xf32> to vector<64x128xf32>
    %6 = arith.addf %3, %5 : vector<64x128xf32>
    %c0_5 = arith.constant 0 : index
    %c0_6 = arith.constant 0 : index
    %7 = vector.load %arg4[%c0_5, %c0_6] : memref<64x128xf32, #tpu.memory_space<vmem>>, vector<64x128xf32>
    tpu.vector_store %arg4[%c0_5, %c0_6], %6 {strides = array<i32>} : memref<64x128xf32, #tpu.memory_space<vmem>>, vector<64x128xf32>,
    return
  }
  func.func @transform_0(%arg0: i32) -> (i32, i32) {
    %c0_i32 = arith.constant 0 : i32
    %c0_i32_0 = arith.constant 0 : i32
    return %arg0, %c0_i32 : i32, i32
  }
  func.func @transform_1(%arg0: i32) -> (i32, i32) {
    %c0_i32 = arith.constant 0 : i32
    %c0_i32_0 = arith.constant 0 : i32
    %c0_i32_1 = arith.constant 0 : i32
    return %c0_i32, %c0_i32_0 : i32, i32
  }
  func.func @transform_2(%arg0: i32) -> (i32, i32) {
    %c0_i32 = arith.constant 0 : i32
    %c0_i32_0 = arith.constant 0 : i32
    %c0_i32_1 = arith.constant 0 : i32
    return %c0_i32, %c0_i32_0 : i32, i32
  }
  func.func @transform_3(%arg0: i32) -> (i32, i32) {
    %c0_i32 = arith.constant 0 : i32
    %c0_i32_0 = arith.constant 0 : i32
    return %arg0, %c0_i32 : i32, i32
  }
}

module attributes {stable_mosaic.version = 11 : i64} {
  func.func @_linear_kernel(%arg0: i32, %arg1: memref<64x128xf32, #tpu.memory_space<vmem>>, %arg2: memref<128x512xbf16, #tpu.memory_space<vmem>>, %arg3: memref<1x512xf32, #tpu.memory_space<vmem>>, %arg4: memref<64x512xf32, #tpu.memory_space<vmem>>) attributes {dimension_semantics = [#tpu.dimension_semantics<parallel>], iteration_bounds = array<i64: 1>, scalar_prefetch = 0 : i64, scratch_operands = 0 : i64, tpu.core_type = #tpu.core_type<tc>, window_params = [{transform_indices = @transform_0, window_bounds = array<i64: 64, 128>}, {pipeline_mode = #tpu.pipeline_mode<synchronous>, transform_indices = @transform_1, window_bounds = array<i64: 128, 512>}, {pipeline_mode = #tpu.pipeline_mode<synchronous>, transform_indices = @transform_2, window_bounds = array<i64: 1, 512>}, {transform_indices = @transform_3, window_bounds = array<i64: 64, 512>}]} {
    %c0 = arith.constant 0 : index
    %c0_0 = arith.constant 0 : index
    %0 = vector.load %arg1[%c0, %c0_0] : memref<64x128xf32, #tpu.memory_space<vmem>>, vector<64x128xf32>
    %1 = arith.truncf %0 : vector<64x128xf32> to vector<64x128xbf16>
    %c0_1 = arith.constant 0 : index
    %c0_2 = arith.constant 0 : index
    %2 = vector.load %arg2[%c0_1, %c0_2] : memref<128x512xbf16, #tpu.memory_space<vmem>>, vector<128x512xbf16>
    %cst = arith.constant dense<0.000000e+00> : vector<64x512xf32>
    %3 = tpu.matmul %1, %2, %cst {dimension_numbers = #tpu.dot_dimension_numbers<[1], [0], [0], [1], [0, 0, 1, 1], [], []>} : vector<64x128xbf16>, vector<128x512xbf16>, vector<64x512xf32> -> vector<64x512xf32>
    %c0_3 = arith.constant 0 : index
    %c0_4 = arith.constant 0 : index
    %4 = vector.load %arg3[%c0_3, %c0_4] : memref<1x512xf32, #tpu.memory_space<vmem>>, vector<1x512xf32>
    %5 = vector.broadcast %4 : vector<1x512xf32> to vector<64x512xf32>
    %6 = arith.addf %3, %5 : vector<64x512xf32>
    %c0_5 = arith.constant 0 : index
    %c0_6 = arith.constant 0 : index
    %7 = vector.load %arg4[%c0_5, %c0_6] : memref<64x512xf32, #tpu.memory_space<vmem>>, vector<64x512xf32>
    tpu.vector_store %arg4[%c0_5, %c0_6], %6 {strides = array<i32>} : memref<64x512xf32, #tpu.memory_space<vmem>>, vector<64x512xf32>,
    return
  }
  func.func @transform_0(%arg0: i32) -> (i32, i32) {
    %c0_i32 = arith.constant 0 : i32
    %c0_i32_0 = arith.constant 0 : i32
    return %arg0, %c0_i32 : i32, i32
  }
  func.func @transform_1(%arg0: i32) -> (i32, i32) {
    %c0_i32 = arith.constant 0 : i32
    %c0_i32_0 = arith.constant 0 : i32
    %c0_i32_1 = arith.constant 0 : i32
    return %c0_i32, %c0_i32_0 : i32, i32
  }
  func.func @transform_2(%arg0: i32) -> (i32, i32) {
    %c0_i32 = arith.constant 0 : i32
    %c0_i32_0 = arith.constant 0 : i32
    %c0_i32_1 = arith.constant 0 : i32
    return %c0_i32, %c0_i32_0 : i32, i32
  }
  func.func @transform_3(%arg0: i32) -> (i32, i32) {
    %c0_i32 = arith.constant 0 : i32
    %c0_i32_0 = arith.constant 0 : i32
    return %arg0, %c0_i32 : i32, i32
  }
}

module attributes {stable_mosaic.version = 11 : i64} {
  func.func @_linear_kernel(%arg0: i32, %arg1: memref<64x128xf32, #tpu.memory_space<vmem>>, %arg2: memref<128x512xbf16, #tpu.memory_space<vmem>>, %arg3: memref<1x512xf32, #tpu.memory_space<vmem>>, %arg4: memref<64x512xf32, #tpu.memory_space<vmem>>) attributes {dimension_semantics = [#tpu.dimension_semantics<parallel>], iteration_bounds = array<i64: 1>, scalar_prefetch = 0 : i64, scratch_operands = 0 : i64, tpu.core_type = #tpu.core_type<tc>, window_params = [{transform_indices = @transform_0, window_bounds = array<i64: 64, 128>}, {pipeline_mode = #tpu.pipeline_mode<synchronous>, transform_indices = @transform_1, window_bounds = array<i64: 128, 512>}, {pipeline_mode = #tpu.pipeline_mode<synchronous>, transform_indices = @transform_2, window_bounds = array<i64: 1, 512>}, {transform_indices = @transform_3, window_bounds = array<i64: 64, 512>}]} {
    %c0 = arith.constant 0 : index
    %c0_0 = arith.constant 0 : index
    %0 = vector.load %arg1[%c0, %c0_0] : memref<64x128xf32, #tpu.memory_space<vmem>>, vector<64x128xf32>
    %1 = arith.truncf %0 : vector<64x128xf32> to vector<64x128xbf16>
    %c0_1 = arith.constant 0 : index
    %c0_2 = arith.constant 0 : index
    %2 = vector.load %arg2[%c0_1, %c0_2] : memref<128x512xbf16, #tpu.memory_space<vmem>>, vector<128x512xbf16>
    %cst = arith.constant dense<0.000000e+00> : vector<64x512xf32>
    %3 = tpu.matmul %1, %2, %cst {dimension_numbers = #tpu.dot_dimension_numbers<[1], [0], [0], [1], [0, 0, 1, 1], [], []>} : vector<64x128xbf16>, vector<128x512xbf16>, vector<64x512xf32> -> vector<64x512xf32>
    %c0_3 = arith.constant 0 : index
    %c0_4 = arith.constant 0 : index
    %4 = vector.load %arg3[%c0_3, %c0_4] : memref<1x512xf32, #tpu.memory_space<vmem>>, vector<1x512xf32>
    %5 = vector.broadcast %4 : vector<1x512xf32> to vector<64x512xf32>
    %6 = arith.addf %3, %5 : vector<64x512xf32>
    %c0_5 = arith.constant 0 : index
    %c0_6 = arith.constant 0 : index
    %7 = vector.load %arg4[%c0_5, %c0_6] : memref<64x512xf32, #tpu.memory_space<vmem>>, vector<64x512xf32>
    tpu.vector_store %arg4[%c0_5, %c0_6], %6 {strides = array<i32>} : memref<64x512xf32, #tpu.memory_space<vmem>>, vector<64x512xf32>,
    return
  }
  func.func @transform_0(%arg0: i32) -> (i32, i32) {
    %c0_i32 = arith.constant 0 : i32
    %c0_i32_0 = arith.constant 0 : i32
    return %arg0, %c0_i32 : i32, i32
  }
  func.func @transform_1(%arg0: i32) -> (i32, i32) {
    %c0_i32 = arith.constant 0 : i32
    %c0_i32_0 = arith.constant 0 : i32
    %c0_i32_1 = arith.constant 0 : i32
    return %c0_i32, %c0_i32_0 : i32, i32
  }
  func.func @transform_2(%arg0: i32) -> (i32, i32) {
    %c0_i32 = arith.constant 0 : i32
    %c0_i32_0 = arith.constant 0 : i32
    %c0_i32_1 = arith.constant 0 : i32
    return %c0_i32, %c0_i32_0 : i32, i32
  }
  func.func @transform_3(%arg0: i32) -> (i32, i32) {
    %c0_i32 = arith.constant 0 : i32
    %c0_i32_0 = arith.constant 0 : i32
    return %arg0, %c0_i32 : i32, i32
  }
}

module attributes {stable_mosaic.version = 11 : i64} {
  func.func @_lstm_chunk_kernel(%arg0: i32, %arg1: i32, %arg2: memref<8x1xi32, #tpu.memory_space<vmem>>, %arg3: memref<8x8x512xf32, #tpu.memory_space<vmem>>, %arg4: memref<8x8x128xf32, #tpu.memory_space<vmem>>, %arg5: memref<8x128xf32, #tpu.memory_space<vmem>>, %arg6: memref<8x128xf32, #tpu.memory_space<vmem>>, %arg7: memref<128x512xbf16, #tpu.memory_space<vmem>>, %arg8: memref<8x8x128xf32, #tpu.memory_space<vmem>>, %arg9: memref<8x128xf32, #tpu.memory_space<vmem>>, %arg10: memref<8x128xf32, #tpu.memory_space<vmem>>, %arg11: memref<8x128xf32, #tpu.memory_space<vmem>>, %arg12: memref<8x128xf32, #tpu.memory_space<vmem>>) attributes {dimension_semantics = [#tpu.dimension_semantics<parallel>, #tpu.dimension_semantics<arbitrary>], iteration_bounds = array<i64: 1, 1>, scalar_prefetch = 0 : i64, scratch_operands = 2 : i64, tpu.core_type = #tpu.core_type<tc>, window_params = [{transform_indices = @transform_0, window_bounds = array<i64: 8, 1>}, {transform_indices = @transform_1, window_bounds = array<i64: 8, 8, 512>}, {transform_indices = @transform_2, window_bounds = array<i64: 8, 8, 128>}, {transform_indices = @transform_3, window_bounds = array<i64: 8, 128>}, {transform_indices = @transform_4, window_bounds = array<i64: 8, 128>}, {pipeline_mode = #tpu.pipeline_mode<synchronous>, transform_indices = @transform_5, window_bounds = array<i64: 128, 512>}, {transform_indices = @transform_6, window_bounds = array<i64: 8, 8, 128>}, {transform_indices = @transform_7, window_bounds = array<i64: 8, 128>}, {transform_indices = @transform_8, window_bounds = array<i64: 8, 128>}]} {
    %c0_i32 = arith.constant 0 : i32
    %0 = arith.cmpi eq, %arg1, %c0_i32 : i32
    %1 = arith.extui %0 : i1 to i32
    %c0_i32_0 = arith.constant 0 : i32
    %2 = arith.cmpi ne, %1, %c0_i32_0 : i32
    scf.if %2 {
      %c0_117 = arith.constant 0 : index
      %c0_118 = arith.constant 0 : index
      %436 = vector.load %arg5[%c0_117, %c0_118] : memref<8x128xf32, #tpu.memory_space<vmem>>, vector<8x128xf32>
      %c0_119 = arith.constant 0 : index
      %c0_120 = arith.constant 0 : index
      %437 = vector.load %arg11[%c0_119, %c0_120] : memref<8x128xf32, #tpu.memory_space<vmem>>, vector<8x128xf32>
      tpu.vector_store %arg11[%c0_119, %c0_120], %436 {strides = array<i32>} : memref<8x128xf32, #tpu.memory_space<vmem>>, vector<8x128xf32>,
      %c0_121 = arith.constant 0 : index
      %c0_122 = arith.constant 0 : index
      %438 = vector.load %arg6[%c0_121, %c0_122] : memref<8x128xf32, #tpu.memory_space<vmem>>, vector<8x128xf32>
      %c0_123 = arith.constant 0 : index
      %c0_124 = arith.constant 0 : index
      %439 = vector.load %arg12[%c0_123, %c0_124] : memref<8x128xf32, #tpu.memory_space<vmem>>, vector<8x128xf32>
      tpu.vector_store %arg12[%c0_123, %c0_124], %438 {strides = array<i32>} : memref<8x128xf32, #tpu.memory_space<vmem>>, vector<8x128xf32>,
    } else {
    }
    %c0 = arith.constant 0 : index
    %c0_1 = arith.constant 0 : index
    %3 = vector.load %arg2[%c0, %c0_1] : memref<8x1xi32, #tpu.memory_space<vmem>>, vector<8x1xi32>
    %c8_i32 = arith.constant 8 : i32
    %4 = arith.muli %arg1, %c8_i32 : i32
    %c0_2 = arith.constant 0 : index
    %c0_3 = arith.constant 0 : index
    %5 = vector.load %arg11[%c0_2, %c0_3] : memref<8x128xf32, #tpu.memory_space<vmem>>, vector<8x128xf32>
    %c0_4 = arith.constant 0 : index
    %c0_5 = arith.constant 0 : index
    %6 = vector.load %arg12[%c0_4, %c0_5] : memref<8x128xf32, #tpu.memory_space<vmem>>, vector<8x128xf32>
    %c0_i32_6 = arith.constant 0 : i32
    %7 = arith.index_cast %c0_i32_6 : i32 to index
    %c0_7 = arith.constant 0 : index
    %c0_8 = arith.constant 0 : index
    %8 = vector.load %arg3[%7, %c0_7, %c0_8] : memref<8x8x512xf32, #tpu.memory_space<vmem>>, vector<1x8x512xf32>
    %9 = vector.shape_cast %8 : vector<1x8x512xf32> to vector<8x512xf32>
    %10 = arith.truncf %5 : vector<8x128xf32> to vector<8x128xbf16>
    %c0_9 = arith.constant 0 : index
    %c0_10 = arith.constant 0 : index
    %11 = vector.load %arg7[%c0_9, %c0_10] : memref<128x512xbf16, #tpu.memory_space<vmem>>, vector<128x512xbf16>
    %cst = arith.constant dense<0.000000e+00> : vector<8x512xf32>
    %12 = tpu.matmul %10, %11, %cst {dimension_numbers = #tpu.dot_dimension_numbers<[1], [0], [0], [1], [0, 0, 1, 1], [], []>} : vector<8x128xbf16>, vector<128x512xbf16>, vector<8x512xf32> -> vector<8x512xf32>
    %13 = arith.addf %9, %12 : vector<8x512xf32>
    %14 = vector.extract_strided_slice %13 {offsets = [0, 0], sizes = [8, 128], strides = [1, 1]} : vector<8x512xf32> to vector<8x128xf32>
    %15 = arith.negf %14 : vector<8x128xf32>
    %16 = math.exp %15 : vector<8x128xf32>
    %cst_11 = arith.constant 1.000000e+00 : f32
    %17 = vector.broadcast %cst_11 : f32 to vector<8x128xf32>
    %18 = arith.addf %17, %16 : vector<8x128xf32>
    %19 = arith.divf %17, %18 : vector<8x128xf32>
    %20 = vector.extract_strided_slice %13 {offsets = [0, 128], sizes = [8, 128], strides = [1, 1]} : vector<8x512xf32> to vector<8x128xf32>
    %21 = arith.negf %20 : vector<8x128xf32>
    %22 = math.exp %21 : vector<8x128xf32>
    %cst_12 = arith.constant 1.000000e+00 : f32
    %23 = vector.broadcast %cst_12 : f32 to vector<8x128xf32>
    %24 = arith.addf %23, %22 : vector<8x128xf32>
    %25 = arith.divf %23, %24 : vector<8x128xf32>
    %26 = vector.extract_strided_slice %13 {offsets = [0, 256], sizes = [8, 128], strides = [1, 1]} : vector<8x512xf32> to vector<8x128xf32>
    %27 = math.tanh %26 : vector<8x128xf32>
    %28 = vector.extract_strided_slice %13 {offsets = [0, 384], sizes = [8, 128], strides = [1, 1]} : vector<8x512xf32> to vector<8x128xf32>
    %29 = arith.negf %28 : vector<8x128xf32>
    %30 = math.exp %29 : vector<8x128xf32>
    %cst_13 = arith.constant 1.000000e+00 : f32
    %31 = vector.broadcast %cst_13 : f32 to vector<8x128xf32>
    %32 = arith.addf %31, %30 : vector<8x128xf32>
    %33 = arith.divf %31, %32 : vector<8x128xf32>
    %34 = arith.mulf %25, %6 : vector<8x128xf32>
    %35 = arith.mulf %19, %27 : vector<8x128xf32>
    %36 = arith.addf %34, %35 : vector<8x128xf32>
    %37 = math.tanh %36 : vector<8x128xf32>
    %38 = arith.mulf %33, %37 : vector<8x128xf32>
    %39 = arith.addi %4, %c0_i32_6 : i32
    %40 = vector.broadcast %39 : i32 to vector<8x1xi32>
    %41 = arith.cmpi slt, %40, %3 : vector<8x1xi32>
    %42 = vector.shape_cast %41 : vector<8x1xi1> to vector<8x1xi1>
    %43 = vector.broadcast %42 : vector<8x1xi1> to vector<8x128xi1>
    %44 = arith.select %43, %38, %5 : vector<8x128xi1>, vector<8x128xf32>
    %45 = vector.shape_cast %41 : vector<8x1xi1> to vector<8x1xi1>
    %46 = vector.broadcast %45 : vector<8x1xi1> to vector<8x128xi1>
    %47 = arith.select %46, %36, %6 : vector<8x128xi1>, vector<8x128xf32>
    %48 = arith.index_cast %c0_i32_6 : i32 to index
    %c0_14 = arith.constant 0 : index
    %c0_15 = arith.constant 0 : index
    %49 = vector.load %arg4[%48, %c0_14, %c0_15] : memref<8x8x128xf32, #tpu.memory_space<vmem>>, vector<1x8x128xf32>
    %50 = vector.shape_cast %49 : vector<1x8x128xf32> to vector<8x128xf32>
    %cst_16 = arith.constant 0.000000e+00 : f32
    %51 = vector.shape_cast %41 : vector<8x1xi1> to vector<8x1xi1>
    %52 = vector.broadcast %51 : vector<8x1xi1> to vector<8x128xi1>
    %53 = vector.broadcast %cst_16 : f32 to vector<8x128xf32>
    %54 = arith.select %52, %38, %53 : vector<8x128xi1>, vector<8x128xf32>
    %55 = arith.addf %50, %54 : vector<8x128xf32>
    %56 = arith.index_cast %c0_i32_6 : i32 to index
    %c0_17 = arith.constant 0 : index
    %c0_18 = arith.constant 0 : index
    %57 = vector.load %arg8[%56, %c0_17, %c0_18] : memref<8x8x128xf32, #tpu.memory_space<vmem>>, vector<1x8x128xf32>
    %58 = vector.shape_cast %57 : vector<1x8x128xf32> to vector<8x128xf32>
    %59 = vector.shape_cast %55 : vector<8x128xf32> to vector<1x8x128xf32>
    tpu.vector_store %arg8[%56, %c0_17, %c0_18], %59 {strides = array<i32>} : memref<8x8x128xf32, #tpu.memory_space<vmem>>, vector<1x8x128xf32>,
    %c1_i32 = arith.constant 1 : i32
    %60 = arith.index_cast %c1_i32 : i32 to index
    %c0_19 = arith.constant 0 : index
    %c0_20 = arith.constant 0 : index
    %61 = vector.load %arg3[%60, %c0_19, %c0_20] : memref<8x8x512xf32, #tpu.memory_space<vmem>>, vector<1x8x512xf32>
    %62 = vector.shape_cast %61 : vector<1x8x512xf32> to vector<8x512xf32>
    %63 = arith.truncf %44 : vector<8x128xf32> to vector<8x128xbf16>
    %c0_21 = arith.constant 0 : index
    %c0_22 = arith.constant 0 : index
    %64 = vector.load %arg7[%c0_21, %c0_22] : memref<128x512xbf16, #tpu.memory_space<vmem>>, vector<128x512xbf16>
    %cst_23 = arith.constant dense<0.000000e+00> : vector<8x512xf32>
    %65 = tpu.matmul %63, %64, %cst_23 {dimension_numbers = #tpu.dot_dimension_numbers<[1], [0], [0], [1], [0, 0, 1, 1], [], []>} : vector<8x128xbf16>, vector<128x512xbf16>, vector<8x512xf32> -> vector<8x512xf32>
    %66 = arith.addf %62, %65 : vector<8x512xf32>
    %67 = vector.extract_strided_slice %66 {offsets = [0, 0], sizes = [8, 128], strides = [1, 1]} : vector<8x512xf32> to vector<8x128xf32>
    %68 = arith.negf %67 : vector<8x128xf32>
    %69 = math.exp %68 : vector<8x128xf32>
    %cst_24 = arith.constant 1.000000e+00 : f32
    %70 = vector.broadcast %cst_24 : f32 to vector<8x128xf32>
    %71 = arith.addf %70, %69 : vector<8x128xf32>
    %72 = arith.divf %70, %71 : vector<8x128xf32>
    %73 = vector.extract_strided_slice %66 {offsets = [0, 128], sizes = [8, 128], strides = [1, 1]} : vector<8x512xf32> to vector<8x128xf32>
    %74 = arith.negf %73 : vector<8x128xf32>
    %75 = math.exp %74 : vector<8x128xf32>
    %cst_25 = arith.constant 1.000000e+00 : f32
    %76 = vector.broadcast %cst_25 : f32 to vector<8x128xf32>
    %77 = arith.addf %76, %75 : vector<8x128xf32>
    %78 = arith.divf %76, %77 : vector<8x128xf32>
    %79 = vector.extract_strided_slice %66 {offsets = [0, 256], sizes = [8, 128], strides = [1, 1]} : vector<8x512xf32> to vector<8x128xf32>
    %80 = math.tanh %79 : vector<8x128xf32>
    %81 = vector.extract_strided_slice %66 {offsets = [0, 384], sizes = [8, 128], strides = [1, 1]} : vector<8x512xf32> to vector<8x128xf32>
    %82 = arith.negf %81 : vector<8x128xf32>
    %83 = math.exp %82 : vector<8x128xf32>
    %cst_26 = arith.constant 1.000000e+00 : f32
    %84 = vector.broadcast %cst_26 : f32 to vector<8x128xf32>
    %85 = arith.addf %84, %83 : vector<8x128xf32>
    %86 = arith.divf %84, %85 : vector<8x128xf32>
    %87 = arith.mulf %78, %47 : vector<8x128xf32>
    %88 = arith.mulf %72, %80 : vector<8x128xf32>
    %89 = arith.addf %87, %88 : vector<8x128xf32>
    %90 = math.tanh %89 : vector<8x128xf32>
    %91 = arith.mulf %86, %90 : vector<8x128xf32>
    %92 = arith.addi %4, %c1_i32 : i32
    %93 = vector.broadcast %92 : i32 to vector<8x1xi32>
    %94 = arith.cmpi slt, %93, %3 : vector<8x1xi32>
    %95 = vector.shape_cast %94 : vector<8x1xi1> to vector<8x1xi1>
    %96 = vector.broadcast %95 : vector<8x1xi1> to vector<8x128xi1>
    %97 = arith.select %96, %91, %44 : vector<8x128xi1>, vector<8x128xf32>
    %98 = vector.shape_cast %94 : vector<8x1xi1> to vector<8x1xi1>
    %99 = vector.broadcast %98 : vector<8x1xi1> to vector<8x128xi1>
    %100 = arith.select %99, %89, %47 : vector<8x128xi1>, vector<8x128xf32>
    %101 = arith.index_cast %c1_i32 : i32 to index
    %c0_27 = arith.constant 0 : index
    %c0_28 = arith.constant 0 : index
    %102 = vector.load %arg4[%101, %c0_27, %c0_28] : memref<8x8x128xf32, #tpu.memory_space<vmem>>, vector<1x8x128xf32>
    %103 = vector.shape_cast %102 : vector<1x8x128xf32> to vector<8x128xf32>
    %cst_29 = arith.constant 0.000000e+00 : f32
    %104 = vector.shape_cast %94 : vector<8x1xi1> to vector<8x1xi1>
    %105 = vector.broadcast %104 : vector<8x1xi1> to vector<8x128xi1>
    %106 = vector.broadcast %cst_29 : f32 to vector<8x128xf32>
    %107 = arith.select %105, %91, %106 : vector<8x128xi1>, vector<8x128xf32>
    %108 = arith.addf %103, %107 : vector<8x128xf32>
    %109 = arith.index_cast %c1_i32 : i32 to index
    %c0_30 = arith.constant 0 : index
    %c0_31 = arith.constant 0 : index
    %110 = vector.load %arg8[%109, %c0_30, %c0_31] : memref<8x8x128xf32, #tpu.memory_space<vmem>>, vector<1x8x128xf32>
    %111 = vector.shape_cast %110 : vector<1x8x128xf32> to vector<8x128xf32>
    %112 = vector.shape_cast %108 : vector<8x128xf32> to vector<1x8x128xf32>
    tpu.vector_store %arg8[%109, %c0_30, %c0_31], %112 {strides = array<i32>} : memref<8x8x128xf32, #tpu.memory_space<vmem>>, vector<1x8x128xf32>,
    %c2_i32 = arith.constant 2 : i32
    %113 = arith.index_cast %c2_i32 : i32 to index
    %c0_32 = arith.constant 0 : index
    %c0_33 = arith.constant 0 : index
    %114 = vector.load %arg3[%113, %c0_32, %c0_33] : memref<8x8x512xf32, #tpu.memory_space<vmem>>, vector<1x8x512xf32>
    %115 = vector.shape_cast %114 : vector<1x8x512xf32> to vector<8x512xf32>
    %116 = arith.truncf %97 : vector<8x128xf32> to vector<8x128xbf16>
    %c0_34 = arith.constant 0 : index
    %c0_35 = arith.constant 0 : index
    %117 = vector.load %arg7[%c0_34, %c0_35] : memref<128x512xbf16, #tpu.memory_space<vmem>>, vector<128x512xbf16>
    %cst_36 = arith.constant dense<0.000000e+00> : vector<8x512xf32>
    %118 = tpu.matmul %116, %117, %cst_36 {dimension_numbers = #tpu.dot_dimension_numbers<[1], [0], [0], [1], [0, 0, 1, 1], [], []>} : vector<8x128xbf16>, vector<128x512xbf16>, vector<8x512xf32> -> vector<8x512xf32>
    %119 = arith.addf %115, %118 : vector<8x512xf32>
    %120 = vector.extract_strided_slice %119 {offsets = [0, 0], sizes = [8, 128], strides = [1, 1]} : vector<8x512xf32> to vector<8x128xf32>
    %121 = arith.negf %120 : vector<8x128xf32>
    %122 = math.exp %121 : vector<8x128xf32>
    %cst_37 = arith.constant 1.000000e+00 : f32
    %123 = vector.broadcast %cst_37 : f32 to vector<8x128xf32>
    %124 = arith.addf %123, %122 : vector<8x128xf32>
    %125 = arith.divf %123, %124 : vector<8x128xf32>
    %126 = vector.extract_strided_slice %119 {offsets = [0, 128], sizes = [8, 128], strides = [1, 1]} : vector<8x512xf32> to vector<8x128xf32>
    %127 = arith.negf %126 : vector<8x128xf32>
    %128 = math.exp %127 : vector<8x128xf32>
    %cst_38 = arith.constant 1.000000e+00 : f32
    %129 = vector.broadcast %cst_38 : f32 to vector<8x128xf32>
    %130 = arith.addf %129, %128 : vector<8x128xf32>
    %131 = arith.divf %129, %130 : vector<8x128xf32>
    %132 = vector.extract_strided_slice %119 {offsets = [0, 256], sizes = [8, 128], strides = [1, 1]} : vector<8x512xf32> to vector<8x128xf32>
    %133 = math.tanh %132 : vector<8x128xf32>
    %134 = vector.extract_strided_slice %119 {offsets = [0, 384], sizes = [8, 128], strides = [1, 1]} : vector<8x512xf32> to vector<8x128xf32>
    %135 = arith.negf %134 : vector<8x128xf32>
    %136 = math.exp %135 : vector<8x128xf32>
    %cst_39 = arith.constant 1.000000e+00 : f32
    %137 = vector.broadcast %cst_39 : f32 to vector<8x128xf32>
    %138 = arith.addf %137, %136 : vector<8x128xf32>
    %139 = arith.divf %137, %138 : vector<8x128xf32>
    %140 = arith.mulf %131, %100 : vector<8x128xf32>
    %141 = arith.mulf %125, %133 : vector<8x128xf32>
    %142 = arith.addf %140, %141 : vector<8x128xf32>
    %143 = math.tanh %142 : vector<8x128xf32>
    %144 = arith.mulf %139, %143 : vector<8x128xf32>
    %145 = arith.addi %4, %c2_i32 : i32
    %146 = vector.broadcast %145 : i32 to vector<8x1xi32>
    %147 = arith.cmpi slt, %146, %3 : vector<8x1xi32>
    %148 = vector.shape_cast %147 : vector<8x1xi1> to vector<8x1xi1>
    %149 = vector.broadcast %148 : vector<8x1xi1> to vector<8x128xi1>
    %150 = arith.select %149, %144, %97 : vector<8x128xi1>, vector<8x128xf32>
    %151 = vector.shape_cast %147 : vector<8x1xi1> to vector<8x1xi1>
    %152 = vector.broadcast %151 : vector<8x1xi1> to vector<8x128xi1>
    %153 = arith.select %152, %142, %100 : vector<8x128xi1>, vector<8x128xf32>
    %154 = arith.index_cast %c2_i32 : i32 to index
    %c0_40 = arith.constant 0 : index
    %c0_41 = arith.constant 0 : index
    %155 = vector.load %arg4[%154, %c0_40, %c0_41] : memref<8x8x128xf32, #tpu.memory_space<vmem>>, vector<1x8x128xf32>
    %156 = vector.shape_cast %155 : vector<1x8x128xf32> to vector<8x128xf32>
    %cst_42 = arith.constant 0.000000e+00 : f32
    %157 = vector.shape_cast %147 : vector<8x1xi1> to vector<8x1xi1>
    %158 = vector.broadcast %157 : vector<8x1xi1> to vector<8x128xi1>
    %159 = vector.broadcast %cst_42 : f32 to vector<8x128xf32>
    %160 = arith.select %158, %144, %159 : vector<8x128xi1>, vector<8x128xf32>
    %161 = arith.addf %156, %160 : vector<8x128xf32>
    %162 = arith.index_cast %c2_i32 : i32 to index
    %c0_43 = arith.constant 0 : index
    %c0_44 = arith.constant 0 : index
    %163 = vector.load %arg8[%162, %c0_43, %c0_44] : memref<8x8x128xf32, #tpu.memory_space<vmem>>, vector<1x8x128xf32>
    %164 = vector.shape_cast %163 : vector<1x8x128xf32> to vector<8x128xf32>
    %165 = vector.shape_cast %161 : vector<8x128xf32> to vector<1x8x128xf32>
    tpu.vector_store %arg8[%162, %c0_43, %c0_44], %165 {strides = array<i32>} : memref<8x8x128xf32, #tpu.memory_space<vmem>>, vector<1x8x128xf32>,
    %c3_i32 = arith.constant 3 : i32
    %166 = arith.index_cast %c3_i32 : i32 to index
    %c0_45 = arith.constant 0 : index
    %c0_46 = arith.constant 0 : index
    %167 = vector.load %arg3[%166, %c0_45, %c0_46] : memref<8x8x512xf32, #tpu.memory_space<vmem>>, vector<1x8x512xf32>
    %168 = vector.shape_cast %167 : vector<1x8x512xf32> to vector<8x512xf32>
    %169 = arith.truncf %150 : vector<8x128xf32> to vector<8x128xbf16>
    %c0_47 = arith.constant 0 : index
    %c0_48 = arith.constant 0 : index
    %170 = vector.load %arg7[%c0_47, %c0_48] : memref<128x512xbf16, #tpu.memory_space<vmem>>, vector<128x512xbf16>
    %cst_49 = arith.constant dense<0.000000e+00> : vector<8x512xf32>
    %171 = tpu.matmul %169, %170, %cst_49 {dimension_numbers = #tpu.dot_dimension_numbers<[1], [0], [0], [1], [0, 0, 1, 1], [], []>} : vector<8x128xbf16>, vector<128x512xbf16>, vector<8x512xf32> -> vector<8x512xf32>
    %172 = arith.addf %168, %171 : vector<8x512xf32>
    %173 = vector.extract_strided_slice %172 {offsets = [0, 0], sizes = [8, 128], strides = [1, 1]} : vector<8x512xf32> to vector<8x128xf32>
    %174 = arith.negf %173 : vector<8x128xf32>
    %175 = math.exp %174 : vector<8x128xf32>
    %cst_50 = arith.constant 1.000000e+00 : f32
    %176 = vector.broadcast %cst_50 : f32 to vector<8x128xf32>
    %177 = arith.addf %176, %175 : vector<8x128xf32>
    %178 = arith.divf %176, %177 : vector<8x128xf32>
    %179 = vector.extract_strided_slice %172 {offsets = [0, 128], sizes = [8, 128], strides = [1, 1]} : vector<8x512xf32> to vector<8x128xf32>
    %180 = arith.negf %179 : vector<8x128xf32>
    %181 = math.exp %180 : vector<8x128xf32>
    %cst_51 = arith.constant 1.000000e+00 : f32
    %182 = vector.broadcast %cst_51 : f32 to vector<8x128xf32>
    %183 = arith.addf %182, %181 : vector<8x128xf32>
    %184 = arith.divf %182, %183 : vector<8x128xf32>
    %185 = vector.extract_strided_slice %172 {offsets = [0, 256], sizes = [8, 128], strides = [1, 1]} : vector<8x512xf32> to vector<8x128xf32>
    %186 = math.tanh %185 : vector<8x128xf32>
    %187 = vector.extract_strided_slice %172 {offsets = [0, 384], sizes = [8, 128], strides = [1, 1]} : vector<8x512xf32> to vector<8x128xf32>
    %188 = arith.negf %187 : vector<8x128xf32>
    %189 = math.exp %188 : vector<8x128xf32>
    %cst_52 = arith.constant 1.000000e+00 : f32
    %190 = vector.broadcast %cst_52 : f32 to vector<8x128xf32>
    %191 = arith.addf %190, %189 : vector<8x128xf32>
    %192 = arith.divf %190, %191 : vector<8x128xf32>
    %193 = arith.mulf %184, %153 : vector<8x128xf32>
    %194 = arith.mulf %178, %186 : vector<8x128xf32>
    %195 = arith.addf %193, %194 : vector<8x128xf32>
    %196 = math.tanh %195 : vector<8x128xf32>
    %197 = arith.mulf %192, %196 : vector<8x128xf32>
    %198 = arith.addi %4, %c3_i32 : i32
    %199 = vector.broadcast %198 : i32 to vector<8x1xi32>
    %200 = arith.cmpi slt, %199, %3 : vector<8x1xi32>
    %201 = vector.shape_cast %200 : vector<8x1xi1> to vector<8x1xi1>
    %202 = vector.broadcast %201 : vector<8x1xi1> to vector<8x128xi1>
    %203 = arith.select %202, %197, %150 : vector<8x128xi1>, vector<8x128xf32>
    %204 = vector.shape_cast %200 : vector<8x1xi1> to vector<8x1xi1>
    %205 = vector.broadcast %204 : vector<8x1xi1> to vector<8x128xi1>
    %206 = arith.select %205, %195, %153 : vector<8x128xi1>, vector<8x128xf32>
    %207 = arith.index_cast %c3_i32 : i32 to index
    %c0_53 = arith.constant 0 : index
    %c0_54 = arith.constant 0 : index
    %208 = vector.load %arg4[%207, %c0_53, %c0_54] : memref<8x8x128xf32, #tpu.memory_space<vmem>>, vector<1x8x128xf32>
    %209 = vector.shape_cast %208 : vector<1x8x128xf32> to vector<8x128xf32>
    %cst_55 = arith.constant 0.000000e+00 : f32
    %210 = vector.shape_cast %200 : vector<8x1xi1> to vector<8x1xi1>
    %211 = vector.broadcast %210 : vector<8x1xi1> to vector<8x128xi1>
    %212 = vector.broadcast %cst_55 : f32 to vector<8x128xf32>
    %213 = arith.select %211, %197, %212 : vector<8x128xi1>, vector<8x128xf32>
    %214 = arith.addf %209, %213 : vector<8x128xf32>
    %215 = arith.index_cast %c3_i32 : i32 to index
    %c0_56 = arith.constant 0 : index
    %c0_57 = arith.constant 0 : index
    %216 = vector.load %arg8[%215, %c0_56, %c0_57] : memref<8x8x128xf32, #tpu.memory_space<vmem>>, vector<1x8x128xf32>
    %217 = vector.shape_cast %216 : vector<1x8x128xf32> to vector<8x128xf32>
    %218 = vector.shape_cast %214 : vector<8x128xf32> to vector<1x8x128xf32>
    tpu.vector_store %arg8[%215, %c0_56, %c0_57], %218 {strides = array<i32>} : memref<8x8x128xf32, #tpu.memory_space<vmem>>, vector<1x8x128xf32>,
    %c4_i32 = arith.constant 4 : i32
    %219 = arith.index_cast %c4_i32 : i32 to index
    %c0_58 = arith.constant 0 : index
    %c0_59 = arith.constant 0 : index
    %220 = vector.load %arg3[%219, %c0_58, %c0_59] : memref<8x8x512xf32, #tpu.memory_space<vmem>>, vector<1x8x512xf32>
    %221 = vector.shape_cast %220 : vector<1x8x512xf32> to vector<8x512xf32>
    %222 = arith.truncf %203 : vector<8x128xf32> to vector<8x128xbf16>
    %c0_60 = arith.constant 0 : index
    %c0_61 = arith.constant 0 : index
    %223 = vector.load %arg7[%c0_60, %c0_61] : memref<128x512xbf16, #tpu.memory_space<vmem>>, vector<128x512xbf16>
    %cst_62 = arith.constant dense<0.000000e+00> : vector<8x512xf32>
    %224 = tpu.matmul %222, %223, %cst_62 {dimension_numbers = #tpu.dot_dimension_numbers<[1], [0], [0], [1], [0, 0, 1, 1], [], []>} : vector<8x128xbf16>, vector<128x512xbf16>, vector<8x512xf32> -> vector<8x512xf32>
    %225 = arith.addf %221, %224 : vector<8x512xf32>
    %226 = vector.extract_strided_slice %225 {offsets = [0, 0], sizes = [8, 128], strides = [1, 1]} : vector<8x512xf32> to vector<8x128xf32>
    %227 = arith.negf %226 : vector<8x128xf32>
    %228 = math.exp %227 : vector<8x128xf32>
    %cst_63 = arith.constant 1.000000e+00 : f32
    %229 = vector.broadcast %cst_63 : f32 to vector<8x128xf32>
    %230 = arith.addf %229, %228 : vector<8x128xf32>
    %231 = arith.divf %229, %230 : vector<8x128xf32>
    %232 = vector.extract_strided_slice %225 {offsets = [0, 128], sizes = [8, 128], strides = [1, 1]} : vector<8x512xf32> to vector<8x128xf32>
    %233 = arith.negf %232 : vector<8x128xf32>
    %234 = math.exp %233 : vector<8x128xf32>
    %cst_64 = arith.constant 1.000000e+00 : f32
    %235 = vector.broadcast %cst_64 : f32 to vector<8x128xf32>
    %236 = arith.addf %235, %234 : vector<8x128xf32>
    %237 = arith.divf %235, %236 : vector<8x128xf32>
    %238 = vector.extract_strided_slice %225 {offsets = [0, 256], sizes = [8, 128], strides = [1, 1]} : vector<8x512xf32> to vector<8x128xf32>
    %239 = math.tanh %238 : vector<8x128xf32>
    %240 = vector.extract_strided_slice %225 {offsets = [0, 384], sizes = [8, 128], strides = [1, 1]} : vector<8x512xf32> to vector<8x128xf32>
    %241 = arith.negf %240 : vector<8x128xf32>
    %242 = math.exp %241 : vector<8x128xf32>
    %cst_65 = arith.constant 1.000000e+00 : f32
    %243 = vector.broadcast %cst_65 : f32 to vector<8x128xf32>
    %244 = arith.addf %243, %242 : vector<8x128xf32>
    %245 = arith.divf %243, %244 : vector<8x128xf32>
    %246 = arith.mulf %237, %206 : vector<8x128xf32>
    %247 = arith.mulf %231, %239 : vector<8x128xf32>
    %248 = arith.addf %246, %247 : vector<8x128xf32>
    %249 = math.tanh %248 : vector<8x128xf32>
    %250 = arith.mulf %245, %249 : vector<8x128xf32>
    %251 = arith.addi %4, %c4_i32 : i32
    %252 = vector.broadcast %251 : i32 to vector<8x1xi32>
    %253 = arith.cmpi slt, %252, %3 : vector<8x1xi32>
    %254 = vector.shape_cast %253 : vector<8x1xi1> to vector<8x1xi1>
    %255 = vector.broadcast %254 : vector<8x1xi1> to vector<8x128xi1>
    %256 = arith.select %255, %250, %203 : vector<8x128xi1>, vector<8x128xf32>
    %257 = vector.shape_cast %253 : vector<8x1xi1> to vector<8x1xi1>
    %258 = vector.broadcast %257 : vector<8x1xi1> to vector<8x128xi1>
    %259 = arith.select %258, %248, %206 : vector<8x128xi1>, vector<8x128xf32>
    %260 = arith.index_cast %c4_i32 : i32 to index
    %c0_66 = arith.constant 0 : index
    %c0_67 = arith.constant 0 : index
    %261 = vector.load %arg4[%260, %c0_66, %c0_67] : memref<8x8x128xf32, #tpu.memory_space<vmem>>, vector<1x8x128xf32>
    %262 = vector.shape_cast %261 : vector<1x8x128xf32> to vector<8x128xf32>
    %cst_68 = arith.constant 0.000000e+00 : f32
    %263 = vector.shape_cast %253 : vector<8x1xi1> to vector<8x1xi1>
    %264 = vector.broadcast %263 : vector<8x1xi1> to vector<8x128xi1>
    %265 = vector.broadcast %cst_68 : f32 to vector<8x128xf32>
    %266 = arith.select %264, %250, %265 : vector<8x128xi1>, vector<8x128xf32>
    %267 = arith.addf %262, %266 : vector<8x128xf32>
    %268 = arith.index_cast %c4_i32 : i32 to index
    %c0_69 = arith.constant 0 : index
    %c0_70 = arith.constant 0 : index
    %269 = vector.load %arg8[%268, %c0_69, %c0_70] : memref<8x8x128xf32, #tpu.memory_space<vmem>>, vector<1x8x128xf32>
    %270 = vector.shape_cast %269 : vector<1x8x128xf32> to vector<8x128xf32>
    %271 = vector.shape_cast %267 : vector<8x128xf32> to vector<1x8x128xf32>
    tpu.vector_store %arg8[%268, %c0_69, %c0_70], %271 {strides = array<i32>} : memref<8x8x128xf32, #tpu.memory_space<vmem>>, vector<1x8x128xf32>,
    %c5_i32 = arith.constant 5 : i32
    %272 = arith.index_cast %c5_i32 : i32 to index
    %c0_71 = arith.constant 0 : index
    %c0_72 = arith.constant 0 : index
    %273 = vector.load %arg3[%272, %c0_71, %c0_72] : memref<8x8x512xf32, #tpu.memory_space<vmem>>, vector<1x8x512xf32>
    %274 = vector.shape_cast %273 : vector<1x8x512xf32> to vector<8x512xf32>
    %275 = arith.truncf %256 : vector<8x128xf32> to vector<8x128xbf16>
    %c0_73 = arith.constant 0 : index
    %c0_74 = arith.constant 0 : index
    %276 = vector.load %arg7[%c0_73, %c0_74] : memref<128x512xbf16, #tpu.memory_space<vmem>>, vector<128x512xbf16>
    %cst_75 = arith.constant dense<0.000000e+00> : vector<8x512xf32>
    %277 = tpu.matmul %275, %276, %cst_75 {dimension_numbers = #tpu.dot_dimension_numbers<[1], [0], [0], [1], [0, 0, 1, 1], [], []>} : vector<8x128xbf16>, vector<128x512xbf16>, vector<8x512xf32> -> vector<8x512xf32>
    %278 = arith.addf %274, %277 : vector<8x512xf32>
    %279 = vector.extract_strided_slice %278 {offsets = [0, 0], sizes = [8, 128], strides = [1, 1]} : vector<8x512xf32> to vector<8x128xf32>
    %280 = arith.negf %279 : vector<8x128xf32>
    %281 = math.exp %280 : vector<8x128xf32>
    %cst_76 = arith.constant 1.000000e+00 : f32
    %282 = vector.broadcast %cst_76 : f32 to vector<8x128xf32>
    %283 = arith.addf %282, %281 : vector<8x128xf32>
    %284 = arith.divf %282, %283 : vector<8x128xf32>
    %285 = vector.extract_strided_slice %278 {offsets = [0, 128], sizes = [8, 128], strides = [1, 1]} : vector<8x512xf32> to vector<8x128xf32>
    %286 = arith.negf %285 : vector<8x128xf32>
    %287 = math.exp %286 : vector<8x128xf32>
    %cst_77 = arith.constant 1.000000e+00 : f32
    %288 = vector.broadcast %cst_77 : f32 to vector<8x128xf32>
    %289 = arith.addf %288, %287 : vector<8x128xf32>
    %290 = arith.divf %288, %289 : vector<8x128xf32>
    %291 = vector.extract_strided_slice %278 {offsets = [0, 256], sizes = [8, 128], strides = [1, 1]} : vector<8x512xf32> to vector<8x128xf32>
    %292 = math.tanh %291 : vector<8x128xf32>
    %293 = vector.extract_strided_slice %278 {offsets = [0, 384], sizes = [8, 128], strides = [1, 1]} : vector<8x512xf32> to vector<8x128xf32>
    %294 = arith.negf %293 : vector<8x128xf32>
    %295 = math.exp %294 : vector<8x128xf32>
    %cst_78 = arith.constant 1.000000e+00 : f32
    %296 = vector.broadcast %cst_78 : f32 to vector<8x128xf32>
    %297 = arith.addf %296, %295 : vector<8x128xf32>
    %298 = arith.divf %296, %297 : vector<8x128xf32>
    %299 = arith.mulf %290, %259 : vector<8x128xf32>
    %300 = arith.mulf %284, %292 : vector<8x128xf32>
    %301 = arith.addf %299, %300 : vector<8x128xf32>
    %302 = math.tanh %301 : vector<8x128xf32>
    %303 = arith.mulf %298, %302 : vector<8x128xf32>
    %304 = arith.addi %4, %c5_i32 : i32
    %305 = vector.broadcast %304 : i32 to vector<8x1xi32>
    %306 = arith.cmpi slt, %305, %3 : vector<8x1xi32>
    %307 = vector.shape_cast %306 : vector<8x1xi1> to vector<8x1xi1>
    %308 = vector.broadcast %307 : vector<8x1xi1> to vector<8x128xi1>
    %309 = arith.select %308, %303, %256 : vector<8x128xi1>, vector<8x128xf32>
    %310 = vector.shape_cast %306 : vector<8x1xi1> to vector<8x1xi1>
    %311 = vector.broadcast %310 : vector<8x1xi1> to vector<8x128xi1>
    %312 = arith.select %311, %301, %259 : vector<8x128xi1>, vector<8x128xf32>
    %313 = arith.index_cast %c5_i32 : i32 to index
    %c0_79 = arith.constant 0 : index
    %c0_80 = arith.constant 0 : index
    %314 = vector.load %arg4[%313, %c0_79, %c0_80] : memref<8x8x128xf32, #tpu.memory_space<vmem>>, vector<1x8x128xf32>
    %315 = vector.shape_cast %314 : vector<1x8x128xf32> to vector<8x128xf32>
    %cst_81 = arith.constant 0.000000e+00 : f32
    %316 = vector.shape_cast %306 : vector<8x1xi1> to vector<8x1xi1>
    %317 = vector.broadcast %316 : vector<8x1xi1> to vector<8x128xi1>
    %318 = vector.broadcast %cst_81 : f32 to vector<8x128xf32>
    %319 = arith.select %317, %303, %318 : vector<8x128xi1>, vector<8x128xf32>
    %320 = arith.addf %315, %319 : vector<8x128xf32>
    %321 = arith.index_cast %c5_i32 : i32 to index
    %c0_82 = arith.constant 0 : index
    %c0_83 = arith.constant 0 : index
    %322 = vector.load %arg8[%321, %c0_82, %c0_83] : memref<8x8x128xf32, #tpu.memory_space<vmem>>, vector<1x8x128xf32>
    %323 = vector.shape_cast %322 : vector<1x8x128xf32> to vector<8x128xf32>
    %324 = vector.shape_cast %320 : vector<8x128xf32> to vector<1x8x128xf32>
    tpu.vector_store %arg8[%321, %c0_82, %c0_83], %324 {strides = array<i32>} : memref<8x8x128xf32, #tpu.memory_space<vmem>>, vector<1x8x128xf32>,
    %c6_i32 = arith.constant 6 : i32
    %325 = arith.index_cast %c6_i32 : i32 to index
    %c0_84 = arith.constant 0 : index
    %c0_85 = arith.constant 0 : index
    %326 = vector.load %arg3[%325, %c0_84, %c0_85] : memref<8x8x512xf32, #tpu.memory_space<vmem>>, vector<1x8x512xf32>
    %327 = vector.shape_cast %326 : vector<1x8x512xf32> to vector<8x512xf32>
    %328 = arith.truncf %309 : vector<8x128xf32> to vector<8x128xbf16>
    %c0_86 = arith.constant 0 : index
    %c0_87 = arith.constant 0 : index
    %329 = vector.load %arg7[%c0_86, %c0_87] : memref<128x512xbf16, #tpu.memory_space<vmem>>, vector<128x512xbf16>
    %cst_88 = arith.constant dense<0.000000e+00> : vector<8x512xf32>
    %330 = tpu.matmul %328, %329, %cst_88 {dimension_numbers = #tpu.dot_dimension_numbers<[1], [0], [0], [1], [0, 0, 1, 1], [], []>} : vector<8x128xbf16>, vector<128x512xbf16>, vector<8x512xf32> -> vector<8x512xf32>
    %331 = arith.addf %327, %330 : vector<8x512xf32>
    %332 = vector.extract_strided_slice %331 {offsets = [0, 0], sizes = [8, 128], strides = [1, 1]} : vector<8x512xf32> to vector<8x128xf32>
    %333 = arith.negf %332 : vector<8x128xf32>
    %334 = math.exp %333 : vector<8x128xf32>
    %cst_89 = arith.constant 1.000000e+00 : f32
    %335 = vector.broadcast %cst_89 : f32 to vector<8x128xf32>
    %336 = arith.addf %335, %334 : vector<8x128xf32>
    %337 = arith.divf %335, %336 : vector<8x128xf32>
    %338 = vector.extract_strided_slice %331 {offsets = [0, 128], sizes = [8, 128], strides = [1, 1]} : vector<8x512xf32> to vector<8x128xf32>
    %339 = arith.negf %338 : vector<8x128xf32>
    %340 = math.exp %339 : vector<8x128xf32>
    %cst_90 = arith.constant 1.000000e+00 : f32
    %341 = vector.broadcast %cst_90 : f32 to vector<8x128xf32>
    %342 = arith.addf %341, %340 : vector<8x128xf32>
    %343 = arith.divf %341, %342 : vector<8x128xf32>
    %344 = vector.extract_strided_slice %331 {offsets = [0, 256], sizes = [8, 128], strides = [1, 1]} : vector<8x512xf32> to vector<8x128xf32>
    %345 = math.tanh %344 : vector<8x128xf32>
    %346 = vector.extract_strided_slice %331 {offsets = [0, 384], sizes = [8, 128], strides = [1, 1]} : vector<8x512xf32> to vector<8x128xf32>
    %347 = arith.negf %346 : vector<8x128xf32>
    %348 = math.exp %347 : vector<8x128xf32>
    %cst_91 = arith.constant 1.000000e+00 : f32
    %349 = vector.broadcast %cst_91 : f32 to vector<8x128xf32>
    %350 = arith.addf %349, %348 : vector<8x128xf32>
    %351 = arith.divf %349, %350 : vector<8x128xf32>
    %352 = arith.mulf %343, %312 : vector<8x128xf32>
    %353 = arith.mulf %337, %345 : vector<8x128xf32>
    %354 = arith.addf %352, %353 : vector<8x128xf32>
    %355 = math.tanh %354 : vector<8x128xf32>
    %356 = arith.mulf %351, %355 : vector<8x128xf32>
    %357 = arith.addi %4, %c6_i32 : i32
    %358 = vector.broadcast %357 : i32 to vector<8x1xi32>
    %359 = arith.cmpi slt, %358, %3 : vector<8x1xi32>
    %360 = vector.shape_cast %359 : vector<8x1xi1> to vector<8x1xi1>
    %361 = vector.broadcast %360 : vector<8x1xi1> to vector<8x128xi1>
    %362 = arith.select %361, %356, %309 : vector<8x128xi1>, vector<8x128xf32>
    %363 = vector.shape_cast %359 : vector<8x1xi1> to vector<8x1xi1>
    %364 = vector.broadcast %363 : vector<8x1xi1> to vector<8x128xi1>
    %365 = arith.select %364, %354, %312 : vector<8x128xi1>, vector<8x128xf32>
    %366 = arith.index_cast %c6_i32 : i32 to index
    %c0_92 = arith.constant 0 : index
    %c0_93 = arith.constant 0 : index
    %367 = vector.load %arg4[%366, %c0_92, %c0_93] : memref<8x8x128xf32, #tpu.memory_space<vmem>>, vector<1x8x128xf32>
    %368 = vector.shape_cast %367 : vector<1x8x128xf32> to vector<8x128xf32>
    %cst_94 = arith.constant 0.000000e+00 : f32
    %369 = vector.shape_cast %359 : vector<8x1xi1> to vector<8x1xi1>
    %370 = vector.broadcast %369 : vector<8x1xi1> to vector<8x128xi1>
    %371 = vector.broadcast %cst_94 : f32 to vector<8x128xf32>
    %372 = arith.select %370, %356, %371 : vector<8x128xi1>, vector<8x128xf32>
    %373 = arith.addf %368, %372 : vector<8x128xf32>
    %374 = arith.index_cast %c6_i32 : i32 to index
    %c0_95 = arith.constant 0 : index
    %c0_96 = arith.constant 0 : index
    %375 = vector.load %arg8[%374, %c0_95, %c0_96] : memref<8x8x128xf32, #tpu.memory_space<vmem>>, vector<1x8x128xf32>
    %376 = vector.shape_cast %375 : vector<1x8x128xf32> to vector<8x128xf32>
    %377 = vector.shape_cast %373 : vector<8x128xf32> to vector<1x8x128xf32>
    tpu.vector_store %arg8[%374, %c0_95, %c0_96], %377 {strides = array<i32>} : memref<8x8x128xf32, #tpu.memory_space<vmem>>, vector<1x8x128xf32>,
    %c7_i32 = arith.constant 7 : i32
    %378 = arith.index_cast %c7_i32 : i32 to index
    %c0_97 = arith.constant 0 : index
    %c0_98 = arith.constant 0 : index
    %379 = vector.load %arg3[%378, %c0_97, %c0_98] : memref<8x8x512xf32, #tpu.memory_space<vmem>>, vector<1x8x512xf32>
    %380 = vector.shape_cast %379 : vector<1x8x512xf32> to vector<8x512xf32>
    %381 = arith.truncf %362 : vector<8x128xf32> to vector<8x128xbf16>
    %c0_99 = arith.constant 0 : index
    %c0_100 = arith.constant 0 : index
    %382 = vector.load %arg7[%c0_99, %c0_100] : memref<128x512xbf16, #tpu.memory_space<vmem>>, vector<128x512xbf16>
    %cst_101 = arith.constant dense<0.000000e+00> : vector<8x512xf32>
    %383 = tpu.matmul %381, %382, %cst_101 {dimension_numbers = #tpu.dot_dimension_numbers<[1], [0], [0], [1], [0, 0, 1, 1], [], []>} : vector<8x128xbf16>, vector<128x512xbf16>, vector<8x512xf32> -> vector<8x512xf32>
    %384 = arith.addf %380, %383 : vector<8x512xf32>
    %385 = vector.extract_strided_slice %384 {offsets = [0, 0], sizes = [8, 128], strides = [1, 1]} : vector<8x512xf32> to vector<8x128xf32>
    %386 = arith.negf %385 : vector<8x128xf32>
    %387 = math.exp %386 : vector<8x128xf32>
    %cst_102 = arith.constant 1.000000e+00 : f32
    %388 = vector.broadcast %cst_102 : f32 to vector<8x128xf32>
    %389 = arith.addf %388, %387 : vector<8x128xf32>
    %390 = arith.divf %388, %389 : vector<8x128xf32>
    %391 = vector.extract_strided_slice %384 {offsets = [0, 128], sizes = [8, 128], strides = [1, 1]} : vector<8x512xf32> to vector<8x128xf32>
    %392 = arith.negf %391 : vector<8x128xf32>
    %393 = math.exp %392 : vector<8x128xf32>
    %cst_103 = arith.constant 1.000000e+00 : f32
    %394 = vector.broadcast %cst_103 : f32 to vector<8x128xf32>
    %395 = arith.addf %394, %393 : vector<8x128xf32>
    %396 = arith.divf %394, %395 : vector<8x128xf32>
    %397 = vector.extract_strided_slice %384 {offsets = [0, 256], sizes = [8, 128], strides = [1, 1]} : vector<8x512xf32> to vector<8x128xf32>
    %398 = math.tanh %397 : vector<8x128xf32>
    %399 = vector.extract_strided_slice %384 {offsets = [0, 384], sizes = [8, 128], strides = [1, 1]} : vector<8x512xf32> to vector<8x128xf32>
    %400 = arith.negf %399 : vector<8x128xf32>
    %401 = math.exp %400 : vector<8x128xf32>
    %cst_104 = arith.constant 1.000000e+00 : f32
    %402 = vector.broadcast %cst_104 : f32 to vector<8x128xf32>
    %403 = arith.addf %402, %401 : vector<8x128xf32>
    %404 = arith.divf %402, %403 : vector<8x128xf32>
    %405 = arith.mulf %396, %365 : vector<8x128xf32>
    %406 = arith.mulf %390, %398 : vector<8x128xf32>
    %407 = arith.addf %405, %406 : vector<8x128xf32>
    %408 = math.tanh %407 : vector<8x128xf32>
    %409 = arith.mulf %404, %408 : vector<8x128xf32>
    %410 = arith.addi %4, %c7_i32 : i32
    %411 = vector.broadcast %410 : i32 to vector<8x1xi32>
    %412 = arith.cmpi slt, %411, %3 : vector<8x1xi32>
    %413 = vector.shape_cast %412 : vector<8x1xi1> to vector<8x1xi1>
    %414 = vector.broadcast %413 : vector<8x1xi1> to vector<8x128xi1>
    %415 = arith.select %414, %409, %362 : vector<8x128xi1>, vector<8x128xf32>
    %416 = vector.shape_cast %412 : vector<8x1xi1> to vector<8x1xi1>
    %417 = vector.broadcast %416 : vector<8x1xi1> to vector<8x128xi1>
    %418 = arith.select %417, %407, %365 : vector<8x128xi1>, vector<8x128xf32>
    %419 = arith.index_cast %c7_i32 : i32 to index
    %c0_105 = arith.constant 0 : index
    %c0_106 = arith.constant 0 : index
    %420 = vector.load %arg4[%419, %c0_105, %c0_106] : memref<8x8x128xf32, #tpu.memory_space<vmem>>, vector<1x8x128xf32>
    %421 = vector.shape_cast %420 : vector<1x8x128xf32> to vector<8x128xf32>
    %cst_107 = arith.constant 0.000000e+00 : f32
    %422 = vector.shape_cast %412 : vector<8x1xi1> to vector<8x1xi1>
    %423 = vector.broadcast %422 : vector<8x1xi1> to vector<8x128xi1>
    %424 = vector.broadcast %cst_107 : f32 to vector<8x128xf32>
    %425 = arith.select %423, %409, %424 : vector<8x128xi1>, vector<8x128xf32>
    %426 = arith.addf %421, %425 : vector<8x128xf32>
    %427 = arith.index_cast %c7_i32 : i32 to index
    %c0_108 = arith.constant 0 : index
    %c0_109 = arith.constant 0 : index
    %428 = vector.load %arg8[%427, %c0_108, %c0_109] : memref<8x8x128xf32, #tpu.memory_space<vmem>>, vector<1x8x128xf32>
    %429 = vector.shape_cast %428 : vector<1x8x128xf32> to vector<8x128xf32>
    %430 = vector.shape_cast %426 : vector<8x128xf32> to vector<1x8x128xf32>
    tpu.vector_store %arg8[%427, %c0_108, %c0_109], %430 {strides = array<i32>} : memref<8x8x128xf32, #tpu.memory_space<vmem>>, vector<1x8x128xf32>,
    %c8_i32_110 = arith.constant 8 : i32
    %c0_111 = arith.constant 0 : index
    %c0_112 = arith.constant 0 : index
    %431 = vector.load %arg11[%c0_111, %c0_112] : memref<8x128xf32, #tpu.memory_space<vmem>>, vector<8x128xf32>
    tpu.vector_store %arg11[%c0_111, %c0_112], %415 {strides = array<i32>} : memref<8x128xf32, #tpu.memory_space<vmem>>, vector<8x128xf32>,
    %c0_113 = arith.constant 0 : index
    %c0_114 = arith.constant 0 : index
    %432 = vector.load %arg12[%c0_113, %c0_114] : memref<8x128xf32, #tpu.memory_space<vmem>>, vector<8x128xf32>
    tpu.vector_store %arg12[%c0_113, %c0_114], %418 {strides = array<i32>} : memref<8x128xf32, #tpu.memory_space<vmem>>, vector<8x128xf32>,
    %c0_i32_115 = arith.constant 0 : i32
    %433 = arith.cmpi eq, %arg1, %c0_i32_115 : i32
    %434 = arith.extui %433 : i1 to i32
    %c0_i32_116 = arith.constant 0 : i32
    %435 = arith.cmpi ne, %434, %c0_i32_116 : i32
    scf.if %435 {
      %c0_117 = arith.constant 0 : index
      %c0_118 = arith.constant 0 : index
      %436 = vector.load %arg9[%c0_117, %c0_118] : memref<8x128xf32, #tpu.memory_space<vmem>>, vector<8x128xf32>
      tpu.vector_store %arg9[%c0_117, %c0_118], %415 {strides = array<i32>} : memref<8x128xf32, #tpu.memory_space<vmem>>, vector<8x128xf32>,
      %c0_119 = arith.constant 0 : index
      %c0_120 = arith.constant 0 : index
      %437 = vector.load %arg10[%c0_119, %c0_120] : memref<8x128xf32, #tpu.memory_space<vmem>>, vector<8x128xf32>
      tpu.vector_store %arg10[%c0_119, %c0_120], %418 {strides = array<i32>} : memref<8x128xf32, #tpu.memory_space<vmem>>, vector<8x128xf32>,
    } else {
    }
    return
  }
  func.func @transform_0(%arg0: i32, %arg1: i32) -> (i32, i32) {
    %c0_i32 = arith.constant 0 : i32
    %c0_i32_0 = arith.constant 0 : i32
    return %arg0, %c0_i32 : i32, i32
  }
  func.func @transform_1(%arg0: i32, %arg1: i32) -> (i32, i32, i32) {
    %c0_i32 = arith.constant 0 : i32
    %c0_i32_0 = arith.constant 0 : i32
    return %arg1, %arg0, %c0_i32 : i32, i32, i32
  }
  func.func @transform_2(%arg0: i32, %arg1: i32) -> (i32, i32, i32) {
    %c0_i32 = arith.constant 0 : i32
    %c0_i32_0 = arith.constant 0 : i32
    return %arg1, %arg0, %c0_i32 : i32, i32, i32
  }
  func.func @transform_3(%arg0: i32, %arg1: i32) -> (i32, i32) {
    %c0_i32 = arith.constant 0 : i32
    %c0_i32_0 = arith.constant 0 : i32
    return %arg0, %c0_i32 : i32, i32
  }
  func.func @transform_4(%arg0: i32, %arg1: i32) -> (i32, i32) {
    %c0_i32 = arith.constant 0 : i32
    %c0_i32_0 = arith.constant 0 : i32
    return %arg0, %c0_i32 : i32, i32
  }
  func.func @transform_5(%arg0: i32, %arg1: i32) -> (i32, i32) {
    %c0_i32 = arith.constant 0 : i32
    %c0_i32_0 = arith.constant 0 : i32
    %c0_i32_1 = arith.constant 0 : i32
    return %c0_i32, %c0_i32_0 : i32, i32
  }
  func.func @transform_6(%arg0: i32, %arg1: i32) -> (i32, i32, i32) {
    %c0_i32 = arith.constant 0 : i32
    %c0_i32_0 = arith.constant 0 : i32
    return %arg1, %arg0, %c0_i32 : i32, i32, i32
  }
  func.func @transform_7(%arg0: i32, %arg1: i32) -> (i32, i32) {
    %c0_i32 = arith.constant 0 : i32
    %c0_i32_0 = arith.constant 0 : i32
    return %arg0, %c0_i32 : i32, i32
  }
  func.func @transform_8(%arg0: i32, %arg1: i32) -> (i32, i32) {
    %c0_i32 = arith.constant 0 : i32
    %c0_i32_0 = arith.constant 0 : i32
    return %arg0, %c0_i32 : i32, i32
  }
}

module attributes {stable_mosaic.version = 11 : i64} {
  func.func @_lstm_chunk_kernel(%arg0: i32, %arg1: i32, %arg2: memref<8x1xi32, #tpu.memory_space<vmem>>, %arg3: memref<8x8x512xf32, #tpu.memory_space<vmem>>, %arg4: memref<8x8x128xf32, #tpu.memory_space<vmem>>, %arg5: memref<8x128xf32, #tpu.memory_space<vmem>>, %arg6: memref<8x128xf32, #tpu.memory_space<vmem>>, %arg7: memref<128x512xbf16, #tpu.memory_space<vmem>>, %arg8: memref<8x8x128xf32, #tpu.memory_space<vmem>>, %arg9: memref<8x128xf32, #tpu.memory_space<vmem>>, %arg10: memref<8x128xf32, #tpu.memory_space<vmem>>, %arg11: memref<8x128xf32, #tpu.memory_space<vmem>>, %arg12: memref<8x128xf32, #tpu.memory_space<vmem>>) attributes {dimension_semantics = [#tpu.dimension_semantics<parallel>, #tpu.dimension_semantics<arbitrary>], iteration_bounds = array<i64: 1, 1>, scalar_prefetch = 0 : i64, scratch_operands = 2 : i64, tpu.core_type = #tpu.core_type<tc>, window_params = [{transform_indices = @transform_0, window_bounds = array<i64: 8, 1>}, {transform_indices = @transform_1, window_bounds = array<i64: 8, 8, 512>}, {transform_indices = @transform_2, window_bounds = array<i64: 8, 8, 128>}, {transform_indices = @transform_3, window_bounds = array<i64: 8, 128>}, {transform_indices = @transform_4, window_bounds = array<i64: 8, 128>}, {pipeline_mode = #tpu.pipeline_mode<synchronous>, transform_indices = @transform_5, window_bounds = array<i64: 128, 512>}, {transform_indices = @transform_6, window_bounds = array<i64: 8, 8, 128>}, {transform_indices = @transform_7, window_bounds = array<i64: 8, 128>}, {transform_indices = @transform_8, window_bounds = array<i64: 8, 128>}]} {
    %c0_i32 = arith.constant 0 : i32
    %0 = arith.cmpi eq, %arg1, %c0_i32 : i32
    %1 = arith.extui %0 : i1 to i32
    %c0_i32_0 = arith.constant 0 : i32
    %2 = arith.cmpi ne, %1, %c0_i32_0 : i32
    scf.if %2 {
      %c0_117 = arith.constant 0 : index
      %c0_118 = arith.constant 0 : index
      %436 = vector.load %arg5[%c0_117, %c0_118] : memref<8x128xf32, #tpu.memory_space<vmem>>, vector<8x128xf32>
      %c0_119 = arith.constant 0 : index
      %c0_120 = arith.constant 0 : index
      %437 = vector.load %arg11[%c0_119, %c0_120] : memref<8x128xf32, #tpu.memory_space<vmem>>, vector<8x128xf32>
      tpu.vector_store %arg11[%c0_119, %c0_120], %436 {strides = array<i32>} : memref<8x128xf32, #tpu.memory_space<vmem>>, vector<8x128xf32>,
      %c0_121 = arith.constant 0 : index
      %c0_122 = arith.constant 0 : index
      %438 = vector.load %arg6[%c0_121, %c0_122] : memref<8x128xf32, #tpu.memory_space<vmem>>, vector<8x128xf32>
      %c0_123 = arith.constant 0 : index
      %c0_124 = arith.constant 0 : index
      %439 = vector.load %arg12[%c0_123, %c0_124] : memref<8x128xf32, #tpu.memory_space<vmem>>, vector<8x128xf32>
      tpu.vector_store %arg12[%c0_123, %c0_124], %438 {strides = array<i32>} : memref<8x128xf32, #tpu.memory_space<vmem>>, vector<8x128xf32>,
    } else {
    }
    %c0 = arith.constant 0 : index
    %c0_1 = arith.constant 0 : index
    %3 = vector.load %arg2[%c0, %c0_1] : memref<8x1xi32, #tpu.memory_space<vmem>>, vector<8x1xi32>
    %c8_i32 = arith.constant 8 : i32
    %4 = arith.muli %arg1, %c8_i32 : i32
    %c0_2 = arith.constant 0 : index
    %c0_3 = arith.constant 0 : index
    %5 = vector.load %arg11[%c0_2, %c0_3] : memref<8x128xf32, #tpu.memory_space<vmem>>, vector<8x128xf32>
    %c0_4 = arith.constant 0 : index
    %c0_5 = arith.constant 0 : index
    %6 = vector.load %arg12[%c0_4, %c0_5] : memref<8x128xf32, #tpu.memory_space<vmem>>, vector<8x128xf32>
    %c0_i32_6 = arith.constant 0 : i32
    %7 = arith.index_cast %c0_i32_6 : i32 to index
    %c0_7 = arith.constant 0 : index
    %c0_8 = arith.constant 0 : index
    %8 = vector.load %arg3[%7, %c0_7, %c0_8] : memref<8x8x512xf32, #tpu.memory_space<vmem>>, vector<1x8x512xf32>
    %9 = vector.shape_cast %8 : vector<1x8x512xf32> to vector<8x512xf32>
    %10 = arith.truncf %5 : vector<8x128xf32> to vector<8x128xbf16>
    %c0_9 = arith.constant 0 : index
    %c0_10 = arith.constant 0 : index
    %11 = vector.load %arg7[%c0_9, %c0_10] : memref<128x512xbf16, #tpu.memory_space<vmem>>, vector<128x512xbf16>
    %cst = arith.constant dense<0.000000e+00> : vector<8x512xf32>
    %12 = tpu.matmul %10, %11, %cst {dimension_numbers = #tpu.dot_dimension_numbers<[1], [0], [0], [1], [0, 0, 1, 1], [], []>} : vector<8x128xbf16>, vector<128x512xbf16>, vector<8x512xf32> -> vector<8x512xf32>
    %13 = arith.addf %9, %12 : vector<8x512xf32>
    %14 = vector.extract_strided_slice %13 {offsets = [0, 0], sizes = [8, 128], strides = [1, 1]} : vector<8x512xf32> to vector<8x128xf32>
    %15 = arith.negf %14 : vector<8x128xf32>
    %16 = math.exp %15 : vector<8x128xf32>
    %cst_11 = arith.constant 1.000000e+00 : f32
    %17 = vector.broadcast %cst_11 : f32 to vector<8x128xf32>
    %18 = arith.addf %17, %16 : vector<8x128xf32>
    %19 = arith.divf %17, %18 : vector<8x128xf32>
    %20 = vector.extract_strided_slice %13 {offsets = [0, 128], sizes = [8, 128], strides = [1, 1]} : vector<8x512xf32> to vector<8x128xf32>
    %21 = arith.negf %20 : vector<8x128xf32>
    %22 = math.exp %21 : vector<8x128xf32>
    %cst_12 = arith.constant 1.000000e+00 : f32
    %23 = vector.broadcast %cst_12 : f32 to vector<8x128xf32>
    %24 = arith.addf %23, %22 : vector<8x128xf32>
    %25 = arith.divf %23, %24 : vector<8x128xf32>
    %26 = vector.extract_strided_slice %13 {offsets = [0, 256], sizes = [8, 128], strides = [1, 1]} : vector<8x512xf32> to vector<8x128xf32>
    %27 = math.tanh %26 : vector<8x128xf32>
    %28 = vector.extract_strided_slice %13 {offsets = [0, 384], sizes = [8, 128], strides = [1, 1]} : vector<8x512xf32> to vector<8x128xf32>
    %29 = arith.negf %28 : vector<8x128xf32>
    %30 = math.exp %29 : vector<8x128xf32>
    %cst_13 = arith.constant 1.000000e+00 : f32
    %31 = vector.broadcast %cst_13 : f32 to vector<8x128xf32>
    %32 = arith.addf %31, %30 : vector<8x128xf32>
    %33 = arith.divf %31, %32 : vector<8x128xf32>
    %34 = arith.mulf %25, %6 : vector<8x128xf32>
    %35 = arith.mulf %19, %27 : vector<8x128xf32>
    %36 = arith.addf %34, %35 : vector<8x128xf32>
    %37 = math.tanh %36 : vector<8x128xf32>
    %38 = arith.mulf %33, %37 : vector<8x128xf32>
    %39 = arith.addi %4, %c0_i32_6 : i32
    %40 = vector.broadcast %39 : i32 to vector<8x1xi32>
    %41 = arith.cmpi slt, %40, %3 : vector<8x1xi32>
    %42 = vector.shape_cast %41 : vector<8x1xi1> to vector<8x1xi1>
    %43 = vector.broadcast %42 : vector<8x1xi1> to vector<8x128xi1>
    %44 = arith.select %43, %38, %5 : vector<8x128xi1>, vector<8x128xf32>
    %45 = vector.shape_cast %41 : vector<8x1xi1> to vector<8x1xi1>
    %46 = vector.broadcast %45 : vector<8x1xi1> to vector<8x128xi1>
    %47 = arith.select %46, %36, %6 : vector<8x128xi1>, vector<8x128xf32>
    %48 = arith.index_cast %c0_i32_6 : i32 to index
    %c0_14 = arith.constant 0 : index
    %c0_15 = arith.constant 0 : index
    %49 = vector.load %arg4[%48, %c0_14, %c0_15] : memref<8x8x128xf32, #tpu.memory_space<vmem>>, vector<1x8x128xf32>
    %50 = vector.shape_cast %49 : vector<1x8x128xf32> to vector<8x128xf32>
    %cst_16 = arith.constant 0.000000e+00 : f32
    %51 = vector.shape_cast %41 : vector<8x1xi1> to vector<8x1xi1>
    %52 = vector.broadcast %51 : vector<8x1xi1> to vector<8x128xi1>
    %53 = vector.broadcast %cst_16 : f32 to vector<8x128xf32>
    %54 = arith.select %52, %38, %53 : vector<8x128xi1>, vector<8x128xf32>
    %55 = arith.addf %50, %54 : vector<8x128xf32>
    %56 = arith.index_cast %c0_i32_6 : i32 to index
    %c0_17 = arith.constant 0 : index
    %c0_18 = arith.constant 0 : index
    %57 = vector.load %arg8[%56, %c0_17, %c0_18] : memref<8x8x128xf32, #tpu.memory_space<vmem>>, vector<1x8x128xf32>
    %58 = vector.shape_cast %57 : vector<1x8x128xf32> to vector<8x128xf32>
    %59 = vector.shape_cast %55 : vector<8x128xf32> to vector<1x8x128xf32>
    tpu.vector_store %arg8[%56, %c0_17, %c0_18], %59 {strides = array<i32>} : memref<8x8x128xf32, #tpu.memory_space<vmem>>, vector<1x8x128xf32>,
    %c1_i32 = arith.constant 1 : i32
    %60 = arith.index_cast %c1_i32 : i32 to index
    %c0_19 = arith.constant 0 : index
    %c0_20 = arith.constant 0 : index
    %61 = vector.load %arg3[%60, %c0_19, %c0_20] : memref<8x8x512xf32, #tpu.memory_space<vmem>>, vector<1x8x512xf32>
    %62 = vector.shape_cast %61 : vector<1x8x512xf32> to vector<8x512xf32>
    %63 = arith.truncf %44 : vector<8x128xf32> to vector<8x128xbf16>
    %c0_21 = arith.constant 0 : index
    %c0_22 = arith.constant 0 : index
    %64 = vector.load %arg7[%c0_21, %c0_22] : memref<128x512xbf16, #tpu.memory_space<vmem>>, vector<128x512xbf16>
    %cst_23 = arith.constant dense<0.000000e+00> : vector<8x512xf32>
    %65 = tpu.matmul %63, %64, %cst_23 {dimension_numbers = #tpu.dot_dimension_numbers<[1], [0], [0], [1], [0, 0, 1, 1], [], []>} : vector<8x128xbf16>, vector<128x512xbf16>, vector<8x512xf32> -> vector<8x512xf32>
    %66 = arith.addf %62, %65 : vector<8x512xf32>
    %67 = vector.extract_strided_slice %66 {offsets = [0, 0], sizes = [8, 128], strides = [1, 1]} : vector<8x512xf32> to vector<8x128xf32>
    %68 = arith.negf %67 : vector<8x128xf32>
    %69 = math.exp %68 : vector<8x128xf32>
    %cst_24 = arith.constant 1.000000e+00 : f32
    %70 = vector.broadcast %cst_24 : f32 to vector<8x128xf32>
    %71 = arith.addf %70, %69 : vector<8x128xf32>
    %72 = arith.divf %70, %71 : vector<8x128xf32>
    %73 = vector.extract_strided_slice %66 {offsets = [0, 128], sizes = [8, 128], strides = [1, 1]} : vector<8x512xf32> to vector<8x128xf32>
    %74 = arith.negf %73 : vector<8x128xf32>
    %75 = math.exp %74 : vector<8x128xf32>
    %cst_25 = arith.constant 1.000000e+00 : f32
    %76 = vector.broadcast %cst_25 : f32 to vector<8x128xf32>
    %77 = arith.addf %76, %75 : vector<8x128xf32>
    %78 = arith.divf %76, %77 : vector<8x128xf32>
    %79 = vector.extract_strided_slice %66 {offsets = [0, 256], sizes = [8, 128], strides = [1, 1]} : vector<8x512xf32> to vector<8x128xf32>
    %80 = math.tanh %79 : vector<8x128xf32>
    %81 = vector.extract_strided_slice %66 {offsets = [0, 384], sizes = [8, 128], strides = [1, 1]} : vector<8x512xf32> to vector<8x128xf32>
    %82 = arith.negf %81 : vector<8x128xf32>
    %83 = math.exp %82 : vector<8x128xf32>
    %cst_26 = arith.constant 1.000000e+00 : f32
    %84 = vector.broadcast %cst_26 : f32 to vector<8x128xf32>
    %85 = arith.addf %84, %83 : vector<8x128xf32>
    %86 = arith.divf %84, %85 : vector<8x128xf32>
    %87 = arith.mulf %78, %47 : vector<8x128xf32>
    %88 = arith.mulf %72, %80 : vector<8x128xf32>
    %89 = arith.addf %87, %88 : vector<8x128xf32>
    %90 = math.tanh %89 : vector<8x128xf32>
    %91 = arith.mulf %86, %90 : vector<8x128xf32>
    %92 = arith.addi %4, %c1_i32 : i32
    %93 = vector.broadcast %92 : i32 to vector<8x1xi32>
    %94 = arith.cmpi slt, %93, %3 : vector<8x1xi32>
    %95 = vector.shape_cast %94 : vector<8x1xi1> to vector<8x1xi1>
    %96 = vector.broadcast %95 : vector<8x1xi1> to vector<8x128xi1>
    %97 = arith.select %96, %91, %44 : vector<8x128xi1>, vector<8x128xf32>
    %98 = vector.shape_cast %94 : vector<8x1xi1> to vector<8x1xi1>
    %99 = vector.broadcast %98 : vector<8x1xi1> to vector<8x128xi1>
    %100 = arith.select %99, %89, %47 : vector<8x128xi1>, vector<8x128xf32>
    %101 = arith.index_cast %c1_i32 : i32 to index
    %c0_27 = arith.constant 0 : index
    %c0_28 = arith.constant 0 : index
    %102 = vector.load %arg4[%101, %c0_27, %c0_28] : memref<8x8x128xf32, #tpu.memory_space<vmem>>, vector<1x8x128xf32>
    %103 = vector.shape_cast %102 : vector<1x8x128xf32> to vector<8x128xf32>
    %cst_29 = arith.constant 0.000000e+00 : f32
    %104 = vector.shape_cast %94 : vector<8x1xi1> to vector<8x1xi1>
    %105 = vector.broadcast %104 : vector<8x1xi1> to vector<8x128xi1>
    %106 = vector.broadcast %cst_29 : f32 to vector<8x128xf32>
    %107 = arith.select %105, %91, %106 : vector<8x128xi1>, vector<8x128xf32>
    %108 = arith.addf %103, %107 : vector<8x128xf32>
    %109 = arith.index_cast %c1_i32 : i32 to index
    %c0_30 = arith.constant 0 : index
    %c0_31 = arith.constant 0 : index
    %110 = vector.load %arg8[%109, %c0_30, %c0_31] : memref<8x8x128xf32, #tpu.memory_space<vmem>>, vector<1x8x128xf32>
    %111 = vector.shape_cast %110 : vector<1x8x128xf32> to vector<8x128xf32>
    %112 = vector.shape_cast %108 : vector<8x128xf32> to vector<1x8x128xf32>
    tpu.vector_store %arg8[%109, %c0_30, %c0_31], %112 {strides = array<i32>} : memref<8x8x128xf32, #tpu.memory_space<vmem>>, vector<1x8x128xf32>,
    %c2_i32 = arith.constant 2 : i32
    %113 = arith.index_cast %c2_i32 : i32 to index
    %c0_32 = arith.constant 0 : index
    %c0_33 = arith.constant 0 : index
    %114 = vector.load %arg3[%113, %c0_32, %c0_33] : memref<8x8x512xf32, #tpu.memory_space<vmem>>, vector<1x8x512xf32>
    %115 = vector.shape_cast %114 : vector<1x8x512xf32> to vector<8x512xf32>
    %116 = arith.truncf %97 : vector<8x128xf32> to vector<8x128xbf16>
    %c0_34 = arith.constant 0 : index
    %c0_35 = arith.constant 0 : index
    %117 = vector.load %arg7[%c0_34, %c0_35] : memref<128x512xbf16, #tpu.memory_space<vmem>>, vector<128x512xbf16>
    %cst_36 = arith.constant dense<0.000000e+00> : vector<8x512xf32>
    %118 = tpu.matmul %116, %117, %cst_36 {dimension_numbers = #tpu.dot_dimension_numbers<[1], [0], [0], [1], [0, 0, 1, 1], [], []>} : vector<8x128xbf16>, vector<128x512xbf16>, vector<8x512xf32> -> vector<8x512xf32>
    %119 = arith.addf %115, %118 : vector<8x512xf32>
    %120 = vector.extract_strided_slice %119 {offsets = [0, 0], sizes = [8, 128], strides = [1, 1]} : vector<8x512xf32> to vector<8x128xf32>
    %121 = arith.negf %120 : vector<8x128xf32>
    %122 = math.exp %121 : vector<8x128xf32>
    %cst_37 = arith.constant 1.000000e+00 : f32
    %123 = vector.broadcast %cst_37 : f32 to vector<8x128xf32>
    %124 = arith.addf %123, %122 : vector<8x128xf32>
    %125 = arith.divf %123, %124 : vector<8x128xf32>
    %126 = vector.extract_strided_slice %119 {offsets = [0, 128], sizes = [8, 128], strides = [1, 1]} : vector<8x512xf32> to vector<8x128xf32>
    %127 = arith.negf %126 : vector<8x128xf32>
    %128 = math.exp %127 : vector<8x128xf32>
    %cst_38 = arith.constant 1.000000e+00 : f32
    %129 = vector.broadcast %cst_38 : f32 to vector<8x128xf32>
    %130 = arith.addf %129, %128 : vector<8x128xf32>
    %131 = arith.divf %129, %130 : vector<8x128xf32>
    %132 = vector.extract_strided_slice %119 {offsets = [0, 256], sizes = [8, 128], strides = [1, 1]} : vector<8x512xf32> to vector<8x128xf32>
    %133 = math.tanh %132 : vector<8x128xf32>
    %134 = vector.extract_strided_slice %119 {offsets = [0, 384], sizes = [8, 128], strides = [1, 1]} : vector<8x512xf32> to vector<8x128xf32>
    %135 = arith.negf %134 : vector<8x128xf32>
    %136 = math.exp %135 : vector<8x128xf32>
    %cst_39 = arith.constant 1.000000e+00 : f32
    %137 = vector.broadcast %cst_39 : f32 to vector<8x128xf32>
    %138 = arith.addf %137, %136 : vector<8x128xf32>
    %139 = arith.divf %137, %138 : vector<8x128xf32>
    %140 = arith.mulf %131, %100 : vector<8x128xf32>
    %141 = arith.mulf %125, %133 : vector<8x128xf32>
    %142 = arith.addf %140, %141 : vector<8x128xf32>
    %143 = math.tanh %142 : vector<8x128xf32>
    %144 = arith.mulf %139, %143 : vector<8x128xf32>
    %145 = arith.addi %4, %c2_i32 : i32
    %146 = vector.broadcast %145 : i32 to vector<8x1xi32>
    %147 = arith.cmpi slt, %146, %3 : vector<8x1xi32>
    %148 = vector.shape_cast %147 : vector<8x1xi1> to vector<8x1xi1>
    %149 = vector.broadcast %148 : vector<8x1xi1> to vector<8x128xi1>
    %150 = arith.select %149, %144, %97 : vector<8x128xi1>, vector<8x128xf32>
    %151 = vector.shape_cast %147 : vector<8x1xi1> to vector<8x1xi1>
    %152 = vector.broadcast %151 : vector<8x1xi1> to vector<8x128xi1>
    %153 = arith.select %152, %142, %100 : vector<8x128xi1>, vector<8x128xf32>
    %154 = arith.index_cast %c2_i32 : i32 to index
    %c0_40 = arith.constant 0 : index
    %c0_41 = arith.constant 0 : index
    %155 = vector.load %arg4[%154, %c0_40, %c0_41] : memref<8x8x128xf32, #tpu.memory_space<vmem>>, vector<1x8x128xf32>
    %156 = vector.shape_cast %155 : vector<1x8x128xf32> to vector<8x128xf32>
    %cst_42 = arith.constant 0.000000e+00 : f32
    %157 = vector.shape_cast %147 : vector<8x1xi1> to vector<8x1xi1>
    %158 = vector.broadcast %157 : vector<8x1xi1> to vector<8x128xi1>
    %159 = vector.broadcast %cst_42 : f32 to vector<8x128xf32>
    %160 = arith.select %158, %144, %159 : vector<8x128xi1>, vector<8x128xf32>
    %161 = arith.addf %156, %160 : vector<8x128xf32>
    %162 = arith.index_cast %c2_i32 : i32 to index
    %c0_43 = arith.constant 0 : index
    %c0_44 = arith.constant 0 : index
    %163 = vector.load %arg8[%162, %c0_43, %c0_44] : memref<8x8x128xf32, #tpu.memory_space<vmem>>, vector<1x8x128xf32>
    %164 = vector.shape_cast %163 : vector<1x8x128xf32> to vector<8x128xf32>
    %165 = vector.shape_cast %161 : vector<8x128xf32> to vector<1x8x128xf32>
    tpu.vector_store %arg8[%162, %c0_43, %c0_44], %165 {strides = array<i32>} : memref<8x8x128xf32, #tpu.memory_space<vmem>>, vector<1x8x128xf32>,
    %c3_i32 = arith.constant 3 : i32
    %166 = arith.index_cast %c3_i32 : i32 to index
    %c0_45 = arith.constant 0 : index
    %c0_46 = arith.constant 0 : index
    %167 = vector.load %arg3[%166, %c0_45, %c0_46] : memref<8x8x512xf32, #tpu.memory_space<vmem>>, vector<1x8x512xf32>
    %168 = vector.shape_cast %167 : vector<1x8x512xf32> to vector<8x512xf32>
    %169 = arith.truncf %150 : vector<8x128xf32> to vector<8x128xbf16>
    %c0_47 = arith.constant 0 : index
    %c0_48 = arith.constant 0 : index
    %170 = vector.load %arg7[%c0_47, %c0_48] : memref<128x512xbf16, #tpu.memory_space<vmem>>, vector<128x512xbf16>
    %cst_49 = arith.constant dense<0.000000e+00> : vector<8x512xf32>
    %171 = tpu.matmul %169, %170, %cst_49 {dimension_numbers = #tpu.dot_dimension_numbers<[1], [0], [0], [1], [0, 0, 1, 1], [], []>} : vector<8x128xbf16>, vector<128x512xbf16>, vector<8x512xf32> -> vector<8x512xf32>
    %172 = arith.addf %168, %171 : vector<8x512xf32>
    %173 = vector.extract_strided_slice %172 {offsets = [0, 0], sizes = [8, 128], strides = [1, 1]} : vector<8x512xf32> to vector<8x128xf32>
    %174 = arith.negf %173 : vector<8x128xf32>
    %175 = math.exp %174 : vector<8x128xf32>
    %cst_50 = arith.constant 1.000000e+00 : f32
    %176 = vector.broadcast %cst_50 : f32 to vector<8x128xf32>
    %177 = arith.addf %176, %175 : vector<8x128xf32>
    %178 = arith.divf %176, %177 : vector<8x128xf32>
    %179 = vector.extract_strided_slice %172 {offsets = [0, 128], sizes = [8, 128], strides = [1, 1]} : vector<8x512xf32> to vector<8x128xf32>
    %180 = arith.negf %179 : vector<8x128xf32>
    %181 = math.exp %180 : vector<8x128xf32>
    %cst_51 = arith.constant 1.000000e+00 : f32
    %182 = vector.broadcast %cst_51 : f32 to vector<8x128xf32>
    %183 = arith.addf %182, %181 : vector<8x128xf32>
    %184 = arith.divf %182, %183 : vector<8x128xf32>
    %185 = vector.extract_strided_slice %172 {offsets = [0, 256], sizes = [8, 128], strides = [1, 1]} : vector<8x512xf32> to vector<8x128xf32>
    %186 = math.tanh %185 : vector<8x128xf32>
    %187 = vector.extract_strided_slice %172 {offsets = [0, 384], sizes = [8, 128], strides = [1, 1]} : vector<8x512xf32> to vector<8x128xf32>
    %188 = arith.negf %187 : vector<8x128xf32>
    %189 = math.exp %188 : vector<8x128xf32>
    %cst_52 = arith.constant 1.000000e+00 : f32
    %190 = vector.broadcast %cst_52 : f32 to vector<8x128xf32>
    %191 = arith.addf %190, %189 : vector<8x128xf32>
    %192 = arith.divf %190, %191 : vector<8x128xf32>
    %193 = arith.mulf %184, %153 : vector<8x128xf32>
    %194 = arith.mulf %178, %186 : vector<8x128xf32>
    %195 = arith.addf %193, %194 : vector<8x128xf32>
    %196 = math.tanh %195 : vector<8x128xf32>
    %197 = arith.mulf %192, %196 : vector<8x128xf32>
    %198 = arith.addi %4, %c3_i32 : i32
    %199 = vector.broadcast %198 : i32 to vector<8x1xi32>
    %200 = arith.cmpi slt, %199, %3 : vector<8x1xi32>
    %201 = vector.shape_cast %200 : vector<8x1xi1> to vector<8x1xi1>
    %202 = vector.broadcast %201 : vector<8x1xi1> to vector<8x128xi1>
    %203 = arith.select %202, %197, %150 : vector<8x128xi1>, vector<8x128xf32>
    %204 = vector.shape_cast %200 : vector<8x1xi1> to vector<8x1xi1>
    %205 = vector.broadcast %204 : vector<8x1xi1> to vector<8x128xi1>
    %206 = arith.select %205, %195, %153 : vector<8x128xi1>, vector<8x128xf32>
    %207 = arith.index_cast %c3_i32 : i32 to index
    %c0_53 = arith.constant 0 : index
    %c0_54 = arith.constant 0 : index
    %208 = vector.load %arg4[%207, %c0_53, %c0_54] : memref<8x8x128xf32, #tpu.memory_space<vmem>>, vector<1x8x128xf32>
    %209 = vector.shape_cast %208 : vector<1x8x128xf32> to vector<8x128xf32>
    %cst_55 = arith.constant 0.000000e+00 : f32
    %210 = vector.shape_cast %200 : vector<8x1xi1> to vector<8x1xi1>
    %211 = vector.broadcast %210 : vector<8x1xi1> to vector<8x128xi1>
    %212 = vector.broadcast %cst_55 : f32 to vector<8x128xf32>
    %213 = arith.select %211, %197, %212 : vector<8x128xi1>, vector<8x128xf32>
    %214 = arith.addf %209, %213 : vector<8x128xf32>
    %215 = arith.index_cast %c3_i32 : i32 to index
    %c0_56 = arith.constant 0 : index
    %c0_57 = arith.constant 0 : index
    %216 = vector.load %arg8[%215, %c0_56, %c0_57] : memref<8x8x128xf32, #tpu.memory_space<vmem>>, vector<1x8x128xf32>
    %217 = vector.shape_cast %216 : vector<1x8x128xf32> to vector<8x128xf32>
    %218 = vector.shape_cast %214 : vector<8x128xf32> to vector<1x8x128xf32>
    tpu.vector_store %arg8[%215, %c0_56, %c0_57], %218 {strides = array<i32>} : memref<8x8x128xf32, #tpu.memory_space<vmem>>, vector<1x8x128xf32>,
    %c4_i32 = arith.constant 4 : i32
    %219 = arith.index_cast %c4_i32 : i32 to index
    %c0_58 = arith.constant 0 : index
    %c0_59 = arith.constant 0 : index
    %220 = vector.load %arg3[%219, %c0_58, %c0_59] : memref<8x8x512xf32, #tpu.memory_space<vmem>>, vector<1x8x512xf32>
    %221 = vector.shape_cast %220 : vector<1x8x512xf32> to vector<8x512xf32>
    %222 = arith.truncf %203 : vector<8x128xf32> to vector<8x128xbf16>
    %c0_60 = arith.constant 0 : index
    %c0_61 = arith.constant 0 : index
    %223 = vector.load %arg7[%c0_60, %c0_61] : memref<128x512xbf16, #tpu.memory_space<vmem>>, vector<128x512xbf16>
    %cst_62 = arith.constant dense<0.000000e+00> : vector<8x512xf32>
    %224 = tpu.matmul %222, %223, %cst_62 {dimension_numbers = #tpu.dot_dimension_numbers<[1], [0], [0], [1], [0, 0, 1, 1], [], []>} : vector<8x128xbf16>, vector<128x512xbf16>, vector<8x512xf32> -> vector<8x512xf32>
    %225 = arith.addf %221, %224 : vector<8x512xf32>
    %226 = vector.extract_strided_slice %225 {offsets = [0, 0], sizes = [8, 128], strides = [1, 1]} : vector<8x512xf32> to vector<8x128xf32>
    %227 = arith.negf %226 : vector<8x128xf32>
    %228 = math.exp %227 : vector<8x128xf32>
    %cst_63 = arith.constant 1.000000e+00 : f32
    %229 = vector.broadcast %cst_63 : f32 to vector<8x128xf32>
    %230 = arith.addf %229, %228 : vector<8x128xf32>
    %231 = arith.divf %229, %230 : vector<8x128xf32>
    %232 = vector.extract_strided_slice %225 {offsets = [0, 128], sizes = [8, 128], strides = [1, 1]} : vector<8x512xf32> to vector<8x128xf32>
    %233 = arith.negf %232 : vector<8x128xf32>
    %234 = math.exp %233 : vector<8x128xf32>
    %cst_64 = arith.constant 1.000000e+00 : f32
    %235 = vector.broadcast %cst_64 : f32 to vector<8x128xf32>
    %236 = arith.addf %235, %234 : vector<8x128xf32>
    %237 = arith.divf %235, %236 : vector<8x128xf32>
    %238 = vector.extract_strided_slice %225 {offsets = [0, 256], sizes = [8, 128], strides = [1, 1]} : vector<8x512xf32> to vector<8x128xf32>
    %239 = math.tanh %238 : vector<8x128xf32>
    %240 = vector.extract_strided_slice %225 {offsets = [0, 384], sizes = [8, 128], strides = [1, 1]} : vector<8x512xf32> to vector<8x128xf32>
    %241 = arith.negf %240 : vector<8x128xf32>
    %242 = math.exp %241 : vector<8x128xf32>
    %cst_65 = arith.constant 1.000000e+00 : f32
    %243 = vector.broadcast %cst_65 : f32 to vector<8x128xf32>
    %244 = arith.addf %243, %242 : vector<8x128xf32>
    %245 = arith.divf %243, %244 : vector<8x128xf32>
    %246 = arith.mulf %237, %206 : vector<8x128xf32>
    %247 = arith.mulf %231, %239 : vector<8x128xf32>
    %248 = arith.addf %246, %247 : vector<8x128xf32>
    %249 = math.tanh %248 : vector<8x128xf32>
    %250 = arith.mulf %245, %249 : vector<8x128xf32>
    %251 = arith.addi %4, %c4_i32 : i32
    %252 = vector.broadcast %251 : i32 to vector<8x1xi32>
    %253 = arith.cmpi slt, %252, %3 : vector<8x1xi32>
    %254 = vector.shape_cast %253 : vector<8x1xi1> to vector<8x1xi1>
    %255 = vector.broadcast %254 : vector<8x1xi1> to vector<8x128xi1>
    %256 = arith.select %255, %250, %203 : vector<8x128xi1>, vector<8x128xf32>
    %257 = vector.shape_cast %253 : vector<8x1xi1> to vector<8x1xi1>
    %258 = vector.broadcast %257 : vector<8x1xi1> to vector<8x128xi1>
    %259 = arith.select %258, %248, %206 : vector<8x128xi1>, vector<8x128xf32>
    %260 = arith.index_cast %c4_i32 : i32 to index
    %c0_66 = arith.constant 0 : index
    %c0_67 = arith.constant 0 : index
    %261 = vector.load %arg4[%260, %c0_66, %c0_67] : memref<8x8x128xf32, #tpu.memory_space<vmem>>, vector<1x8x128xf32>
    %262 = vector.shape_cast %261 : vector<1x8x128xf32> to vector<8x128xf32>
    %cst_68 = arith.constant 0.000000e+00 : f32
    %263 = vector.shape_cast %253 : vector<8x1xi1> to vector<8x1xi1>
    %264 = vector.broadcast %263 : vector<8x1xi1> to vector<8x128xi1>
    %265 = vector.broadcast %cst_68 : f32 to vector<8x128xf32>
    %266 = arith.select %264, %250, %265 : vector<8x128xi1>, vector<8x128xf32>
    %267 = arith.addf %262, %266 : vector<8x128xf32>
    %268 = arith.index_cast %c4_i32 : i32 to index
    %c0_69 = arith.constant 0 : index
    %c0_70 = arith.constant 0 : index
    %269 = vector.load %arg8[%268, %c0_69, %c0_70] : memref<8x8x128xf32, #tpu.memory_space<vmem>>, vector<1x8x128xf32>
    %270 = vector.shape_cast %269 : vector<1x8x128xf32> to vector<8x128xf32>
    %271 = vector.shape_cast %267 : vector<8x128xf32> to vector<1x8x128xf32>
    tpu.vector_store %arg8[%268, %c0_69, %c0_70], %271 {strides = array<i32>} : memref<8x8x128xf32, #tpu.memory_space<vmem>>, vector<1x8x128xf32>,
    %c5_i32 = arith.constant 5 : i32
    %272 = arith.index_cast %c5_i32 : i32 to index
    %c0_71 = arith.constant 0 : index
    %c0_72 = arith.constant 0 : index
    %273 = vector.load %arg3[%272, %c0_71, %c0_72] : memref<8x8x512xf32, #tpu.memory_space<vmem>>, vector<1x8x512xf32>
    %274 = vector.shape_cast %273 : vector<1x8x512xf32> to vector<8x512xf32>
    %275 = arith.truncf %256 : vector<8x128xf32> to vector<8x128xbf16>
    %c0_73 = arith.constant 0 : index
    %c0_74 = arith.constant 0 : index
    %276 = vector.load %arg7[%c0_73, %c0_74] : memref<128x512xbf16, #tpu.memory_space<vmem>>, vector<128x512xbf16>
    %cst_75 = arith.constant dense<0.000000e+00> : vector<8x512xf32>
    %277 = tpu.matmul %275, %276, %cst_75 {dimension_numbers = #tpu.dot_dimension_numbers<[1], [0], [0], [1], [0, 0, 1, 1], [], []>} : vector<8x128xbf16>, vector<128x512xbf16>, vector<8x512xf32> -> vector<8x512xf32>
    %278 = arith.addf %274, %277 : vector<8x512xf32>
    %279 = vector.extract_strided_slice %278 {offsets = [0, 0], sizes = [8, 128], strides = [1, 1]} : vector<8x512xf32> to vector<8x128xf32>
    %280 = arith.negf %279 : vector<8x128xf32>
    %281 = math.exp %280 : vector<8x128xf32>
    %cst_76 = arith.constant 1.000000e+00 : f32
    %282 = vector.broadcast %cst_76 : f32 to vector<8x128xf32>
    %283 = arith.addf %282, %281 : vector<8x128xf32>
    %284 = arith.divf %282, %283 : vector<8x128xf32>
    %285 = vector.extract_strided_slice %278 {offsets = [0, 128], sizes = [8, 128], strides = [1, 1]} : vector<8x512xf32> to vector<8x128xf32>
    %286 = arith.negf %285 : vector<8x128xf32>
    %287 = math.exp %286 : vector<8x128xf32>
    %cst_77 = arith.constant 1.000000e+00 : f32
    %288 = vector.broadcast %cst_77 : f32 to vector<8x128xf32>
    %289 = arith.addf %288, %287 : vector<8x128xf32>
    %290 = arith.divf %288, %289 : vector<8x128xf32>
    %291 = vector.extract_strided_slice %278 {offsets = [0, 256], sizes = [8, 128], strides = [1, 1]} : vector<8x512xf32> to vector<8x128xf32>
    %292 = math.tanh %291 : vector<8x128xf32>
    %293 = vector.extract_strided_slice %278 {offsets = [0, 384], sizes = [8, 128], strides = [1, 1]} : vector<8x512xf32> to vector<8x128xf32>
    %294 = arith.negf %293 : vector<8x128xf32>
    %295 = math.exp %294 : vector<8x128xf32>
    %cst_78 = arith.constant 1.000000e+00 : f32
    %296 = vector.broadcast %cst_78 : f32 to vector<8x128xf32>
    %297 = arith.addf %296, %295 : vector<8x128xf32>
    %298 = arith.divf %296, %297 : vector<8x128xf32>
    %299 = arith.mulf %290, %259 : vector<8x128xf32>
    %300 = arith.mulf %284, %292 : vector<8x128xf32>
    %301 = arith.addf %299, %300 : vector<8x128xf32>
    %302 = math.tanh %301 : vector<8x128xf32>
    %303 = arith.mulf %298, %302 : vector<8x128xf32>
    %304 = arith.addi %4, %c5_i32 : i32
    %305 = vector.broadcast %304 : i32 to vector<8x1xi32>
    %306 = arith.cmpi slt, %305, %3 : vector<8x1xi32>
    %307 = vector.shape_cast %306 : vector<8x1xi1> to vector<8x1xi1>
    %308 = vector.broadcast %307 : vector<8x1xi1> to vector<8x128xi1>
    %309 = arith.select %308, %303, %256 : vector<8x128xi1>, vector<8x128xf32>
    %310 = vector.shape_cast %306 : vector<8x1xi1> to vector<8x1xi1>
    %311 = vector.broadcast %310 : vector<8x1xi1> to vector<8x128xi1>
    %312 = arith.select %311, %301, %259 : vector<8x128xi1>, vector<8x128xf32>
    %313 = arith.index_cast %c5_i32 : i32 to index
    %c0_79 = arith.constant 0 : index
    %c0_80 = arith.constant 0 : index
    %314 = vector.load %arg4[%313, %c0_79, %c0_80] : memref<8x8x128xf32, #tpu.memory_space<vmem>>, vector<1x8x128xf32>
    %315 = vector.shape_cast %314 : vector<1x8x128xf32> to vector<8x128xf32>
    %cst_81 = arith.constant 0.000000e+00 : f32
    %316 = vector.shape_cast %306 : vector<8x1xi1> to vector<8x1xi1>
    %317 = vector.broadcast %316 : vector<8x1xi1> to vector<8x128xi1>
    %318 = vector.broadcast %cst_81 : f32 to vector<8x128xf32>
    %319 = arith.select %317, %303, %318 : vector<8x128xi1>, vector<8x128xf32>
    %320 = arith.addf %315, %319 : vector<8x128xf32>
    %321 = arith.index_cast %c5_i32 : i32 to index
    %c0_82 = arith.constant 0 : index
    %c0_83 = arith.constant 0 : index
    %322 = vector.load %arg8[%321, %c0_82, %c0_83] : memref<8x8x128xf32, #tpu.memory_space<vmem>>, vector<1x8x128xf32>
    %323 = vector.shape_cast %322 : vector<1x8x128xf32> to vector<8x128xf32>
    %324 = vector.shape_cast %320 : vector<8x128xf32> to vector<1x8x128xf32>
    tpu.vector_store %arg8[%321, %c0_82, %c0_83], %324 {strides = array<i32>} : memref<8x8x128xf32, #tpu.memory_space<vmem>>, vector<1x8x128xf32>,
    %c6_i32 = arith.constant 6 : i32
    %325 = arith.index_cast %c6_i32 : i32 to index
    %c0_84 = arith.constant 0 : index
    %c0_85 = arith.constant 0 : index
    %326 = vector.load %arg3[%325, %c0_84, %c0_85] : memref<8x8x512xf32, #tpu.memory_space<vmem>>, vector<1x8x512xf32>
    %327 = vector.shape_cast %326 : vector<1x8x512xf32> to vector<8x512xf32>
    %328 = arith.truncf %309 : vector<8x128xf32> to vector<8x128xbf16>
    %c0_86 = arith.constant 0 : index
    %c0_87 = arith.constant 0 : index
    %329 = vector.load %arg7[%c0_86, %c0_87] : memref<128x512xbf16, #tpu.memory_space<vmem>>, vector<128x512xbf16>
    %cst_88 = arith.constant dense<0.000000e+00> : vector<8x512xf32>
    %330 = tpu.matmul %328, %329, %cst_88 {dimension_numbers = #tpu.dot_dimension_numbers<[1], [0], [0], [1], [0, 0, 1, 1], [], []>} : vector<8x128xbf16>, vector<128x512xbf16>, vector<8x512xf32> -> vector<8x512xf32>
    %331 = arith.addf %327, %330 : vector<8x512xf32>
    %332 = vector.extract_strided_slice %331 {offsets = [0, 0], sizes = [8, 128], strides = [1, 1]} : vector<8x512xf32> to vector<8x128xf32>
    %333 = arith.negf %332 : vector<8x128xf32>
    %334 = math.exp %333 : vector<8x128xf32>
    %cst_89 = arith.constant 1.000000e+00 : f32
    %335 = vector.broadcast %cst_89 : f32 to vector<8x128xf32>
    %336 = arith.addf %335, %334 : vector<8x128xf32>
    %337 = arith.divf %335, %336 : vector<8x128xf32>
    %338 = vector.extract_strided_slice %331 {offsets = [0, 128], sizes = [8, 128], strides = [1, 1]} : vector<8x512xf32> to vector<8x128xf32>
    %339 = arith.negf %338 : vector<8x128xf32>
    %340 = math.exp %339 : vector<8x128xf32>
    %cst_90 = arith.constant 1.000000e+00 : f32
    %341 = vector.broadcast %cst_90 : f32 to vector<8x128xf32>
    %342 = arith.addf %341, %340 : vector<8x128xf32>
    %343 = arith.divf %341, %342 : vector<8x128xf32>
    %344 = vector.extract_strided_slice %331 {offsets = [0, 256], sizes = [8, 128], strides = [1, 1]} : vector<8x512xf32> to vector<8x128xf32>
    %345 = math.tanh %344 : vector<8x128xf32>
    %346 = vector.extract_strided_slice %331 {offsets = [0, 384], sizes = [8, 128], strides = [1, 1]} : vector<8x512xf32> to vector<8x128xf32>
    %347 = arith.negf %346 : vector<8x128xf32>
    %348 = math.exp %347 : vector<8x128xf32>
    %cst_91 = arith.constant 1.000000e+00 : f32
    %349 = vector.broadcast %cst_91 : f32 to vector<8x128xf32>
    %350 = arith.addf %349, %348 : vector<8x128xf32>
    %351 = arith.divf %349, %350 : vector<8x128xf32>
    %352 = arith.mulf %343, %312 : vector<8x128xf32>
    %353 = arith.mulf %337, %345 : vector<8x128xf32>
    %354 = arith.addf %352, %353 : vector<8x128xf32>
    %355 = math.tanh %354 : vector<8x128xf32>
    %356 = arith.mulf %351, %355 : vector<8x128xf32>
    %357 = arith.addi %4, %c6_i32 : i32
    %358 = vector.broadcast %357 : i32 to vector<8x1xi32>
    %359 = arith.cmpi slt, %358, %3 : vector<8x1xi32>
    %360 = vector.shape_cast %359 : vector<8x1xi1> to vector<8x1xi1>
    %361 = vector.broadcast %360 : vector<8x1xi1> to vector<8x128xi1>
    %362 = arith.select %361, %356, %309 : vector<8x128xi1>, vector<8x128xf32>
    %363 = vector.shape_cast %359 : vector<8x1xi1> to vector<8x1xi1>
    %364 = vector.broadcast %363 : vector<8x1xi1> to vector<8x128xi1>
    %365 = arith.select %364, %354, %312 : vector<8x128xi1>, vector<8x128xf32>
    %366 = arith.index_cast %c6_i32 : i32 to index
    %c0_92 = arith.constant 0 : index
    %c0_93 = arith.constant 0 : index
    %367 = vector.load %arg4[%366, %c0_92, %c0_93] : memref<8x8x128xf32, #tpu.memory_space<vmem>>, vector<1x8x128xf32>
    %368 = vector.shape_cast %367 : vector<1x8x128xf32> to vector<8x128xf32>
    %cst_94 = arith.constant 0.000000e+00 : f32
    %369 = vector.shape_cast %359 : vector<8x1xi1> to vector<8x1xi1>
    %370 = vector.broadcast %369 : vector<8x1xi1> to vector<8x128xi1>
    %371 = vector.broadcast %cst_94 : f32 to vector<8x128xf32>
    %372 = arith.select %370, %356, %371 : vector<8x128xi1>, vector<8x128xf32>
    %373 = arith.addf %368, %372 : vector<8x128xf32>
    %374 = arith.index_cast %c6_i32 : i32 to index
    %c0_95 = arith.constant 0 : index
    %c0_96 = arith.constant 0 : index
    %375 = vector.load %arg8[%374, %c0_95, %c0_96] : memref<8x8x128xf32, #tpu.memory_space<vmem>>, vector<1x8x128xf32>
    %376 = vector.shape_cast %375 : vector<1x8x128xf32> to vector<8x128xf32>
    %377 = vector.shape_cast %373 : vector<8x128xf32> to vector<1x8x128xf32>
    tpu.vector_store %arg8[%374, %c0_95, %c0_96], %377 {strides = array<i32>} : memref<8x8x128xf32, #tpu.memory_space<vmem>>, vector<1x8x128xf32>,
    %c7_i32 = arith.constant 7 : i32
    %378 = arith.index_cast %c7_i32 : i32 to index
    %c0_97 = arith.constant 0 : index
    %c0_98 = arith.constant 0 : index
    %379 = vector.load %arg3[%378, %c0_97, %c0_98] : memref<8x8x512xf32, #tpu.memory_space<vmem>>, vector<1x8x512xf32>
    %380 = vector.shape_cast %379 : vector<1x8x512xf32> to vector<8x512xf32>
    %381 = arith.truncf %362 : vector<8x128xf32> to vector<8x128xbf16>
    %c0_99 = arith.constant 0 : index
    %c0_100 = arith.constant 0 : index
    %382 = vector.load %arg7[%c0_99, %c0_100] : memref<128x512xbf16, #tpu.memory_space<vmem>>, vector<128x512xbf16>
    %cst_101 = arith.constant dense<0.000000e+00> : vector<8x512xf32>
    %383 = tpu.matmul %381, %382, %cst_101 {dimension_numbers = #tpu.dot_dimension_numbers<[1], [0], [0], [1], [0, 0, 1, 1], [], []>} : vector<8x128xbf16>, vector<128x512xbf16>, vector<8x512xf32> -> vector<8x512xf32>
    %384 = arith.addf %380, %383 : vector<8x512xf32>
    %385 = vector.extract_strided_slice %384 {offsets = [0, 0], sizes = [8, 128], strides = [1, 1]} : vector<8x512xf32> to vector<8x128xf32>
    %386 = arith.negf %385 : vector<8x128xf32>
    %387 = math.exp %386 : vector<8x128xf32>
    %cst_102 = arith.constant 1.000000e+00 : f32
    %388 = vector.broadcast %cst_102 : f32 to vector<8x128xf32>
    %389 = arith.addf %388, %387 : vector<8x128xf32>
    %390 = arith.divf %388, %389 : vector<8x128xf32>
    %391 = vector.extract_strided_slice %384 {offsets = [0, 128], sizes = [8, 128], strides = [1, 1]} : vector<8x512xf32> to vector<8x128xf32>
    %392 = arith.negf %391 : vector<8x128xf32>
    %393 = math.exp %392 : vector<8x128xf32>
    %cst_103 = arith.constant 1.000000e+00 : f32
    %394 = vector.broadcast %cst_103 : f32 to vector<8x128xf32>
    %395 = arith.addf %394, %393 : vector<8x128xf32>
    %396 = arith.divf %394, %395 : vector<8x128xf32>
    %397 = vector.extract_strided_slice %384 {offsets = [0, 256], sizes = [8, 128], strides = [1, 1]} : vector<8x512xf32> to vector<8x128xf32>
    %398 = math.tanh %397 : vector<8x128xf32>
    %399 = vector.extract_strided_slice %384 {offsets = [0, 384], sizes = [8, 128], strides = [1, 1]} : vector<8x512xf32> to vector<8x128xf32>
    %400 = arith.negf %399 : vector<8x128xf32>
    %401 = math.exp %400 : vector<8x128xf32>
    %cst_104 = arith.constant 1.000000e+00 : f32
    %402 = vector.broadcast %cst_104 : f32 to vector<8x128xf32>
    %403 = arith.addf %402, %401 : vector<8x128xf32>
    %404 = arith.divf %402, %403 : vector<8x128xf32>
    %405 = arith.mulf %396, %365 : vector<8x128xf32>
    %406 = arith.mulf %390, %398 : vector<8x128xf32>
    %407 = arith.addf %405, %406 : vector<8x128xf32>
    %408 = math.tanh %407 : vector<8x128xf32>
    %409 = arith.mulf %404, %408 : vector<8x128xf32>
    %410 = arith.addi %4, %c7_i32 : i32
    %411 = vector.broadcast %410 : i32 to vector<8x1xi32>
    %412 = arith.cmpi slt, %411, %3 : vector<8x1xi32>
    %413 = vector.shape_cast %412 : vector<8x1xi1> to vector<8x1xi1>
    %414 = vector.broadcast %413 : vector<8x1xi1> to vector<8x128xi1>
    %415 = arith.select %414, %409, %362 : vector<8x128xi1>, vector<8x128xf32>
    %416 = vector.shape_cast %412 : vector<8x1xi1> to vector<8x1xi1>
    %417 = vector.broadcast %416 : vector<8x1xi1> to vector<8x128xi1>
    %418 = arith.select %417, %407, %365 : vector<8x128xi1>, vector<8x128xf32>
    %419 = arith.index_cast %c7_i32 : i32 to index
    %c0_105 = arith.constant 0 : index
    %c0_106 = arith.constant 0 : index
    %420 = vector.load %arg4[%419, %c0_105, %c0_106] : memref<8x8x128xf32, #tpu.memory_space<vmem>>, vector<1x8x128xf32>
    %421 = vector.shape_cast %420 : vector<1x8x128xf32> to vector<8x128xf32>
    %cst_107 = arith.constant 0.000000e+00 : f32
    %422 = vector.shape_cast %412 : vector<8x1xi1> to vector<8x1xi1>
    %423 = vector.broadcast %422 : vector<8x1xi1> to vector<8x128xi1>
    %424 = vector.broadcast %cst_107 : f32 to vector<8x128xf32>
    %425 = arith.select %423, %409, %424 : vector<8x128xi1>, vector<8x128xf32>
    %426 = arith.addf %421, %425 : vector<8x128xf32>
    %427 = arith.index_cast %c7_i32 : i32 to index
    %c0_108 = arith.constant 0 : index
    %c0_109 = arith.constant 0 : index
    %428 = vector.load %arg8[%427, %c0_108, %c0_109] : memref<8x8x128xf32, #tpu.memory_space<vmem>>, vector<1x8x128xf32>
    %429 = vector.shape_cast %428 : vector<1x8x128xf32> to vector<8x128xf32>
    %430 = vector.shape_cast %426 : vector<8x128xf32> to vector<1x8x128xf32>
    tpu.vector_store %arg8[%427, %c0_108, %c0_109], %430 {strides = array<i32>} : memref<8x8x128xf32, #tpu.memory_space<vmem>>, vector<1x8x128xf32>,
    %c8_i32_110 = arith.constant 8 : i32
    %c0_111 = arith.constant 0 : index
    %c0_112 = arith.constant 0 : index
    %431 = vector.load %arg11[%c0_111, %c0_112] : memref<8x128xf32, #tpu.memory_space<vmem>>, vector<8x128xf32>
    tpu.vector_store %arg11[%c0_111, %c0_112], %415 {strides = array<i32>} : memref<8x128xf32, #tpu.memory_space<vmem>>, vector<8x128xf32>,
    %c0_113 = arith.constant 0 : index
    %c0_114 = arith.constant 0 : index
    %432 = vector.load %arg12[%c0_113, %c0_114] : memref<8x128xf32, #tpu.memory_space<vmem>>, vector<8x128xf32>
    tpu.vector_store %arg12[%c0_113, %c0_114], %418 {strides = array<i32>} : memref<8x128xf32, #tpu.memory_space<vmem>>, vector<8x128xf32>,
    %c0_i32_115 = arith.constant 0 : i32
    %433 = arith.cmpi eq, %arg1, %c0_i32_115 : i32
    %434 = arith.extui %433 : i1 to i32
    %c0_i32_116 = arith.constant 0 : i32
    %435 = arith.cmpi ne, %434, %c0_i32_116 : i32
    scf.if %435 {
      %c0_117 = arith.constant 0 : index
      %c0_118 = arith.constant 0 : index
      %436 = vector.load %arg9[%c0_117, %c0_118] : memref<8x128xf32, #tpu.memory_space<vmem>>, vector<8x128xf32>
      tpu.vector_store %arg9[%c0_117, %c0_118], %415 {strides = array<i32>} : memref<8x128xf32, #tpu.memory_space<vmem>>, vector<8x128xf32>,
      %c0_119 = arith.constant 0 : index
      %c0_120 = arith.constant 0 : index
      %437 = vector.load %arg10[%c0_119, %c0_120] : memref<8x128xf32, #tpu.memory_space<vmem>>, vector<8x128xf32>
      tpu.vector_store %arg10[%c0_119, %c0_120], %418 {strides = array<i32>} : memref<8x128xf32, #tpu.memory_space<vmem>>, vector<8x128xf32>,
    } else {
    }
    return
  }
  func.func @transform_0(%arg0: i32, %arg1: i32) -> (i32, i32) {
    %c0_i32 = arith.constant 0 : i32
    %c0_i32_0 = arith.constant 0 : i32
    return %arg0, %c0_i32 : i32, i32
  }
  func.func @transform_1(%arg0: i32, %arg1: i32) -> (i32, i32, i32) {
    %c0_i32 = arith.constant 0 : i32
    %c0_i32_0 = arith.constant 0 : i32
    return %arg1, %arg0, %c0_i32 : i32, i32, i32
  }
  func.func @transform_2(%arg0: i32, %arg1: i32) -> (i32, i32, i32) {
    %c0_i32 = arith.constant 0 : i32
    %c0_i32_0 = arith.constant 0 : i32
    return %arg1, %arg0, %c0_i32 : i32, i32, i32
  }
  func.func @transform_3(%arg0: i32, %arg1: i32) -> (i32, i32) {
    %c0_i32 = arith.constant 0 : i32
    %c0_i32_0 = arith.constant 0 : i32
    return %arg0, %c0_i32 : i32, i32
  }
  func.func @transform_4(%arg0: i32, %arg1: i32) -> (i32, i32) {
    %c0_i32 = arith.constant 0 : i32
    %c0_i32_0 = arith.constant 0 : i32
    return %arg0, %c0_i32 : i32, i32
  }
  func.func @transform_5(%arg0: i32, %arg1: i32) -> (i32, i32) {
    %c0_i32 = arith.constant 0 : i32
    %c0_i32_0 = arith.constant 0 : i32
    %c0_i32_1 = arith.constant 0 : i32
    return %c0_i32, %c0_i32_0 : i32, i32
  }
  func.func @transform_6(%arg0: i32, %arg1: i32) -> (i32, i32, i32) {
    %c0_i32 = arith.constant 0 : i32
    %c0_i32_0 = arith.constant 0 : i32
    return %arg1, %arg0, %c0_i32 : i32, i32, i32
  }
  func.func @transform_7(%arg0: i32, %arg1: i32) -> (i32, i32) {
    %c0_i32 = arith.constant 0 : i32
    %c0_i32_0 = arith.constant 0 : i32
    return %arg0, %c0_i32 : i32, i32
  }
  func.func @transform_8(%arg0: i32, %arg1: i32) -> (i32, i32) {
    %c0_i32 = arith.constant 0 : i32
    %c0_i32_0 = arith.constant 0 : i32
    return %arg0, %c0_i32 : i32, i32
  }
}

</mosaic_0001>

<bundles_post_ra>
// kernel: residual_gru_forward.5
= control target key start
LH: loop header
LB: loop body
LE: loop exit
PB: predicated region body
PF: predicated region fallthrough
CT: control target
= control target key end

     0   :  { %vm42_vm0 = vcmask 130048   ;;  %s234_s1 = inlined_call_operand.vmem [shape: bf16[16,128], index: 1, kind: input, shape index: {}]   ;;  %s235_s0 = inlined_call_operand.vmem [shape: f32[64,16], index: 0, kind: input, shape index: {}]   ;;  %s236_s2 = inlined_call_operand.vmem [shape: f32[1,128], index: 2, kind: input, shape index: {}]   ;;  %s237_s3 = inlined_call_operand.vmem [shape: f32[64,128], index: 3, kind: output, shape index: {}]  }
   0x1   :  { %v155_v0 = vld [vmem:[%s234_s1] sm:$0xff]   ;;  %v16_v2 = vld [vmem:[%s235_s0 + $0x8] sm:$0xff]  ;;  %v17_v6 = vld [vmem:[%s235_s0 + $0x10] sm:$0xff] }
   0x2   :  { %v15_v1 = vld [vmem:[%s235_s0] sm:$0xff]  ;;  %143 = vmatprep.subr.bf16.mxu0 %v155_v0  ;;  %153 = vmatprep.subr.bf16.mxu1 %v155_v0  ;;  %v20_v5 = vld [vmem:[%s235_s0 + $0x28] sm:$0xff]  ;;  %v18_v7 = vld [vmem:[%s235_s0 + $0x18] sm:$0xff] }
   0x3   :  { %v19_v3 = vld [vmem:[%s235_s0 + $0x20] sm:$0xff]  ;;  %v23_v4 = vpack.c.bf16 %v16_v2, %v15_v1  ;;  %144 = vmatpush3.bf16.msra.mxu0 %v155_v0  ;;  %154 = vmatpush3.bf16.msra.mxu1 %v155_v0  ;;  %v24_v9 = vpack.c.bf16 %v18_v7, %v17_v6  ;;  %v21_v10 = vld [vmem:[%s235_s0 + $0x30] sm:$0xff]  ;;  %v22_v11 = vld [vmem:[%s235_s0 + $0x38] sm:$0xff] }
   0x4   :  { %v25_v8 = vpack.c.bf16 %v20_v5, %v19_v3  ;;  %v26_v12 = vpack.c.bf16 %v22_v11, %v21_v10  ;;  %v132_v13 = vld [vmem:[%s236_s2] ss:$0 sm:$0xff] }
   0x5   :  { %145 = vmatprep.mubr.msk.bf16.mxu0 %vm42_vm0, %v23_v4 }
   0x6   :  { %149 = vmatprep.mubr.msk.bf16.mxu1 %vm42_vm0, %v25_v8  ;;  %146 = vmatmul.mubr.msk.bf16.vlgmr.msra.gmra.mrb[0].mxu0 %vm42_vm0, %v24_v9 }
   0x7   :  { %150 = vmatmul.mubr.msk.bf16.vlgmr.msra.gmra.mrb[0].mxu1 %vm42_vm0, %v26_v12 }
  0xd9   :  { %v147_v14 = vpop.f32.mrb[0].mxu0 }
  0xda   :  { %v151_v15 = vpop.f32.mrb[0].mxu1  ;;  %v98_v16 = vadd.f32 %v147_v14, %v132_v13  ;;  %v89_v18 = vpop.f32.mrb[1].mxu0 }
  0xdb   :  { %v114_v17 = vadd.f32 %v151_v15, %v132_v13  ;;  %v105_v19 = vpop.f32.mrb[1].mxu1  ;;  %v90_v20 = vadd.f32 %v132_v13, %v89_v18  ;;  %v148_v22 = vpop.f32.mrb[2].mxu0 }
  0xdc   :  { %v106_v21 = vadd.f32 %v132_v13, %v105_v19  ;;  %v152_v23 = vpop.f32.mrb[2].mxu1  ;;  %122 = vst [vmem:[%s237_s3 + $0x10] sm:$0xff] %v98_v16  ;;  %v101_v24 = vadd.f32 %v148_v22, %v132_v13  ;;  %v92_v26 = vpop.f32.mrb[3].mxu0 }
  0xdd   :  { %126 = vst [vmem:[%s237_s3 + $0x30] sm:$0xff] %v114_v17  ;;  %v117_v25 = vadd.f32 %v152_v23, %v132_v13  ;;  %v108_v27 = vpop.f32.mrb[3].mxu1  ;;  %120 = vst [vmem:[%s237_s3] sm:$0xff] %v90_v20  ;;  %v93_v28 = vadd.f32 %v132_v13, %v92_v26 }
  0xde   :  { %124 = vst [vmem:[%s237_s3 + $0x20] sm:$0xff] %v106_v21  ;;  %v109_v29 = vadd.f32 %v132_v13, %v108_v27  ;;  %123 = vst [vmem:[%s237_s3 + $0x18] sm:$0xff] %v101_v24 }
  0xdf   :  { %127 = vst [vmem:[%s237_s3 + $0x38] sm:$0xff] %v117_v25  ;;  %121 = vst [vmem:[%s237_s3 + $0x8] sm:$0xff] %v93_v28 }
  0xe0   :  { %125 = vst [vmem:[%s237_s3 + $0x28] sm:$0xff] %v109_v29 }

// kernel: residual_gru_forward.6
= control target key start
LH: loop header
LB: loop body
LE: loop exit
PB: predicated region body
PF: predicated region fallthrough
CT: control target
= control target key end

     0   :  { %8 = vsyncpa [#allocation3], 0  ;;  %s546_s12 = smov [#allocation2]   ;;  %s753_s0 = inlined_call_operand.vmem [shape: f32[64,128], index: 0, kind: input, shape index: {}]   ;;  %s754_s1 = inlined_call_operand.hbm [shape: bf16[128,512], index: 1, kind: input, shape index: {}]   ;;  %s755_s2 = inlined_call_operand.vmem [shape: f32[1,512], index: 2, kind: input, shape index: {}]   ;;  %s756_s3 = inlined_call_operand.vmem [shape: f32[64,512], index: 3, kind: output, shape index: {}]  }
   0x1   :  { %s16_s13 = sshll.u32 %s546_s12, 4  ;;  %s522_s16 = scalar_lea.hbm %s754_s1, 4096  ;;  %s17_s13 = int_to_ptr.vmem [resolvable:$true] %s16_s13 }
   0x2   :  { %p523_p0 = scmp.ne.s32.totalorder %s754_s1, %s522_s16  ;;  %p526_p1 = scmp.lt.u32.totalorder %s522_s16, %s754_s1 }
   0x4   :  { %p528_p2 = pnand %p526_p1, %p523_p0 }
   0x6   :  { %531 = shalt.err (!%p528_p2)
}
   0x7   :  { %s532_s21 = scalar_lea.vmem %s17_s13, 4096  ;;  %p537_p4 = scmp.lt.s32.totalorder %s17_s13, %s17_s13 }
   0x8   :  { %p533_p3 = scmp.ne.s32.totalorder %s17_s13, %s532_s21  ;;  %p538_p5 = scmp.lt.s32.totalorder %s532_s21, %s532_s21 }
   0xa   :  { %p539_p6 = por %p538_p5, %p537_p4 }
   0xc   :  { %p540_p7 = pnand %p539_p6, %p533_p3 }
   0xe   :  { %543 = shalt.err (!%p540_p7)
}
   0xf   :  { %s547_s22 = smov 256   ;;  %s548_s23 = smov 16  }
  0x10   :  { %22 = dma.hbm_to_vmem [thread:$0]  %s754_s1, 4096, %s17_s13, [#allocation3], %s547_s22, %s547_s22, %s548_s23  }
  0x11   :  { %544 = dma.done.wait [#allocation3], 4096  }
  0x12   :  { %545 = vsyncadd [#allocation3], 4294963200  ;;  %v549_v0 = vmov 0   ;;  %v474_v1 = vld [vmem:[#allocation2 + $0x4] ss:$16 sps:$4 sm:$0xff]   ;;  %v30_v34 = vld [vmem:[%s753_s0 + $0x8] sm:$0xff]  ;;  %v75_v45 = vlaneseq }
  0x13   :  { %287 = vmatprep.mubr.bf16.mxu0 %v549_v0  ;;  %360 = vmatprep.mubr.bf16.mxu1 %v549_v0  ;;  %v476_v2 = vld [vmem:[#allocation2 + $0xc] ss:$16 sps:$4 sm:$0xff]   ;;  %v478_v3 = vld [vmem:[#allocation2] ss:$16 sps:$4 sm:$0xff]   ;;  %v479_v4 = vld [vmem:[#allocation2 + $0x8] ss:$16 sps:$4 sm:$0xff]  }
  0x14   :  { %255 = vmatprep.subr.bf16.mxu0 %v474_v1  ;;  %328 = vmatprep.subr.bf16.mxu1 %v476_v2  ;;  %v480_v5 = vld [vmem:[#allocation2 + $0x24] ss:$16 sps:$4 sm:$0xff]   ;;  %v482_v6 = vld [vmem:[#allocation2 + $0x2c] ss:$16 sps:$4 sm:$0xff]   ;;  %v484_v7 = vld [vmem:[#allocation2 + $0x20] ss:$16 sps:$4 sm:$0xff]  }
  0x15   :  { %256 = vmatpush1.bf16.msra.mxu0 %v478_v3  ;;  %329 = vmatpush1.bf16.msra.mxu1 %v479_v4  ;;  %v485_v8 = vld [vmem:[#allocation2 + $0x28] ss:$16 sps:$4 sm:$0xff]   ;;  %v486_v9 = vld [vmem:[#allocation2 + $0x44] ss:$16 sps:$4 sm:$0xff]   ;;  %v488_v10 = vld [vmem:[#allocation2 + $0x4c] ss:$16 sps:$4 sm:$0xff]  }
  0x16   :  { %257 = vmatprep.subr.bf16.mxu0 %v480_v5  ;;  %330 = vmatprep.subr.bf16.mxu1 %v482_v6  ;;  %v490_v11 = vld [vmem:[#allocation2 + $0x40] ss:$16 sps:$4 sm:$0xff]   ;;  %v491_v12 = vld [vmem:[#allocation2 + $0x48] ss:$16 sps:$4 sm:$0xff]   ;;  %v492_v13 = vld [vmem:[#allocation2 + $0x64] ss:$16 sps:$4 sm:$0xff]  }
  0x17   :  { %v494_v14 = vld [vmem:[#allocation2 + $0x6c] ss:$16 sps:$4 sm:$0xff]   ;;  %v496_v15 = vld [vmem:[#allocation2 + $0x60] ss:$16 sps:$4 sm:$0xff]   ;;  %v497_v16 = vld [vmem:[#allocation2 + $0x68] ss:$16 sps:$4 sm:$0xff]  }
  0x18   :  { %v498_v17 = vld [vmem:[#allocation2 + $0x84] ss:$16 sps:$4 sm:$0xff]   ;;  %v500_v18 = vld [vmem:[#allocation2 + $0x8c] ss:$16 sps:$4 sm:$0xff]   ;;  %v502_v19 = vld [vmem:[#allocation2 + $0x80] ss:$16 sps:$4 sm:$0xff]  }
  0x19   :  { %258 = vmatpush1.bf16.msra.mxu0 %v484_v7  ;;  %331 = vmatpush1.bf16.msra.mxu1 %v485_v8  ;;  %v503_v20 = vld [vmem:[#allocation2 + $0x88] ss:$16 sps:$4 sm:$0xff]   ;;  %v504_v21 = vld [vmem:[#allocation2 + $0xa4] ss:$16 sps:$4 sm:$0xff]   ;;  %v506_v22 = vld [vmem:[#allocation2 + $0xac] ss:$16 sps:$4 sm:$0xff]  }
  0x1a   :  { %259 = vmatprep.subr.bf16.mxu0 %v486_v9  ;;  %332 = vmatprep.subr.bf16.mxu1 %v488_v10  ;;  %v508_v23 = vld [vmem:[#allocation2 + $0xa0] ss:$16 sps:$4 sm:$0xff]   ;;  %v509_v24 = vld [vmem:[#allocation2 + $0xa8] ss:$16 sps:$4 sm:$0xff]   ;;  %v510_v25 = vld [vmem:[#allocation2 + $0xc4] ss:$16 sps:$4 sm:$0xff]  }
  0x1b   :  { %v512_v26 = vld [vmem:[#allocation2 + $0xcc] ss:$16 sps:$4 sm:$0xff]   ;;  %v514_v27 = vld [vmem:[#allocation2 + $0xc0] ss:$16 sps:$4 sm:$0xff]   ;;  %v515_v28 = vld [vmem:[#allocation2 + $0xc8] ss:$16 sps:$4 sm:$0xff]  }
  0x1c   :  { %v516_v29 = vld [vmem:[#allocation2 + $0xe4] ss:$16 sps:$4 sm:$0xff]   ;;  %v518_v30 = vld [vmem:[#allocation2 + $0xec] ss:$16 sps:$4 sm:$0xff]   ;;  %v520_v31 = vld [vmem:[#allocation2 + $0xe0] ss:$16 sps:$4 sm:$0xff]  }
  0x1d   :  { %260 = vmatpush1.bf16.msra.mxu0 %v490_v11  ;;  %333 = vmatpush1.bf16.msra.mxu1 %v491_v12  ;;  %v521_v32 = vld [vmem:[#allocation2 + $0xe8] ss:$16 sps:$4 sm:$0xff]   ;;  %v29_v33 = vld [vmem:[%s753_s0] sm:$0xff]  ;;  %v31_v36 = vld [vmem:[%s753_s0 + $0x10] sm:$0xff]  ;;  %v76_v46 = vshrl.u32 %v75_v45, 7 }
  0x1e   :  { %261 = vmatprep.subr.bf16.mxu0 %v492_v13  ;;  %334 = vmatprep.subr.bf16.mxu1 %v494_v14  ;;  %v37_v35 = vpack.c.bf16 %v30_v34, %v29_v33  ;;  %v32_v37 = vld [vmem:[%s753_s0 + $0x18] sm:$0xff]  ;;  %v33_v39 = vld [vmem:[%s753_s0 + $0x20] sm:$0xff]  ;;  %v34_v40 = vld [vmem:[%s753_s0 + $0x28] sm:$0xff] }
  0x1f   :  { %v38_v38 = vpack.c.bf16 %v32_v37, %v31_v36  ;;  %v39_v41 = vpack.c.bf16 %v34_v40, %v33_v39  ;;  %v35_v42 = vld [vmem:[%s753_s0 + $0x30] sm:$0xff]  ;;  %v36_v43 = vld [vmem:[%s753_s0 + $0x38] sm:$0xff]  ;;  %v77_v47 = vsub.s32 0, %v76_v46  ;;  %v85_v48 = vsub.s32 2, %v76_v46  ;;  %v73_v49 = vld [vmem:[%s755_s2] sm:$0xf] }
  0x20   :  { %v40_v44 = vpack.c.bf16 %v36_v43, %v35_v42  ;;  %v81_v50 = vsub.s32 1, %v76_v46  ;;  %v89_v51 = vsub.s32 3, %v76_v46 }
  0x21   :  { %262 = vmatpush1.bf16.msra.mxu0 %v496_v15  ;;  %335 = vmatpush1.bf16.msra.mxu1 %v497_v16  ;;  %v617_v52 = vrot.slane %v73_v49, %v77_v47  ;;  %v619_v53 = vrot.slane %v73_v49, %v85_v48 }
  0x22   :  { %263 = vmatprep.subr.bf16.mxu0 %v498_v17  ;;  %336 = vmatprep.subr.bf16.mxu1 %v500_v18  ;;  %v621_v54 = vrot.slane %v73_v49, %v81_v50  ;;  %v623_v55 = vrot.slane %v73_v49, %v89_v51 }
  0x25   :  { %264 = vmatpush1.bf16.msra.mxu0 %v502_v19  ;;  %337 = vmatpush1.bf16.msra.mxu1 %v503_v20 }
  0x26   :  { %265 = vmatprep.subr.bf16.mxu0 %v504_v21  ;;  %338 = vmatprep.subr.bf16.mxu1 %v506_v22 }
  0x29   :  { %266 = vmatpush1.bf16.msra.mxu0 %v508_v23  ;;  %339 = vmatpush1.bf16.msra.mxu1 %v509_v24 }
  0x2a   :  { %267 = vmatprep.subr.bf16.mxu0 %v510_v25  ;;  %340 = vmatprep.subr.bf16.mxu1 %v512_v26 }
  0x2d   :  { %268 = vmatpush1.bf16.msra.mxu0 %v514_v27  ;;  %341 = vmatpush1.bf16.msra.mxu1 %v515_v28 }
  0x2e   :  { %269 = vmatprep.subr.bf16.mxu0 %v516_v29  ;;  %342 = vmatprep.subr.bf16.mxu1 %v518_v30 }
  0x31   :  { %270 = vmatpush1.bf16.msra.mxu0 %v520_v31  ;;  %343 = vmatpush1.bf16.msra.mxu1 %v521_v32 }
  0x34   :  { %288 = vmatmul.mubr.bf16.vlgmr.msra.gmra.mrb[0].mxu0 %v37_v35  ;;  %361 = vmatmul.mubr.bf16.vlgmr.msra.gmra.mrb[0].mxu1 %v37_v35 }
  0x35   :  { %297 = vmatprep.mubr.bf16.mxu0 %v549_v0  ;;  %370 = vmatprep.mubr.bf16.mxu1 %v549_v0 }
  0x3c   :  { %298 = vmatmul.mubr.bf16.gmra.mrb[4].mxu0 %v38_v38  ;;  %371 = vmatmul.mubr.bf16.gmra.mrb[4].mxu1 %v38_v38 }
  0x3d   :  { %307 = vmatprep.mubr.bf16.mxu0 %v549_v0  ;;  %380 = vmatprep.mubr.bf16.mxu1 %v549_v0 }
  0x44   :  { %308 = vmatmul.mubr.bf16.gmra.mrb[8].mxu0 %v39_v41  ;;  %381 = vmatmul.mubr.bf16.gmra.mrb[8].mxu1 %v39_v41 }
  0x45   :  { %317 = vmatprep.mubr.bf16.mxu0 %v549_v0  ;;  %390 = vmatprep.mubr.bf16.mxu1 %v549_v0 }
  0x4c   :  { %318 = vmatmul.mubr.bf16.gmra.mrb[12].mxu0 %v40_v44  ;;  %391 = vmatmul.mubr.bf16.gmra.mrb[12].mxu1 %v40_v44 }
 0x107   :  { %v289_v56 = vpop.f32.mrb[0].mxu0  ;;  %v362_v57 = vpop.f32.mrb[0].mxu1 }
 0x108   :  { %v290_v58 = vadd.f32 %v289_v56, %v617_v52  ;;  %v363_v59 = vadd.f32 %v362_v57, %v619_v53  ;;  %v291_v60 = vpop.f32.mrb[1].mxu0  ;;  %v364_v61 = vpop.f32.mrb[1].mxu1 }
 0x109   :  { %v292_v62 = vadd.f32 %v291_v60, %v621_v54  ;;  %v365_v63 = vadd.f32 %v364_v61, %v623_v55  ;;  %v293_v0 = vpop.f32.mrb[2].mxu0  ;;  %v366_v1 = vpop.f32.mrb[2].mxu1 }
 0x10a   :  { %401 = vst [vmem:[%s756_s3] sm:$0xff] %v290_v58  ;;  %403 = vst [vmem:[%s756_s3 + $0x10] sm:$0xff] %v363_v59  ;;  %v294_v2 = vadd.f32 %v293_v0, %v617_v52  ;;  %v367_v3 = vadd.f32 %v366_v1, %v619_v53  ;;  %v295_v4 = vpop.f32.mrb[3].mxu0  ;;  %v368_v5 = vpop.f32.mrb[3].mxu1 }
 0x10b   :  { %402 = vst [vmem:[%s756_s3 + $0x8] sm:$0xff] %v292_v62  ;;  %404 = vst [vmem:[%s756_s3 + $0x18] sm:$0xff] %v365_v63  ;;  %v296_v6 = vadd.f32 %v295_v4, %v621_v54  ;;  %v369_v7 = vadd.f32 %v368_v5, %v623_v55 }
 0x10c   :  { %405 = vst [vmem:[%s756_s3 + $0x20] sm:$0xff] %v294_v2  ;;  %407 = vst [vmem:[%s756_s3 + $0x30] sm:$0xff] %v367_v3 }
 0x10d   :  { %406 = vst [vmem:[%s756_s3 + $0x28] sm:$0xff] %v296_v6  ;;  %408 = vst [vmem:[%s756_s3 + $0x38] sm:$0xff] %v369_v7 }
 0x10f   :  { %v299_v8 = vpop.f32.mrb[4].mxu0  ;;  %v372_v9 = vpop.f32.mrb[4].mxu1 }
 0x110   :  { %v300_v10 = vadd.f32 %v299_v8, %v617_v52  ;;  %v373_v11 = vadd.f32 %v372_v9, %v619_v53  ;;  %v301_v12 = vpop.f32.mrb[5].mxu0  ;;  %v374_v13 = vpop.f32.mrb[5].mxu1 }
 0x111   :  { %v302_v14 = vadd.f32 %v301_v12, %v621_v54  ;;  %v375_v15 = vadd.f32 %v374_v13, %v623_v55  ;;  %v303_v16 = vpop.f32.mrb[6].mxu0  ;;  %v376_v17 = vpop.f32.mrb[6].mxu1 }
 0x112   :  { %409 = vst [vmem:[%s756_s3 + $0x40] sm:$0xff] %v300_v10  ;;  %411 = vst [vmem:[%s756_s3 + $0x50] sm:$0xff] %v373_v11  ;;  %v304_v18 = vadd.f32 %v303_v16, %v617_v52  ;;  %v377_v19 = vadd.f32 %v376_v17, %v619_v53  ;;  %v305_v20 = vpop.f32.mrb[7].mxu0  ;;  %v378_v21 = vpop.f32.mrb[7].mxu1 }
 0x113   :  { %410 = vst [vmem:[%s756_s3 + $0x48] sm:$0xff] %v302_v14  ;;  %412 = vst [vmem:[%s756_s3 + $0x58] sm:$0xff] %v375_v15  ;;  %v306_v22 = vadd.f32 %v305_v20, %v621_v54  ;;  %v379_v23 = vadd.f32 %v378_v21, %v623_v55 }
 0x114   :  { %413 = vst [vmem:[%s756_s3 + $0x60] sm:$0xff] %v304_v18  ;;  %415 = vst [vmem:[%s756_s3 + $0x70] sm:$0xff] %v377_v19 }
 0x115   :  { %414 = vst [vmem:[%s756_s3 + $0x68] sm:$0xff] %v306_v22  ;;  %416 = vst [vmem:[%s756_s3 + $0x78] sm:$0xff] %v379_v23 }
 0x117   :  { %v309_v24 = vpop.f32.mrb[8].mxu0  ;;  %v382_v25 = vpop.f32.mrb[8].mxu1 }
 0x118   :  { %v310_v26 = vadd.f32 %v309_v24, %v617_v52  ;;  %v383_v27 = vadd.f32 %v382_v25, %v619_v53  ;;  %v311_v28 = vpop.f32.mrb[9].mxu0  ;;  %v384_v29 = vpop.f32.mrb[9].mxu1 }
 0x119   :  { %v312_v30 = vadd.f32 %v311_v28, %v621_v54  ;;  %v385_v31 = vadd.f32 %v384_v29, %v623_v55  ;;  %v313_v32 = vpop.f32.mrb[10].mxu0  ;;  %v386_v33 = vpop.f32.mrb[10].mxu1 }
 0x11a   :  { %417 = vst [vmem:[%s756_s3 + $0x80] sm:$0xff] %v310_v26  ;;  %419 = vst [vmem:[%s756_s3 + $0x90] sm:$0xff] %v383_v27  ;;  %v314_v34 = vadd.f32 %v313_v32, %v617_v52  ;;  %v387_v35 = vadd.f32 %v386_v33, %v619_v53  ;;  %v315_v36 = vpop.f32.mrb[11].mxu0  ;;  %v388_v37 = vpop.f32.mrb[11].mxu1 }
 0x11b   :  { %418 = vst [vmem:[%s756_s3 + $0x88] sm:$0xff] %v312_v30  ;;  %420 = vst [vmem:[%s756_s3 + $0x98] sm:$0xff] %v385_v31  ;;  %v316_v38 = vadd.f32 %v315_v36, %v621_v54  ;;  %v389_v39 = vadd.f32 %v388_v37, %v623_v55 }
 0x11c   :  { %421 = vst [vmem:[%s756_s3 + $0xa0] sm:$0xff] %v314_v34  ;;  %423 = vst [vmem:[%s756_s3 + $0xb0] sm:$0xff] %v387_v35 }
 0x11d   :  { %422 = vst [vmem:[%s756_s3 + $0xa8] sm:$0xff] %v316_v38  ;;  %424 = vst [vmem:[%s756_s3 + $0xb8] sm:$0xff] %v389_v39 }
 0x11f   :  { %v319_v40 = vpop.f32.mrb[12].mxu0  ;;  %v392_v41 = vpop.f32.mrb[12].mxu1 }
 0x120   :  { %v320_v42 = vadd.f32 %v319_v40, %v617_v52  ;;  %v393_v43 = vadd.f32 %v392_v41, %v619_v53  ;;  %v321_v44 = vpop.f32.mrb[13].mxu0  ;;  %v394_v45 = vpop.f32.mrb[13].mxu1 }
 0x121   :  { %v322_v46 = vadd.f32 %v321_v44, %v621_v54  ;;  %v395_v47 = vadd.f32 %v394_v45, %v623_v55  ;;  %v323_v48 = vpop.f32.mrb[14].mxu0  ;;  %v396_v49 = vpop.f32.mrb[14].mxu1 }
 0x122   :  { %425 = vst [vmem:[%s756_s3 + $0xc0] sm:$0xff] %v320_v42  ;;  %427 = vst [vmem:[%s756_s3 + $0xd0] sm:$0xff] %v393_v43  ;;  %v324_v50 = vadd.f32 %v323_v48, %v617_v52  ;;  %v397_v51 = vadd.f32 %v396_v49, %v619_v53  ;;  %v325_v56 = vpop.f32.mrb[15].mxu0  ;;  %v398_v57 = vpop.f32.mrb[15].mxu1 }
 0x123   :  { %426 = vst [vmem:[%s756_s3 + $0xc8] sm:$0xff] %v322_v46  ;;  %428 = vst [vmem:[%s756_s3 + $0xd8] sm:$0xff] %v395_v47  ;;  %v326_v58 = vadd.f32 %v325_v56, %v621_v54  ;;  %v399_v59 = vadd.f32 %v398_v57, %v623_v55 }
 0x124   :  { %429 = vst [vmem:[%s756_s3 + $0xe0] sm:$0xff] %v324_v50  ;;  %431 = vst [vmem:[%s756_s3 + $0xf0] sm:$0xff] %v397_v51 }
 0x125   :  { %430 = vst [vmem:[%s756_s3 + $0xe8] sm:$0xff] %v326_v58  ;;  %432 = vst [vmem:[%s756_s3 + $0xf8] sm:$0xff] %v399_v59 }
 0x126   :  { %437 = vsyncpa [#allocation3], 1 }

// kernel: residual_gru_forward.8
= control target key start
LH: loop header
LB: loop body
LE: loop exit
PB: predicated region body
PF: predicated region fallthrough
CT: control target
= control target key end

     0   :  { %v504_v1 = vmov 0   ;;  %v61_v45 = vlaneseq  ;;  %s792_s1 = inlined_call_operand.vmem [shape: bf16[128,512], index: 1, kind: input, shape index: {}]   ;;  %s793_s0 = inlined_call_operand.vmem [shape: f32[64,128], index: 0, kind: input, shape index: {}]   ;;  %s794_s2 = inlined_call_operand.vmem [shape: f32[1,512], index: 2, kind: input, shape index: {}]   ;;  %s795_s3 = inlined_call_operand.vmem [shape: f32[64,512], index: 3, kind: output, shape index: {}]  }
   0x1   :  { %v456_v0 = vld [vmem:[%s792_s1 + $0x4] ss:$16 sps:$4 sm:$0xff]   ;;  %273 = vmatprep.mubr.bf16.mxu0 %v504_v1  ;;  %346 = vmatprep.mubr.bf16.mxu1 %v504_v1  ;;  %v458_v2 = vld [vmem:[%s792_s1 + $0xc] ss:$16 sps:$4 sm:$0xff]   ;;  %v460_v3 = vld [vmem:[%s792_s1] ss:$16 sps:$4 sm:$0xff]  }
   0x2   :  { %241 = vmatprep.subr.bf16.mxu0 %v456_v0  ;;  %v461_v4 = vld [vmem:[%s792_s1 + $0x8] ss:$16 sps:$4 sm:$0xff]   ;;  %314 = vmatprep.subr.bf16.mxu1 %v458_v2  ;;  %v462_v5 = vld [vmem:[%s792_s1 + $0x24] ss:$16 sps:$4 sm:$0xff]   ;;  %v464_v6 = vld [vmem:[%s792_s1 + $0x2c] ss:$16 sps:$4 sm:$0xff]  }
   0x3   :  { %242 = vmatpush1.bf16.msra.mxu0 %v460_v3  ;;  %315 = vmatpush1.bf16.msra.mxu1 %v461_v4  ;;  %v466_v7 = vld [vmem:[%s792_s1 + $0x20] ss:$16 sps:$4 sm:$0xff]   ;;  %v467_v8 = vld [vmem:[%s792_s1 + $0x28] ss:$16 sps:$4 sm:$0xff]   ;;  %v468_v9 = vld [vmem:[%s792_s1 + $0x44] ss:$16 sps:$4 sm:$0xff]  }
   0x4   :  { %243 = vmatprep.subr.bf16.mxu0 %v462_v5  ;;  %316 = vmatprep.subr.bf16.mxu1 %v464_v6  ;;  %v470_v10 = vld [vmem:[%s792_s1 + $0x4c] ss:$16 sps:$4 sm:$0xff]   ;;  %v472_v11 = vld [vmem:[%s792_s1 + $0x40] ss:$16 sps:$4 sm:$0xff]   ;;  %v473_v12 = vld [vmem:[%s792_s1 + $0x48] ss:$16 sps:$4 sm:$0xff]  }
   0x5   :  { %v474_v13 = vld [vmem:[%s792_s1 + $0x64] ss:$16 sps:$4 sm:$0xff]   ;;  %v476_v14 = vld [vmem:[%s792_s1 + $0x6c] ss:$16 sps:$4 sm:$0xff]   ;;  %v478_v15 = vld [vmem:[%s792_s1 + $0x60] ss:$16 sps:$4 sm:$0xff]  }
   0x6   :  { %v479_v16 = vld [vmem:[%s792_s1 + $0x68] ss:$16 sps:$4 sm:$0xff]   ;;  %v480_v17 = vld [vmem:[%s792_s1 + $0x84] ss:$16 sps:$4 sm:$0xff]   ;;  %v482_v18 = vld [vmem:[%s792_s1 + $0x8c] ss:$16 sps:$4 sm:$0xff]  }
   0x7   :  { %244 = vmatpush1.bf16.msra.mxu0 %v466_v7  ;;  %317 = vmatpush1.bf16.msra.mxu1 %v467_v8  ;;  %v484_v19 = vld [vmem:[%s792_s1 + $0x80] ss:$16 sps:$4 sm:$0xff]   ;;  %v485_v20 = vld [vmem:[%s792_s1 + $0x88] ss:$16 sps:$4 sm:$0xff]   ;;  %v486_v21 = vld [vmem:[%s792_s1 + $0xa4] ss:$16 sps:$4 sm:$0xff]  }
   0x8   :  { %245 = vmatprep.subr.bf16.mxu0 %v468_v9  ;;  %318 = vmatprep.subr.bf16.mxu1 %v470_v10  ;;  %v488_v22 = vld [vmem:[%s792_s1 + $0xac] ss:$16 sps:$4 sm:$0xff]   ;;  %v490_v23 = vld [vmem:[%s792_s1 + $0xa0] ss:$16 sps:$4 sm:$0xff]   ;;  %v491_v24 = vld [vmem:[%s792_s1 + $0xa8] ss:$16 sps:$4 sm:$0xff]  }
   0x9   :  { %v492_v25 = vld [vmem:[%s792_s1 + $0xc4] ss:$16 sps:$4 sm:$0xff]   ;;  %v494_v26 = vld [vmem:[%s792_s1 + $0xcc] ss:$16 sps:$4 sm:$0xff]   ;;  %v496_v27 = vld [vmem:[%s792_s1 + $0xc0] ss:$16 sps:$4 sm:$0xff]  }
   0xa   :  { %v497_v28 = vld [vmem:[%s792_s1 + $0xc8] ss:$16 sps:$4 sm:$0xff]   ;;  %v498_v29 = vld [vmem:[%s792_s1 + $0xe4] ss:$16 sps:$4 sm:$0xff]   ;;  %v500_v30 = vld [vmem:[%s792_s1 + $0xec] ss:$16 sps:$4 sm:$0xff]  }
   0xb   :  { %246 = vmatpush1.bf16.msra.mxu0 %v472_v11  ;;  %319 = vmatpush1.bf16.msra.mxu1 %v473_v12  ;;  %v502_v31 = vld [vmem:[%s792_s1 + $0xe0] ss:$16 sps:$4 sm:$0xff]   ;;  %v503_v32 = vld [vmem:[%s792_s1 + $0xe8] ss:$16 sps:$4 sm:$0xff]   ;;  %v62_v46 = vshrl.u32 %v61_v45, 7 }
   0xc   :  { %247 = vmatprep.subr.bf16.mxu0 %v474_v13  ;;  %320 = vmatprep.subr.bf16.mxu1 %v476_v14  ;;  %v15_v33 = vld [vmem:[%s793_s0] sm:$0xff]  ;;  %v16_v34 = vld [vmem:[%s793_s0 + $0x8] sm:$0xff]  ;;  %v17_v36 = vld [vmem:[%s793_s0 + $0x10] sm:$0xff] }
   0xd   :  { %v23_v35 = vpack.c.bf16 %v16_v34, %v15_v33  ;;  %v18_v37 = vld [vmem:[%s793_s0 + $0x18] sm:$0xff]  ;;  %v19_v39 = vld [vmem:[%s793_s0 + $0x20] sm:$0xff]  ;;  %v20_v40 = vld [vmem:[%s793_s0 + $0x28] sm:$0xff]  ;;  %v63_v47 = vsub.s32 0, %v62_v46  ;;  %v71_v48 = vsub.s32 2, %v62_v46  ;;  %v67_v50 = vsub.s32 1, %v62_v46 }
   0xe   :  { %v24_v38 = vpack.c.bf16 %v18_v37, %v17_v36  ;;  %v25_v41 = vpack.c.bf16 %v20_v40, %v19_v39  ;;  %v21_v42 = vld [vmem:[%s793_s0 + $0x30] sm:$0xff]  ;;  %v22_v43 = vld [vmem:[%s793_s0 + $0x38] sm:$0xff]  ;;  %v59_v49 = vld [vmem:[%s794_s2] sm:$0xf]  ;;  %v75_v51 = vsub.s32 3, %v62_v46 }
   0xf   :  { %248 = vmatpush1.bf16.msra.mxu0 %v478_v15  ;;  %321 = vmatpush1.bf16.msra.mxu1 %v479_v16  ;;  %v26_v44 = vpack.c.bf16 %v22_v43, %v21_v42  ;;  %v656_v52 = vrot.slane %v59_v49, %v63_v47  ;;  %v658_v53 = vrot.slane %v59_v49, %v71_v48 }
  0x10   :  { %249 = vmatprep.subr.bf16.mxu0 %v480_v17  ;;  %322 = vmatprep.subr.bf16.mxu1 %v482_v18  ;;  %v660_v54 = vrot.slane %v59_v49, %v67_v50  ;;  %v662_v55 = vrot.slane %v59_v49, %v75_v51 }
  0x13   :  { %250 = vmatpush1.bf16.msra.mxu0 %v484_v19  ;;  %323 = vmatpush1.bf16.msra.mxu1 %v485_v20 }
  0x14   :  { %251 = vmatprep.subr.bf16.mxu0 %v486_v21  ;;  %324 = vmatprep.subr.bf16.mxu1 %v488_v22 }
  0x17   :  { %252 = vmatpush1.bf16.msra.mxu0 %v490_v23  ;;  %325 = vmatpush1.bf16.msra.mxu1 %v491_v24 }
  0x18   :  { %253 = vmatprep.subr.bf16.mxu0 %v492_v25  ;;  %326 = vmatprep.subr.bf16.mxu1 %v494_v26 }
  0x1b   :  { %254 = vmatpush1.bf16.msra.mxu0 %v496_v27  ;;  %327 = vmatpush1.bf16.msra.mxu1 %v497_v28 }
  0x1c   :  { %255 = vmatprep.subr.bf16.mxu0 %v498_v29  ;;  %328 = vmatprep.subr.bf16.mxu1 %v500_v30 }
  0x1f   :  { %256 = vmatpush1.bf16.msra.mxu0 %v502_v31  ;;  %329 = vmatpush1.bf16.msra.mxu1 %v503_v32 }
  0x22   :  { %274 = vmatmul.mubr.bf16.vlgmr.msra.gmra.mrb[0].mxu0 %v23_v35  ;;  %347 = vmatmul.mubr.bf16.vlgmr.msra.gmra.mrb[0].mxu1 %v23_v35 }
  0x23   :  { %283 = vmatprep.mubr.bf16.mxu0 %v504_v1  ;;  %356 = vmatprep.mubr.bf16.mxu1 %v504_v1 }
  0x2a   :  { %284 = vmatmul.mubr.bf16.gmra.mrb[4].mxu0 %v24_v38  ;;  %357 = vmatmul.mubr.bf16.gmra.mrb[4].mxu1 %v24_v38 }
  0x2b   :  { %293 = vmatprep.mubr.bf16.mxu0 %v504_v1  ;;  %366 = vmatprep.mubr.bf16.mxu1 %v504_v1 }
  0x32   :  { %294 = vmatmul.mubr.bf16.gmra.mrb[8].mxu0 %v25_v41  ;;  %367 = vmatmul.mubr.bf16.gmra.mrb[8].mxu1 %v25_v41 }
  0x33   :  { %303 = vmatprep.mubr.bf16.mxu0 %v504_v1  ;;  %376 = vmatprep.mubr.bf16.mxu1 %v504_v1 }
  0x3a   :  { %304 = vmatmul.mubr.bf16.gmra.mrb[12].mxu0 %v26_v44  ;;  %377 = vmatmul.mubr.bf16.gmra.mrb[12].mxu1 %v26_v44 }
  0xf5   :  { %v275_v56 = vpop.f32.mrb[0].mxu0  ;;  %v348_v57 = vpop.f32.mrb[0].mxu1 }
  0xf6   :  { %v276_v58 = vadd.f32 %v275_v56, %v656_v52  ;;  %v349_v59 = vadd.f32 %v348_v57, %v658_v53  ;;  %v277_v60 = vpop.f32.mrb[1].mxu0  ;;  %v350_v61 = vpop.f32.mrb[1].mxu1 }
  0xf7   :  { %v278_v62 = vadd.f32 %v277_v60, %v660_v54  ;;  %v351_v63 = vadd.f32 %v350_v61, %v662_v55  ;;  %v279_v0 = vpop.f32.mrb[2].mxu0  ;;  %v352_v1 = vpop.f32.mrb[2].mxu1 }
  0xf8   :  { %387 = vst [vmem:[%s795_s3] sm:$0xff] %v276_v58  ;;  %389 = vst [vmem:[%s795_s3 + $0x10] sm:$0xff] %v349_v59  ;;  %v280_v2 = vadd.f32 %v279_v0, %v656_v52  ;;  %v353_v3 = vadd.f32 %v352_v1, %v658_v53  ;;  %v281_v4 = vpop.f32.mrb[3].mxu0  ;;  %v354_v5 = vpop.f32.mrb[3].mxu1 }
  0xf9   :  { %388 = vst [vmem:[%s795_s3 + $0x8] sm:$0xff] %v278_v62  ;;  %390 = vst [vmem:[%s795_s3 + $0x18] sm:$0xff] %v351_v63  ;;  %v282_v6 = vadd.f32 %v281_v4, %v660_v54  ;;  %v355_v7 = vadd.f32 %v354_v5, %v662_v55 }
  0xfa   :  { %391 = vst [vmem:[%s795_s3 + $0x20] sm:$0xff] %v280_v2  ;;  %393 = vst [vmem:[%s795_s3 + $0x30] sm:$0xff] %v353_v3 }
  0xfb   :  { %392 = vst [vmem:[%s795_s3 + $0x28] sm:$0xff] %v282_v6  ;;  %394 = vst [vmem:[%s795_s3 + $0x38] sm:$0xff] %v355_v7 }
  0xfd   :  { %v285_v8 = vpop.f32.mrb[4].mxu0  ;;  %v358_v9 = vpop.f32.mrb[4].mxu1 }
  0xfe   :  { %v286_v10 = vadd.f32 %v285_v8, %v656_v52  ;;  %v359_v11 = vadd.f32 %v358_v9, %v658_v53  ;;  %v287_v12 = vpop.f32.mrb[5].mxu0  ;;  %v360_v13 = vpop.f32.mrb[5].mxu1 }
  0xff   :  { %v288_v14 = vadd.f32 %v287_v12, %v660_v54  ;;  %v361_v15 = vadd.f32 %v360_v13, %v662_v55  ;;  %v289_v16 = vpop.f32.mrb[6].mxu0  ;;  %v362_v17 = vpop.f32.mrb[6].mxu1 }
 0x100   :  { %395 = vst [vmem:[%s795_s3 + $0x40] sm:$0xff] %v286_v10  ;;  %397 = vst [vmem:[%s795_s3 + $0x50] sm:$0xff] %v359_v11  ;;  %v290_v18 = vadd.f32 %v289_v16, %v656_v52  ;;  %v363_v19 = vadd.f32 %v362_v17, %v658_v53  ;;  %v291_v20 = vpop.f32.mrb[7].mxu0  ;;  %v364_v21 = vpop.f32.mrb[7].mxu1 }
 0x101   :  { %396 = vst [vmem:[%s795_s3 + $0x48] sm:$0xff] %v288_v14  ;;  %398 = vst [vmem:[%s795_s3 + $0x58] sm:$0xff] %v361_v15  ;;  %v292_v22 = vadd.f32 %v291_v20, %v660_v54  ;;  %v365_v23 = vadd.f32 %v364_v21, %v662_v55 }
 0x102   :  { %399 = vst [vmem:[%s795_s3 + $0x60] sm:$0xff] %v290_v18  ;;  %401 = vst [vmem:[%s795_s3 + $0x70] sm:$0xff] %v363_v19 }
 0x103   :  { %400 = vst [vmem:[%s795_s3 + $0x68] sm:$0xff] %v292_v22  ;;  %402 = vst [vmem:[%s795_s3 + $0x78] sm:$0xff] %v365_v23 }
 0x105   :  { %v295_v24 = vpop.f32.mrb[8].mxu0  ;;  %v368_v25 = vpop.f32.mrb[8].mxu1 }
 0x106   :  { %v296_v26 = vadd.f32 %v295_v24, %v656_v52  ;;  %v369_v27 = vadd.f32 %v368_v25, %v658_v53  ;;  %v297_v28 = vpop.f32.mrb[9].mxu0  ;;  %v370_v29 = vpop.f32.mrb[9].mxu1 }
 0x107   :  { %v298_v30 = vadd.f32 %v297_v28, %v660_v54  ;;  %v371_v31 = vadd.f32 %v370_v29, %v662_v55  ;;  %v299_v32 = vpop.f32.mrb[10].mxu0  ;;  %v372_v33 = vpop.f32.mrb[10].mxu1 }
 0x108   :  { %403 = vst [vmem:[%s795_s3 + $0x80] sm:$0xff] %v296_v26  ;;  %405 = vst [vmem:[%s795_s3 + $0x90] sm:$0xff] %v369_v27  ;;  %v300_v34 = vadd.f32 %v299_v32, %v656_v52  ;;  %v373_v35 = vadd.f32 %v372_v33, %v658_v53  ;;  %v301_v36 = vpop.f32.mrb[11].mxu0  ;;  %v374_v37 = vpop.f32.mrb[11].mxu1 }
 0x109   :  { %404 = vst [vmem:[%s795_s3 + $0x88] sm:$0xff] %v298_v30  ;;  %406 = vst [vmem:[%s795_s3 + $0x98] sm:$0xff] %v371_v31  ;;  %v302_v38 = vadd.f32 %v301_v36, %v660_v54  ;;  %v375_v39 = vadd.f32 %v374_v37, %v662_v55 }
 0x10a   :  { %407 = vst [vmem:[%s795_s3 + $0xa0] sm:$0xff] %v300_v34  ;;  %409 = vst [vmem:[%s795_s3 + $0xb0] sm:$0xff] %v373_v35 }
 0x10b   :  { %408 = vst [vmem:[%s795_s3 + $0xa8] sm:$0xff] %v302_v38  ;;  %410 = vst [vmem:[%s795_s3 + $0xb8] sm:$0xff] %v375_v39 }
 0x10d   :  { %v305_v40 = vpop.f32.mrb[12].mxu0  ;;  %v378_v41 = vpop.f32.mrb[12].mxu1 }
 0x10e   :  { %v306_v42 = vadd.f32 %v305_v40, %v656_v52  ;;  %v379_v43 = vadd.f32 %v378_v41, %v658_v53  ;;  %v307_v44 = vpop.f32.mrb[13].mxu0  ;;  %v380_v45 = vpop.f32.mrb[13].mxu1 }
 0x10f   :  { %v308_v46 = vadd.f32 %v307_v44, %v660_v54  ;;  %v381_v47 = vadd.f32 %v380_v45, %v662_v55  ;;  %v309_v48 = vpop.f32.mrb[14].mxu0  ;;  %v382_v49 = vpop.f32.mrb[14].mxu1 }
 0x110   :  { %411 = vst [vmem:[%s795_s3 + $0xc0] sm:$0xff] %v306_v42  ;;  %413 = vst [vmem:[%s795_s3 + $0xd0] sm:$0xff] %v379_v43  ;;  %v310_v50 = vadd.f32 %v309_v48, %v656_v52  ;;  %v383_v51 = vadd.f32 %v382_v49, %v658_v53  ;;  %v311_v56 = vpop.f32.mrb[15].mxu0  ;;  %v384_v57 = vpop.f32.mrb[15].mxu1 }
 0x111   :  { %412 = vst [vmem:[%s795_s3 + $0xc8] sm:$0xff] %v308_v46  ;;  %414 = vst [vmem:[%s795_s3 + $0xd8] sm:$0xff] %v381_v47  ;;  %v312_v58 = vadd.f32 %v311_v56, %v660_v54  ;;  %v385_v59 = vadd.f32 %v384_v57, %v662_v55 }
 0x112   :  { %415 = vst [vmem:[%s795_s3 + $0xe0] sm:$0xff] %v310_v50  ;;  %417 = vst [vmem:[%s795_s3 + $0xf0] sm:$0xff] %v383_v51 }
 0x113   :  { %416 = vst [vmem:[%s795_s3 + $0xe8] sm:$0xff] %v312_v58  ;;  %418 = vst [vmem:[%s795_s3 + $0xf8] sm:$0xff] %v385_v59 }

// kernel: residual_gru_forward.7
= control target key start
LH: loop header
LB: loop body
LE: loop exit
PB: predicated region body
PF: predicated region fallthrough
CT: control target
= control target key end

     0   :  { %v3203_v1 = vmov 0   ;;  %s4079_s5 = inlined_call_operand.vmem [shape: bf16[128,512], index: 5, kind: input, shape index: {}]   ;;  %s4080_s0 = inlined_call_operand.vmem [shape: s32[8,1], index: 0, kind: input, shape index: {}]   ;;  %s4081_s3 = inlined_call_operand.vmem [shape: f32[8,128], index: 3, kind: input, shape index: {}]   ;;  %s4082_s1 = inlined_call_operand.vmem [shape: f32[8,8,512], index: 1, kind: input, shape index: {}]   ;;  %s4083_s4 = inlined_call_operand.vmem [shape: f32[8,128], index: 4, kind: input, shape index: {}]   ;;  %s4084_s2 = inlined_call_operand.vmem [shape: f32[8,8,128], index: 2, kind: input, shape index: {}]   ;;  %s4085_s6 = inlined_call_operand.vmem [shape: f32[8,8,128], index: 6, kind: output, shape index: {0}]   ;;  %s4086_s8 = inlined_call_operand.vmem [shape: f32[8,128], index: 8, kind: output, shape index: {2}]   ;;  %s4087_s7 = inlined_call_operand.vmem [shape: f32[8,128], index: 7, kind: output, shape index: {1}]  }
   0x1   :  { %v3252_v0 = vld [vmem:[%s4079_s5 + $0x4] ss:$16 sps:$4 sm:$0xff]   ;;  %268 = vmatprep.mubr.bf16.mxu0 %v3203_v1  ;;  %309 = vmatprep.mubr.bf16.mxu1 %v3203_v1  ;;  %v3259_v2 = vld [vmem:[%s4079_s5] ss:$16 sps:$4 sm:$0xff]   ;;  %v3284_v6 = vld [vmem:[%s4079_s5 + $0xc] ss:$16 sps:$4 sm:$0xff]  }
   0x2   :  { %2977 = vset.pattern.permute.xlu0 %v3203_v1  ;;  %2978 = vset.pattern.permute.xlu1 %v3203_v1  ;;  %v3267_v3 = vld [vmem:[%s4079_s5 + $0x24] ss:$16 sps:$4 sm:$0xff]   ;;  %v3273_v4 = vld [vmem:[%s4079_s5 + $0x20] ss:$16 sps:$4 sm:$0xff]   ;;  %v3289_v7 = vld [vmem:[%s4079_s5 + $0x8] ss:$16 sps:$4 sm:$0xff]  }
   0x3   :  { %236 = vmatprep.subr.bf16.mxu0 %v3252_v0  ;;  %v3279_v5 = vld [vmem:[%s4079_s5 + $0x44] ss:$16 sps:$4 sm:$0xff]   ;;  %v3295_v8 = vld [vmem:[%s4079_s5 + $0x40] ss:$16 sps:$4 sm:$0xff]   ;;  %277 = vmatprep.subr.bf16.mxu1 %v3284_v6  ;;  %v3308_v10 = vld [vmem:[%s4079_s5 + $0x2c] ss:$16 sps:$4 sm:$0xff]  }
   0x4   :  { %237 = vmatpush1.bf16.msra.mxu0 %v3259_v2  ;;  %v3302_v9 = vld [vmem:[%s4079_s5 + $0x64] ss:$16 sps:$4 sm:$0xff]   ;;  %278 = vmatpush1.bf16.msra.mxu1 %v3289_v7  ;;  %v3313_v11 = vld [vmem:[%s4079_s5 + $0x28] ss:$16 sps:$4 sm:$0xff]   ;;  %v3320_v12 = vld [vmem:[%s4079_s5 + $0x60] ss:$16 sps:$4 sm:$0xff]  }
   0x5   :  { %238 = vmatprep.subr.bf16.mxu0 %v3267_v3  ;;  %279 = vmatprep.subr.bf16.mxu1 %v3308_v10  ;;  %v3325_v13 = vld [vmem:[%s4079_s5 + $0x84] ss:$16 sps:$4 sm:$0xff]   ;;  %v3330_v14 = vld [vmem:[%s4079_s5 + $0x4c] ss:$16 sps:$4 sm:$0xff]   ;;  %v3337_v15 = vld [vmem:[%s4079_s5 + $0x48] ss:$16 sps:$4 sm:$0xff]  }
   0x6   :  { %v3343_v16 = vld [vmem:[%s4079_s5 + $0x6c] ss:$16 sps:$4 sm:$0xff]   ;;  %v3349_v17 = vld [vmem:[%s4079_s5 + $0x80] ss:$16 sps:$4 sm:$0xff]   ;;  %v3355_v18 = vld [vmem:[%s4079_s5 + $0xa4] ss:$16 sps:$4 sm:$0xff]  }
   0x7   :  { %v3361_v19 = vld [vmem:[%s4079_s5 + $0x68] ss:$16 sps:$4 sm:$0xff]   ;;  %v3367_v20 = vld [vmem:[%s4079_s5 + $0x8c] ss:$16 sps:$4 sm:$0xff]   ;;  %v3372_v21 = vld [vmem:[%s4079_s5 + $0xa0] ss:$16 sps:$4 sm:$0xff]  }
   0x8   :  { %239 = vmatpush1.bf16.msra.mxu0 %v3273_v4  ;;  %280 = vmatpush1.bf16.msra.mxu1 %v3313_v11  ;;  %v3378_v22 = vld [vmem:[%s4079_s5 + $0xc4] ss:$16 sps:$4 sm:$0xff]   ;;  %v3385_v23 = vld [vmem:[%s4079_s5 + $0x88] ss:$16 sps:$4 sm:$0xff]   ;;  %v3390_v24 = vld [vmem:[%s4079_s5 + $0xc0] ss:$16 sps:$4 sm:$0xff]  }
   0x9   :  { %240 = vmatprep.subr.bf16.mxu0 %v3279_v5  ;;  %281 = vmatprep.subr.bf16.mxu1 %v3330_v14  ;;  %v3396_v25 = vld [vmem:[%s4079_s5 + $0xac] ss:$16 sps:$4 sm:$0xff]   ;;  %v3401_v26 = vld [vmem:[%s4080_s0] sm:$0xff]  ;;  %v3411_v28 = vld [vmem:[%s4079_s5 + $0xa8] ss:$16 sps:$4 sm:$0xff]  }
   0xa   :  { %v3406_v27 = vld [vmem:[%s4079_s5 + $0xe4] ss:$16 sps:$4 sm:$0xff]   ;;  %vm2681_vm0 = vcmp.gt.s32.totalorder %v3401_v26, 0  ;;  %v3418_v29 = vld [vmem:[%s4079_s5 + $0xcc] ss:$16 sps:$4 sm:$0xff]   ;;  %vm2721_vm1 = vcmp.gt.s32.totalorder %v3401_v26, 1 }
   0xb   :  { %v348_v30 = vsel %vm2681_vm0, 1, %v3203_v1  ;;  %v3427_v31 = vld [vmem:[%s4079_s5 + $0xe0] ss:$16 sps:$4 sm:$0xff]   ;;  %v3438_v33 = vld [vmem:[%s4079_s5 + $0xc8] ss:$16 sps:$4 sm:$0xff]   ;;  %v670_v34 = vsel %vm2721_vm1, 1, %v3203_v1 }
   0xc   :  { %241 = vmatpush1.bf16.msra.mxu0 %v3295_v8  ;;  %282 = vmatpush1.bf16.msra.mxu1 %v3337_v15  ;;  %v3432_v32 = vld [vmem:[%s4081_s3] sm:$0xff]  ;;  %v3445_v35 = vld [vmem:[%s4079_s5 + $0xec] ss:$16 sps:$4 sm:$0xff]   ;;  %vm2847_vm2 = vcmp.gt.s32.totalorder %v3401_v26, 4  ;;  %v3456_v37 = vld [vmem:[%s4079_s5 + $0xe8] ss:$16 sps:$4 sm:$0xff]  }
   0xd   :  { %242 = vmatprep.subr.bf16.mxu0 %v3302_v9  ;;  %283 = vmatprep.subr.bf16.mxu1 %v3343_v16  ;;  %v43_v36 = vpack.c.bf16 %v3432_v32, %v3432_v32  ;;  %v1642_v38 = vsel %vm2847_vm2, 1, %v3203_v1  ;;  %vm2931_vm3 = vcmp.gt.s32.totalorder %v3401_v26, 6  ;;  %v39_v40 = vld [vmem:[%s4082_s1] sm:$0xff]  ;;  %v40_v41 = vld [vmem:[%s4082_s1 + $0x8] sm:$0xff]  ;;  %v42_v50 = vld [vmem:[%s4082_s1 + $0x18] sm:$0xff]  ;;  %vm2763_vm5 = vcmp.gt.s32.totalorder %v3401_v26, 2 }
   0xe   :  { %350 = vperm.xlu0 %2977, %v348_v30   ;;  %v2290_v39 = vsel %vm2931_vm3, 1, %v3203_v1  ;;  %v41_v56 = vld [vmem:[%s4082_s1 + $0x10] sm:$0xff]  ;;  %vm2805_vm6 = vcmp.gt.s32.totalorder %v3401_v26, 3  ;;  %vm2889_vm7 = vcmp.gt.s32.totalorder %v3401_v26, 5  ;;  %vm2973_vm8 = vcmp.gt.s32.totalorder %v3401_v26, 7 }
  0x10   :  { %243 = vmatpush1.bf16.msra.mxu0 %v3320_v12  ;;  %284 = vmatpush1.bf16.msra.mxu1 %v3361_v19 }
  0x11   :  { %244 = vmatprep.subr.bf16.mxu0 %v3325_v13  ;;  %285 = vmatprep.subr.bf16.mxu1 %v3367_v20 }
  0x12   :  { %672 = vperm.xlu0 %2977, %v670_v34   ;;  %v33_v34 = vld [vmem:[%s4083_s4] sm:$0xff] }
  0x14   :  { %245 = vmatpush1.bf16.msra.mxu0 %v3349_v17  ;;  %286 = vmatpush1.bf16.msra.mxu1 %v3385_v23 }
  0x15   :  { %246 = vmatprep.subr.bf16.mxu0 %v3355_v18  ;;  %287 = vmatprep.subr.bf16.mxu1 %v3396_v25 }
  0x16   :  { %1644 = vperm.xlu0 %2977, %v1642_v38  }
  0x18   :  { %247 = vmatpush1.bf16.msra.mxu0 %v3372_v21  ;;  %288 = vmatpush1.bf16.msra.mxu1 %v3411_v28 }
  0x19   :  { %248 = vmatprep.subr.bf16.mxu0 %v3378_v22  ;;  %289 = vmatprep.subr.bf16.mxu1 %v3418_v29 }
  0x1a   :  { %2292 = vperm.xlu0 %2977, %v2290_v39  }
  0x1c   :  { %249 = vmatpush1.bf16.msra.mxu0 %v3390_v24  ;;  %290 = vmatpush1.bf16.msra.mxu1 %v3438_v33 }
  0x1d   :  { %250 = vmatprep.subr.bf16.mxu0 %v3406_v27  ;;  %291 = vmatprep.subr.bf16.mxu1 %v3445_v35 }
  0x20   :  { %251 = vmatpush1.bf16.msra.mxu0 %v3427_v31  ;;  %292 = vmatpush1.bf16.msra.mxu1 %v3456_v37 }
  0x21   :  { %557 = vmatprep.subr.bf16.mxu0 %v3252_v0  ;;  %598 = vmatprep.subr.bf16.mxu1 %v3284_v6 }
  0x23   :  { %269 = vmatmul.mubr.bf16.vlgmr.msra.gmra.mrb[0].mxu0 %v43_v36  ;;  %310 = vmatmul.mubr.bf16.vlgmr.msra.gmra.mrb[0].mxu1 %v43_v36 }
  0x24   :  { %558 = vmatpush1.bf16.msra.mxu0 %v3259_v2  ;;  %589 = vmatprep.mubr.bf16.mxu0 %v3203_v1 }
  0x25   :  { %559 = vmatprep.subr.bf16.mxu0 %v3267_v3  ;;  %599 = vmatpush1.bf16.msra.mxu1 %v3289_v7 }
  0x26   :  { %600 = vmatprep.subr.bf16.mxu1 %v3308_v10  ;;  %630 = vmatprep.mubr.bf16.mxu1 %v3203_v1 }
  0x28   :  { %560 = vmatpush1.bf16.msra.mxu0 %v3273_v4 }
  0x29   :  { %561 = vmatprep.subr.bf16.mxu0 %v3279_v5  ;;  %601 = vmatpush1.bf16.msra.mxu1 %v3313_v11 }
  0x2a   :  { %602 = vmatprep.subr.bf16.mxu1 %v3330_v14 }
  0x2c   :  { %562 = vmatpush1.bf16.msra.mxu0 %v3295_v8 }
  0x2d   :  { %563 = vmatprep.subr.bf16.mxu0 %v3302_v9  ;;  %603 = vmatpush1.bf16.msra.mxu1 %v3337_v15 }
  0x2e   :  { %604 = vmatprep.subr.bf16.mxu1 %v3343_v16 }
  0x30   :  { %564 = vmatpush1.bf16.msra.mxu0 %v3320_v12 }
  0x31   :  { %565 = vmatprep.subr.bf16.mxu0 %v3325_v13  ;;  %605 = vmatpush1.bf16.msra.mxu1 %v3361_v19 }
  0x32   :  { %606 = vmatprep.subr.bf16.mxu1 %v3367_v20 }
  0x34   :  { %566 = vmatpush1.bf16.msra.mxu0 %v3349_v17 }
  0x35   :  { %567 = vmatprep.subr.bf16.mxu0 %v3355_v18  ;;  %607 = vmatpush1.bf16.msra.mxu1 %v3385_v23 }
  0x36   :  { %608 = vmatprep.subr.bf16.mxu1 %v3396_v25 }
  0x38   :  { %568 = vmatpush1.bf16.msra.mxu0 %v3372_v21 }
  0x39   :  { %569 = vmatprep.subr.bf16.mxu0 %v3378_v22  ;;  %609 = vmatpush1.bf16.msra.mxu1 %v3411_v28 }
  0x3a   :  { %610 = vmatprep.subr.bf16.mxu1 %v3418_v29 }
  0x3c   :  { %570 = vmatpush1.bf16.msra.mxu0 %v3390_v24 }
  0x3d   :  { %571 = vmatprep.subr.bf16.mxu0 %v3406_v27  ;;  %611 = vmatpush1.bf16.msra.mxu1 %v3438_v33 }
  0x3e   :  { %612 = vmatprep.subr.bf16.mxu1 %v3445_v35 }
  0x40   :  { %572 = vmatpush1.bf16.msra.mxu0 %v3427_v31 }
  0x41   :  { %881 = vmatprep.subr.bf16.mxu0 %v3252_v0  ;;  %613 = vmatpush1.bf16.msra.mxu1 %v3456_v37 }
  0x42   :  { %922 = vmatprep.subr.bf16.mxu1 %v3284_v6 }
  0x8d   :  { %v351_v39 = vpop.permute.xlu0 %350 }
  0x8e   :  { %vm352_vm4 = vcmp.eq.s32.totalorder %v351_v39, 1 }
  0xf6   :  { %v270_v42 = vpop.f32.mrb[0].mxu0  ;;  %v311_v51 = vpop.f32.mrb[0].mxu1 }
  0xf7   :  { %v318_v43 = vadd.f32 %v270_v42, %v39_v40  ;;  %v272_v44 = vpop.f32.mrb[1].mxu0  ;;  %v313_v52 = vpop.f32.mrb[1].mxu1  ;;  %v320_v58 = vadd.f32 %v311_v51, %v41_v56 }
  0xf8   :  { %v319_v45 = vadd.f32 %v272_v44, %v40_v41  ;;  %v274_v46 = vpop.f32.mrb[2].mxu0  ;;  %v321_v53 = vadd.f32 %v313_v52, %v42_v50  ;;  %v315_v54 = vpop.f32.mrb[2].mxu1 }
  0xf9   :  { %v2678_v47 = vmul.f32 -1.442695, %v318_v43  ;;  %v275_v48 = vpop.f32.mrb[3].mxu0  ;;  %v316_v55 = vpop.f32.mrb[3].mxu1  ;;  %v1966_v54 = vsel %vm2889_vm7, 1, %v3203_v1 }
  0xfa   :  { %v2679_v49 = vmul.f32 -1.442695, %v319_v45  ;;  %v2680_v57 = vmul.f32 -1.442695, %v321_v53  ;;  %v355_v48 = vld [vmem:[%s4084_s2] sm:$0xff]  ;;  %v1318_v53 = vsel %vm2805_vm6, 1, %v3203_v1 }
  0xfb   :  { %3075 = vpow2.f32 %v2678_v47  ;;  %v2683_v55 = vld [vmem:[%s4082_s1 + $0x28] sm:$0xff] }
  0xfc   :  { %3077 = vpow2.f32 %v2679_v49 }
  0xfd   :  { %3079 = vpow2.f32 %v2680_v57 }
  0xfe   :  { %3081 = vtanh.f32 %v320_v58 }
 0x105   :  { %v3076_v59 = vpop.eup %3075 }
 0x106   :  { %v3078_v60 = vpop.eup %3077  ;;  %v325_v61 = vadd.f32 1.0, %v3076_v59 }
 0x107   :  { %v331_v62 = vadd.f32 1.0, %v3078_v60  ;;  %v3080_v63 = vpop.eup %3079 }
 0x108   :  { %3083 = vrcp.f32 %v325_v61  ;;  %v3082_v30 = vpop.eup %3081  ;;  %v338_v38 = vadd.f32 1.0, %v3080_v63 }
 0x109   :  { %3085 = vrcp.f32 %v331_v62 }
 0x10a   :  { %3087 = vrcp.f32 %v338_v38  ;;  %v2685_v38 = vld [vmem:[%s4082_s1 + $0x38] sm:$0xff] }
 0x112   :  { %v3084_v36 = vpop.eup %3083 }
 0x113   :  { %v3086_v40 = vpop.eup %3085  ;;  %v342_v41 = vmul.f32 %v3084_v36, %v3082_v30 }
 0x114   :  { %v341_v42 = vmul.f32 %v3086_v40, %v33_v34  ;;  %v3088_v45 = vpop.eup %3087  ;;  %v2684_v40 = vld [vmem:[%s4082_s1 + $0x30] sm:$0xff] }
 0x116   :  { %v343_v43 = vadd.f32 %v342_v41, %v341_v42 }
 0x118   :  { %3089 = vtanh.f32 %v343_v43  ;;  %v3516_v44 = vsel %vm352_vm4, %v343_v43, %v33_v34 }
 0x122   :  { %v3090_v46 = vpop.eup %3089 }
 0x123   :  { %v345_v47 = vmul.f32 %v3090_v46, %v3088_v45 }
 0x125   :  { %v3522_v49 = vsel %vm352_vm4, %v345_v47, %v3432_v32  ;;  %v356_v50 = vsel %vm352_vm4, %v345_v47, 0.0  ;;  %v994_v32 = vsel %vm2763_vm5, 1, %v3203_v1 }
 0x126   :  { %v357_v51 = vadd.f32 %v356_v50, %v355_v48  ;;  %v364_v52 = vpack.c.bf16 %v3522_v49, %v3522_v49  ;;  %996 = vperm.xlu1 %2978, %v994_v32  }
 0x128   :  { %358 = vst [vmem:[%s4085_s6] sm:$0xff] %v357_v51  ;;  %590 = vmatmul.mubr.bf16.vlgmr.msra.gmra.mrb[4].mxu0 %v364_v52  ;;  %631 = vmatmul.mubr.bf16.vlgmr.msra.gmra.mrb[4].mxu1 %v364_v52 }
 0x129   :  { %882 = vmatpush1.bf16.msra.mxu0 %v3259_v2  ;;  %923 = vmatpush1.bf16.msra.mxu1 %v3289_v7 }
 0x12a   :  { %883 = vmatprep.subr.bf16.mxu0 %v3267_v3  ;;  %924 = vmatprep.subr.bf16.mxu1 %v3308_v10 }
 0x12b   :  { %913 = vmatprep.mubr.bf16.mxu0 %v3203_v1  ;;  %954 = vmatprep.mubr.bf16.mxu1 %v3203_v1 }
 0x12c   :  { %1320 = vperm.xlu1 %2978, %v1318_v53  }
 0x12d   :  { %884 = vmatpush1.bf16.msra.mxu0 %v3273_v4  ;;  %925 = vmatpush1.bf16.msra.mxu1 %v3313_v11 }
 0x12e   :  { %885 = vmatprep.subr.bf16.mxu0 %v3279_v5  ;;  %926 = vmatprep.subr.bf16.mxu1 %v3330_v14 }
 0x130   :  { %1968 = vperm.xlu1 %2978, %v1966_v54  }
 0x131   :  { %886 = vmatpush1.bf16.msra.mxu0 %v3295_v8  ;;  %927 = vmatpush1.bf16.msra.mxu1 %v3337_v15 }
 0x132   :  { %887 = vmatprep.subr.bf16.mxu0 %v3302_v9  ;;  %928 = vmatprep.subr.bf16.mxu1 %v3343_v16 }
 0x135   :  { %888 = vmatpush1.bf16.msra.mxu0 %v3320_v12  ;;  %929 = vmatpush1.bf16.msra.mxu1 %v3361_v19 }
 0x136   :  { %889 = vmatprep.subr.bf16.mxu0 %v3325_v13  ;;  %930 = vmatprep.subr.bf16.mxu1 %v3367_v20 }
 0x139   :  { %890 = vmatpush1.bf16.msra.mxu0 %v3349_v17  ;;  %931 = vmatpush1.bf16.msra.mxu1 %v3385_v23 }
 0x13a   :  { %891 = vmatprep.subr.bf16.mxu0 %v3355_v18  ;;  %932 = vmatprep.subr.bf16.mxu1 %v3396_v25 }
 0x13d   :  { %892 = vmatpush1.bf16.msra.mxu0 %v3372_v21  ;;  %933 = vmatpush1.bf16.msra.mxu1 %v3411_v28 }
 0x13e   :  { %893 = vmatprep.subr.bf16.mxu0 %v3378_v22  ;;  %934 = vmatprep.subr.bf16.mxu1 %v3418_v29 }
 0x141   :  { %894 = vmatpush1.bf16.msra.mxu0 %v3390_v24  ;;  %935 = vmatpush1.bf16.msra.mxu1 %v3438_v33 }
 0x142   :  { %895 = vmatprep.subr.bf16.mxu0 %v3406_v27  ;;  %936 = vmatprep.subr.bf16.mxu1 %v3445_v35 }
 0x145   :  { %896 = vmatpush1.bf16.msra.mxu0 %v3427_v31  ;;  %937 = vmatpush1.bf16.msra.mxu1 %v3456_v37 }
 0x146   :  { %1205 = vmatprep.subr.bf16.mxu0 %v3252_v0  ;;  %1246 = vmatprep.subr.bf16.mxu1 %v3284_v6  ;;  %v2614_v0 = vsel %vm2973_vm8, 1, %v3203_v1  ;;  %v2682_v6 = vld [vmem:[%s4082_s1 + $0x20] sm:$0xff] }
 0x147   :  { %2616 = vperm.xlu1 %2978, %v2614_v0   ;;  %v673_v0 = vpop.permute.xlu0 %672 }
 0x148   :  { %vm674_vm9 = vcmp.eq.s32.totalorder %v673_v0, 1  ;;  %v3725_v0 = vld [vmem:[%s4079_s5 + $0x48] ss:$16 sps:$4 sm:$0xff]  }
 0x1fb   :  { %v591_v56 = vpop.f32.mrb[4].mxu0  ;;  %v632_v57 = vpop.f32.mrb[4].mxu1 }
 0x1fc   :  { %v639_v58 = vadd.f32 %v2682_v6, %v591_v56  ;;  %v593_v59 = vpop.f32.mrb[5].mxu0  ;;  %v634_v60 = vpop.f32.mrb[5].mxu1  ;;  %v641_v42 = vadd.f32 %v2684_v40, %v632_v57 }
 0x1fd   :  { %v640_v61 = vadd.f32 %v2683_v55, %v593_v59  ;;  %v595_v62 = vpop.f32.mrb[6].mxu0  ;;  %v636_v26 = vpop.f32.mrb[6].mxu1  ;;  %v642_v39 = vadd.f32 %v2685_v38, %v634_v60  ;;  %v2722_v59 = vld [vmem:[%s4084_s2 + $0x8] sm:$0xff] }
 0x1fe   :  { %v2718_v63 = vmul.f32 -1.442695, %v639_v58  ;;  %v596_v30 = vpop.f32.mrb[7].mxu0  ;;  %v637_v34 = vpop.f32.mrb[7].mxu1 }
 0x1ff   :  { %v2719_v36 = vmul.f32 -1.442695, %v640_v61  ;;  %v2720_v41 = vmul.f32 -1.442695, %v642_v39 }
 0x200   :  { %3091 = vpow2.f32 %v2718_v63 }
 0x201   :  { %3093 = vpow2.f32 %v2719_v36  ;;  %v2764_v36 = vld [vmem:[%s4084_s2 + $0x10] sm:$0xff] }
 0x202   :  { %3095 = vpow2.f32 %v2720_v41 }
 0x203   :  { %3097 = vtanh.f32 %v641_v42 }
 0x20a   :  { %v3092_v43 = vpop.eup %3091 }
 0x20b   :  { %v3094_v45 = vpop.eup %3093  ;;  %v646_v46 = vadd.f32 1.0, %v3092_v43  ;;  %v3662_v43 = vld [vmem:[%s4079_s5 + $0x4] ss:$16 sps:$4 sm:$0xff]  }
 0x20c   :  { %v652_v47 = vadd.f32 1.0, %v3094_v45  ;;  %v3096_v48 = vpop.eup %3095  ;;  %v3667_v45 = vld [vmem:[%s4079_s5 + $0xc] ss:$16 sps:$4 sm:$0xff]  }
 0x20d   :  { %3099 = vrcp.f32 %v646_v46  ;;  %v3098_v50 = vpop.eup %3097  ;;  %v659_v53 = vadd.f32 1.0, %v3096_v48  ;;  %v3672_v46 = vld [vmem:[%s4079_s5] ss:$16 sps:$4 sm:$0xff]   ;;  %v3686_v48 = vld [vmem:[%s4079_s5 + $0x24] ss:$16 sps:$4 sm:$0xff]  }
 0x20e   :  { %3101 = vrcp.f32 %v652_v47  ;;  %v3677_v47 = vld [vmem:[%s4079_s5 + $0x8] ss:$16 sps:$4 sm:$0xff]  }
 0x20f   :  { %3103 = vrcp.f32 %v659_v53  ;;  %v3715_v53 = vld [vmem:[%s4079_s5 + $0x4c] ss:$16 sps:$4 sm:$0xff]  }
 0x217   :  { %v3100_v51 = vpop.eup %3099 }
 0x218   :  { %v3102_v52 = vpop.eup %3101  ;;  %v663_v32 = vmul.f32 %v3100_v51, %v3098_v50  ;;  %v3691_v50 = vld [vmem:[%s4079_s5 + $0x2c] ss:$16 sps:$4 sm:$0xff]   ;;  %v3696_v51 = vld [vmem:[%s4079_s5 + $0x20] ss:$16 sps:$4 sm:$0xff]  }
 0x219   :  { %v662_v54 = vmul.f32 %v3102_v52, %v3516_v44  ;;  %v3104_v56 = vpop.eup %3103  ;;  %v3701_v52 = vld [vmem:[%s4079_s5 + $0x28] ss:$16 sps:$4 sm:$0xff]  }
 0x21b   :  { %v664_v6 = vadd.f32 %v663_v32, %v662_v54  ;;  %v3710_v32 = vld [vmem:[%s4079_s5 + $0x44] ss:$16 sps:$4 sm:$0xff]   ;;  %v3720_v54 = vld [vmem:[%s4079_s5 + $0x40] ss:$16 sps:$4 sm:$0xff]  }
 0x21d   :  { %3105 = vtanh.f32 %v664_v6  ;;  %v3585_v55 = vsel %vm674_vm9, %v664_v6, %v3516_v44  ;;  %v3734_v6 = vld [vmem:[%s4079_s5 + $0x64] ss:$16 sps:$4 sm:$0xff]  }
 0x227   :  { %v3106_v57 = vpop.eup %3105 }
 0x228   :  { %v666_v58 = vmul.f32 %v3106_v57, %v3104_v56  ;;  %v3744_v56 = vld [vmem:[%s4079_s5 + $0x60] ss:$16 sps:$4 sm:$0xff]   ;;  %v3749_v57 = vld [vmem:[%s4079_s5 + $0x68] ss:$16 sps:$4 sm:$0xff]  }
 0x22a   :  { %v3591_v60 = vsel %vm674_vm9, %v666_v58, %v3522_v49  ;;  %v679_v61 = vsel %vm674_vm9, %v666_v58, 0.0  ;;  %v3758_v58 = vld [vmem:[%s4079_s5 + $0x84] ss:$16 sps:$4 sm:$0xff]  }
 0x22b   :  { %v680_v62 = vadd.f32 %v2722_v59, %v679_v61  ;;  %v688_v26 = vpack.c.bf16 %v3591_v60, %v3591_v60  ;;  %v3763_v59 = vld [vmem:[%s4079_s5 + $0x8c] ss:$16 sps:$4 sm:$0xff]   ;;  %v3773_v61 = vld [vmem:[%s4079_s5 + $0x88] ss:$16 sps:$4 sm:$0xff]  }
 0x22d   :  { %2723 = vst [vmem:[%s4085_s6 + $0x8] sm:$0xff] %v680_v62  ;;  %914 = vmatmul.mubr.bf16.vlgmr.msra.gmra.mrb[8].mxu0 %v688_v26  ;;  %955 = vmatmul.mubr.bf16.vlgmr.msra.gmra.mrb[8].mxu1 %v688_v26  ;;  %v3780_v62 = vld [vmem:[%s4079_s5 + $0xa4] ss:$16 sps:$4 sm:$0xff]   ;;  %v3785_v26 = vld [vmem:[%s4079_s5 + $0xac] ss:$16 sps:$4 sm:$0xff]  }
 0x22e   :  { %1206 = vmatpush1.bf16.msra.mxu0 %v3259_v2  ;;  %1247 = vmatpush1.bf16.msra.mxu1 %v3289_v7  ;;  %v2724_v2 = vld [vmem:[%s4082_s1 + $0x40] sm:$0xff] }
 0x22f   :  { %1207 = vmatprep.subr.bf16.mxu0 %v3267_v3  ;;  %1248 = vmatprep.subr.bf16.mxu1 %v3308_v10  ;;  %v2725_v3 = vld [vmem:[%s4082_s1 + $0x48] sm:$0xff] }
 0x230   :  { %1237 = vmatprep.mubr.bf16.mxu0 %v3203_v1  ;;  %1278 = vmatprep.mubr.bf16.mxu1 %v3203_v1 }
 0x232   :  { %1208 = vmatpush1.bf16.msra.mxu0 %v3273_v4  ;;  %1249 = vmatpush1.bf16.msra.mxu1 %v3313_v11 }
 0x233   :  { %1209 = vmatprep.subr.bf16.mxu0 %v3279_v5  ;;  %1250 = vmatprep.subr.bf16.mxu1 %v3330_v14 }
 0x236   :  { %1210 = vmatpush1.bf16.msra.mxu0 %v3295_v8  ;;  %1251 = vmatpush1.bf16.msra.mxu1 %v3337_v15 }
 0x237   :  { %1211 = vmatprep.subr.bf16.mxu0 %v3302_v9  ;;  %1252 = vmatprep.subr.bf16.mxu1 %v3343_v16 }
 0x23a   :  { %1212 = vmatpush1.bf16.msra.mxu0 %v3320_v12  ;;  %1253 = vmatpush1.bf16.msra.mxu1 %v3361_v19  ;;  %v2726_v19 = vld [vmem:[%s4082_s1 + $0x50] sm:$0xff] }
 0x23b   :  { %1213 = vmatprep.subr.bf16.mxu0 %v3325_v13  ;;  %1254 = vmatprep.subr.bf16.mxu1 %v3367_v20 }
 0x23e   :  { %1214 = vmatpush1.bf16.msra.mxu0 %v3349_v17  ;;  %1255 = vmatpush1.bf16.msra.mxu1 %v3385_v23  ;;  %v2727_v17 = vld [vmem:[%s4082_s1 + $0x58] sm:$0xff] }
 0x23f   :  { %1215 = vmatprep.subr.bf16.mxu0 %v3355_v18  ;;  %1256 = vmatprep.subr.bf16.mxu1 %v3396_v25 }
 0x242   :  { %1216 = vmatpush1.bf16.msra.mxu0 %v3372_v21  ;;  %1257 = vmatpush1.bf16.msra.mxu1 %v3411_v28 }
 0x243   :  { %1217 = vmatprep.subr.bf16.mxu0 %v3378_v22  ;;  %1258 = vmatprep.subr.bf16.mxu1 %v3418_v29 }
 0x246   :  { %1218 = vmatpush1.bf16.msra.mxu0 %v3390_v24  ;;  %1259 = vmatpush1.bf16.msra.mxu1 %v3438_v33 }
 0x247   :  { %1219 = vmatprep.subr.bf16.mxu0 %v3406_v27  ;;  %1260 = vmatprep.subr.bf16.mxu1 %v3445_v35 }
 0x24a   :  { %1220 = vmatpush1.bf16.msra.mxu0 %v3427_v31  ;;  %1261 = vmatpush1.bf16.msra.mxu1 %v3456_v37  ;;  %v997_v31 = vpop.permute.xlu1 %996 }
 0x24b   :  { %vm998_vm10 = vcmp.eq.s32.totalorder %v997_v31, 1  ;;  %1529 = vmatprep.subr.bf16.mxu0 %v3662_v43  ;;  %1570 = vmatprep.subr.bf16.mxu1 %v3667_v45  ;;  %v2768_v31 = vld [vmem:[%s4082_s1 + $0x70] sm:$0xff] }
 0x300   :  { %v915_v4 = vpop.f32.mrb[8].mxu0  ;;  %v956_v5 = vpop.f32.mrb[8].mxu1 }
 0x301   :  { %v963_v7 = vadd.f32 %v2724_v2, %v915_v4  ;;  %v917_v8 = vpop.f32.mrb[9].mxu0  ;;  %v958_v9 = vpop.f32.mrb[9].mxu1  ;;  %v965_v21 = vadd.f32 %v2726_v19, %v956_v5  ;;  %v3792_v2 = vld [vmem:[%s4079_s5 + $0xa0] ss:$16 sps:$4 sm:$0xff]   ;;  %v3804_v4 = vld [vmem:[%s4079_s5 + $0xc4] ss:$16 sps:$4 sm:$0xff]  }
 0x302   :  { %v964_v10 = vadd.f32 %v2725_v3, %v917_v8  ;;  %v919_v11 = vpop.f32.mrb[10].mxu0  ;;  %v960_v12 = vpop.f32.mrb[10].mxu1  ;;  %v966_v18 = vadd.f32 %v2727_v17, %v958_v9  ;;  %v3797_v3 = vld [vmem:[%s4079_s5 + $0xa8] ss:$16 sps:$4 sm:$0xff]   ;;  %v3809_v5 = vld [vmem:[%s4079_s5 + $0xcc] ss:$16 sps:$4 sm:$0xff]  }
 0x303   :  { %v2760_v13 = vmul.f32 -1.442695, %v963_v7  ;;  %v920_v14 = vpop.f32.mrb[11].mxu0  ;;  %v961_v15 = vpop.f32.mrb[11].mxu1  ;;  %v3816_v7 = vld [vmem:[%s4079_s5 + $0xc0] ss:$16 sps:$4 sm:$0xff]  }
 0x304   :  { %v2761_v16 = vmul.f32 -1.442695, %v964_v10  ;;  %v2762_v20 = vmul.f32 -1.442695, %v966_v18  ;;  %v3821_v8 = vld [vmem:[%s4079_s5 + $0xc8] ss:$16 sps:$4 sm:$0xff]  }
 0x305   :  { %3107 = vpow2.f32 %v2760_v13  ;;  %v3828_v9 = vld [vmem:[%s4079_s5 + $0xe4] ss:$16 sps:$4 sm:$0xff]   ;;  %v3833_v10 = vld [vmem:[%s4079_s5 + $0xec] ss:$16 sps:$4 sm:$0xff]   ;;  %v3840_v11 = vld [vmem:[%s4079_s5 + $0xe0] ss:$16 sps:$4 sm:$0xff]  }
 0x306   :  { %3109 = vpow2.f32 %v2761_v16  ;;  %v3845_v12 = vld [vmem:[%s4079_s5 + $0xe8] ss:$16 sps:$4 sm:$0xff]   ;;  %v2766_v13 = vld [vmem:[%s4082_s1 + $0x60] sm:$0xff] }
 0x307   :  { %3111 = vpow2.f32 %v2762_v20  ;;  %v2767_v14 = vld [vmem:[%s4082_s1 + $0x68] sm:$0xff] }
 0x308   :  { %3113 = vtanh.f32 %v965_v21 }
 0x30f   :  { %v3108_v22 = vpop.eup %3107 }
 0x310   :  { %v3110_v23 = vpop.eup %3109  ;;  %v970_v24 = vadd.f32 1.0, %v3108_v22 }
 0x311   :  { %v976_v25 = vadd.f32 1.0, %v3110_v23  ;;  %v3112_v27 = vpop.eup %3111 }
 0x312   :  { %3115 = vrcp.f32 %v970_v24  ;;  %v3114_v28 = vpop.eup %3113  ;;  %v983_v35 = vadd.f32 1.0, %v3112_v27 }
 0x313   :  { %3117 = vrcp.f32 %v976_v25 }
 0x314   :  { %3119 = vrcp.f32 %v983_v35 }
 0x31c   :  { %v3116_v29 = vpop.eup %3115 }
 0x31d   :  { %v3118_v33 = vpop.eup %3117  ;;  %v987_v37 = vmul.f32 %v3116_v29, %v3114_v28  ;;  %v2769_v28 = vld [vmem:[%s4082_s1 + $0x78] sm:$0xff] }
 0x31e   :  { %v986_v44 = vmul.f32 %v3118_v33, %v3585_v55  ;;  %v3120_v30 = vpop.eup %3119 }
 0x320   :  { %v988_v49 = vadd.f32 %v987_v37, %v986_v44 }
 0x322   :  { %3121 = vtanh.f32 %v988_v49  ;;  %v3644_v63 = vsel %vm998_vm10, %v988_v49, %v3585_v55  ;;  %v3739_v55 = vld [vmem:[%s4079_s5 + $0x6c] ss:$16 sps:$4 sm:$0xff]  }
 0x32c   :  { %v3122_v34 = vpop.eup %3121 }
 0x32d   :  { %v990_v38 = vmul.f32 %v3122_v34, %v3120_v30 }
 0x32f   :  { %v3650_v39 = vsel %vm998_vm10, %v990_v38, %v3591_v60  ;;  %v1003_v40 = vsel %vm998_vm10, %v990_v38, 0.0  ;;  %v3768_v60 = vld [vmem:[%s4079_s5 + $0x80] ss:$16 sps:$4 sm:$0xff]  }
 0x330   :  { %v1004_v41 = vadd.f32 %v2764_v36, %v1003_v40  ;;  %v1012_v42 = vpack.c.bf16 %v3650_v39, %v3650_v39 }
 0x332   :  { %2765 = vst [vmem:[%s4085_s6 + $0x10] sm:$0xff] %v1004_v41  ;;  %1238 = vmatmul.mubr.bf16.vlgmr.msra.gmra.mrb[12].mxu0 %v1012_v42  ;;  %1279 = vmatmul.mubr.bf16.vlgmr.msra.gmra.mrb[12].mxu1 %v1012_v42 }
 0x333   :  { %1561 = vmatprep.mubr.bf16.mxu0 %v3203_v1  ;;  %1602 = vmatprep.mubr.bf16.mxu1 %v3203_v1 }
 0x334   :  { %1530 = vmatpush1.bf16.msra.mxu0 %v3672_v46  ;;  %1571 = vmatpush1.bf16.msra.mxu1 %v3677_v47 }
 0x335   :  { %1531 = vmatprep.subr.bf16.mxu0 %v3686_v48  ;;  %1572 = vmatprep.subr.bf16.mxu1 %v3691_v50 }
 0x338   :  { %1532 = vmatpush1.bf16.msra.mxu0 %v3696_v51  ;;  %1573 = vmatpush1.bf16.msra.mxu1 %v3701_v52 }
 0x339   :  { %1533 = vmatprep.subr.bf16.mxu0 %v3710_v32  ;;  %1574 = vmatprep.subr.bf16.mxu1 %v3715_v53 }
 0x33c   :  { %1534 = vmatpush1.bf16.msra.mxu0 %v3720_v54  ;;  %1575 = vmatpush1.bf16.msra.mxu1 %v3725_v0 }
 0x33d   :  { %1535 = vmatprep.subr.bf16.mxu0 %v3734_v6  ;;  %1576 = vmatprep.subr.bf16.mxu1 %v3739_v55 }
 0x340   :  { %1536 = vmatpush1.bf16.msra.mxu0 %v3744_v56  ;;  %1577 = vmatpush1.bf16.msra.mxu1 %v3749_v57 }
 0x341   :  { %1537 = vmatprep.subr.bf16.mxu0 %v3758_v58  ;;  %1578 = vmatprep.subr.bf16.mxu1 %v3763_v59 }
 0x344   :  { %1538 = vmatpush1.bf16.msra.mxu0 %v3768_v60  ;;  %1579 = vmatpush1.bf16.msra.mxu1 %v3773_v61 }
 0x345   :  { %1539 = vmatprep.subr.bf16.mxu0 %v3780_v62  ;;  %1580 = vmatprep.subr.bf16.mxu1 %v3785_v26 }
 0x348   :  { %1540 = vmatpush1.bf16.msra.mxu0 %v3792_v2  ;;  %1581 = vmatpush1.bf16.msra.mxu1 %v3797_v3 }
 0x349   :  { %1541 = vmatprep.subr.bf16.mxu0 %v3804_v4  ;;  %1582 = vmatprep.subr.bf16.mxu1 %v3809_v5 }
 0x34c   :  { %1542 = vmatpush1.bf16.msra.mxu0 %v3816_v7  ;;  %1583 = vmatpush1.bf16.msra.mxu1 %v3821_v8 }
 0x34d   :  { %1543 = vmatprep.subr.bf16.mxu0 %v3828_v9  ;;  %1584 = vmatprep.subr.bf16.mxu1 %v3833_v10 }
 0x350   :  { %1544 = vmatpush1.bf16.msra.mxu0 %v3840_v11  ;;  %1585 = vmatpush1.bf16.msra.mxu1 %v3845_v12 }
 0x351   :  { %1853 = vmatprep.subr.bf16.mxu0 %v3662_v43  ;;  %1894 = vmatprep.subr.bf16.mxu1 %v3667_v45 }
 0x405   :  { %v1239_v15 = vpop.f32.mrb[12].mxu0  ;;  %v1280_v16 = vpop.f32.mrb[12].mxu1 }
 0x406   :  { %v1287_v17 = vadd.f32 %v2766_v13, %v1239_v15  ;;  %v1241_v18 = vpop.f32.mrb[13].mxu0  ;;  %v1282_v19 = vpop.f32.mrb[13].mxu1  ;;  %v1289_v35 = vadd.f32 %v2768_v31, %v1280_v16 }
 0x407   :  { %v1288_v20 = vadd.f32 %v2767_v14, %v1241_v18  ;;  %v1243_v21 = vpop.f32.mrb[14].mxu0  ;;  %v1284_v22 = vpop.f32.mrb[14].mxu1  ;;  %v1290_v29 = vadd.f32 %v2769_v28, %v1282_v19 }
 0x408   :  { %v2802_v23 = vmul.f32 -1.442695, %v1287_v17  ;;  %v1244_v24 = vpop.f32.mrb[15].mxu0  ;;  %v1285_v25 = vpop.f32.mrb[15].mxu1 }
 0x409   :  { %v2803_v27 = vmul.f32 -1.442695, %v1288_v20  ;;  %v2804_v33 = vmul.f32 -1.442695, %v1290_v29  ;;  %v1321_v14 = vpop.permute.xlu1 %1320  ;;  %v2806_v20 = vld [vmem:[%s4084_s2 + $0x18] sm:$0xff] }
 0x40a   :  { %3123 = vpow2.f32 %v2802_v23  ;;  %vm1322_vm11 = vcmp.eq.s32.totalorder %v1321_v14, 1 }
 0x40b   :  { %3125 = vpow2.f32 %v2803_v27 }
 0x40c   :  { %3127 = vpow2.f32 %v2804_v33 }
 0x40d   :  { %3129 = vtanh.f32 %v1289_v35 }
 0x414   :  { %v3124_v37 = vpop.eup %3123 }
 0x415   :  { %v3126_v44 = vpop.eup %3125  ;;  %v1294_v49 = vadd.f32 1.0, %v3124_v37 }
 0x416   :  { %v1300_v30 = vadd.f32 1.0, %v3126_v44  ;;  %v3128_v34 = vpop.eup %3127 }
 0x417   :  { %3131 = vrcp.f32 %v1294_v49  ;;  %v3130_v36 = vpop.eup %3129  ;;  %v1307_v42 = vadd.f32 1.0, %v3128_v34 }
 0x418   :  { %3133 = vrcp.f32 %v1300_v30 }
 0x419   :  { %3135 = vrcp.f32 %v1307_v42 }
 0x421   :  { %v3132_v38 = vpop.eup %3131 }
 0x422   :  { %v3134_v40 = vpop.eup %3133  ;;  %v1311_v41 = vmul.f32 %v3132_v38, %v3130_v36  ;;  %v2811_v36 = vld [vmem:[%s4082_s1 + $0x98] sm:$0xff] }
 0x423   :  { %v1310_v13 = vmul.f32 %v3134_v40, %v3644_v63  ;;  %v3136_v17 = vpop.eup %3135  ;;  %v2810_v40 = vld [vmem:[%s4082_s1 + $0x90] sm:$0xff] }
 0x425   :  { %v1312_v15 = vadd.f32 %v1311_v41, %v1310_v13 }
 0x427   :  { %3137 = vtanh.f32 %v1312_v15  ;;  %v3867_v16 = vsel %vm1322_vm11, %v1312_v15, %v3644_v63  ;;  %v2808_v63 = vld [vmem:[%s4082_s1 + $0x80] sm:$0xff] }
 0x431   :  { %v3138_v18 = vpop.eup %3137 }
 0x432   :  { %v1314_v19 = vmul.f32 %v3138_v18, %v3136_v17 }
 0x434   :  { %v3873_v21 = vsel %vm1322_vm11, %v1314_v19, %v3650_v39  ;;  %v1327_v22 = vsel %vm1322_vm11, %v1314_v19, 0.0  ;;  %v2809_v39 = vld [vmem:[%s4082_s1 + $0x88] sm:$0xff] }
 0x435   :  { %v1328_v23 = vadd.f32 %v2806_v20, %v1327_v22  ;;  %v1336_v24 = vpack.c.bf16 %v3873_v21, %v3873_v21 }
 0x437   :  { %2807 = vst [vmem:[%s4085_s6 + $0x18] sm:$0xff] %v1328_v23  ;;  %1562 = vmatmul.mubr.bf16.vlgmr.msra.gmra.mrb[16].mxu0 %v1336_v24  ;;  %1603 = vmatmul.mubr.bf16.vlgmr.msra.gmra.mrb[16].mxu1 %v1336_v24 }
 0x438   :  { %1854 = vmatpush1.bf16.msra.mxu0 %v3672_v46  ;;  %1895 = vmatpush1.bf16.msra.mxu1 %v3677_v47 }
 0x439   :  { %1855 = vmatprep.subr.bf16.mxu0 %v3686_v48  ;;  %1896 = vmatprep.subr.bf16.mxu1 %v3691_v50 }
 0x43a   :  { %1885 = vmatprep.mubr.bf16.mxu0 %v3203_v1  ;;  %1926 = vmatprep.mubr.bf16.mxu1 %v3203_v1 }
 0x43c   :  { %1856 = vmatpush1.bf16.msra.mxu0 %v3696_v51  ;;  %1897 = vmatpush1.bf16.msra.mxu1 %v3701_v52 }
 0x43d   :  { %1857 = vmatprep.subr.bf16.mxu0 %v3710_v32  ;;  %1898 = vmatprep.subr.bf16.mxu1 %v3715_v53 }
 0x440   :  { %1858 = vmatpush1.bf16.msra.mxu0 %v3720_v54  ;;  %1899 = vmatpush1.bf16.msra.mxu1 %v3725_v0 }
 0x441   :  { %1859 = vmatprep.subr.bf16.mxu0 %v3734_v6  ;;  %1900 = vmatprep.subr.bf16.mxu1 %v3739_v55 }
 0x444   :  { %1860 = vmatpush1.bf16.msra.mxu0 %v3744_v56  ;;  %1901 = vmatpush1.bf16.msra.mxu1 %v3749_v57 }
 0x445   :  { %1861 = vmatprep.subr.bf16.mxu0 %v3758_v58  ;;  %1902 = vmatprep.subr.bf16.mxu1 %v3763_v59 }
 0x448   :  { %1862 = vmatpush1.bf16.msra.mxu0 %v3768_v60  ;;  %1903 = vmatpush1.bf16.msra.mxu1 %v3773_v61 }
 0x449   :  { %1863 = vmatprep.subr.bf16.mxu0 %v3780_v62  ;;  %1904 = vmatprep.subr.bf16.mxu1 %v3785_v26 }
 0x44c   :  { %1864 = vmatpush1.bf16.msra.mxu0 %v3792_v2  ;;  %1905 = vmatpush1.bf16.msra.mxu1 %v3797_v3 }
 0x44d   :  { %1865 = vmatprep.subr.bf16.mxu0 %v3804_v4  ;;  %1906 = vmatprep.subr.bf16.mxu1 %v3809_v5 }
 0x450   :  { %1866 = vmatpush1.bf16.msra.mxu0 %v3816_v7  ;;  %1907 = vmatpush1.bf16.msra.mxu1 %v3821_v8 }
 0x451   :  { %1867 = vmatprep.subr.bf16.mxu0 %v3828_v9  ;;  %1908 = vmatprep.subr.bf16.mxu1 %v3833_v10 }
 0x454   :  { %1868 = vmatpush1.bf16.msra.mxu0 %v3840_v11  ;;  %1909 = vmatpush1.bf16.msra.mxu1 %v3845_v12 }
 0x455   :  { %2177 = vmatprep.subr.bf16.mxu0 %v3662_v43  ;;  %2218 = vmatprep.subr.bf16.mxu1 %v3667_v45 }
 0x50a   :  { %v1563_v25 = vpop.f32.mrb[16].mxu0  ;;  %v1604_v27 = vpop.f32.mrb[16].mxu1 }
 0x50b   :  { %v1611_v28 = vadd.f32 %v2808_v63, %v1563_v25  ;;  %v1565_v29 = vpop.f32.mrb[17].mxu0  ;;  %v1606_v31 = vpop.f32.mrb[17].mxu1  ;;  %v1613_v42 = vadd.f32 %v2810_v40, %v1604_v27 }
 0x50c   :  { %v1612_v33 = vadd.f32 %v2809_v39, %v1565_v29  ;;  %v1567_v35 = vpop.f32.mrb[18].mxu0  ;;  %v1608_v37 = vpop.f32.mrb[18].mxu1  ;;  %v1614_v38 = vadd.f32 %v2811_v36, %v1606_v31 }
 0x50d   :  { %v2844_v44 = vmul.f32 -1.442695, %v1611_v28  ;;  %v1568_v49 = vpop.f32.mrb[19].mxu0  ;;  %v1609_v30 = vpop.f32.mrb[19].mxu1 }
 0x50e   :  { %v2845_v34 = vmul.f32 -1.442695, %v1612_v33  ;;  %v2846_v41 = vmul.f32 -1.442695, %v1614_v38  ;;  %v1645_v39 = vpop.permute.xlu0 %1644  ;;  %v2848_v33 = vld [vmem:[%s4084_s2 + $0x20] sm:$0xff] }
 0x50f   :  { %3139 = vpow2.f32 %v2844_v44  ;;  %vm1646_vm12 = vcmp.eq.s32.totalorder %v1645_v39, 1 }
 0x510   :  { %3141 = vpow2.f32 %v2845_v34 }
 0x511   :  { %3143 = vpow2.f32 %v2846_v41 }
 0x512   :  { %3145 = vtanh.f32 %v1613_v42 }
 0x519   :  { %v3140_v13 = vpop.eup %3139 }
 0x51a   :  { %v3142_v14 = vpop.eup %3141  ;;  %v1618_v15 = vadd.f32 1.0, %v3140_v13 }
 0x51b   :  { %v1624_v17 = vadd.f32 1.0, %v3142_v14  ;;  %v3144_v18 = vpop.eup %3143 }
 0x51c   :  { %3147 = vrcp.f32 %v1618_v15  ;;  %v3146_v19 = vpop.eup %3145  ;;  %v1631_v24 = vadd.f32 1.0, %v3144_v18 }
 0x51d   :  { %3149 = vrcp.f32 %v1624_v17  ;;  %v2853_v17 = vld [vmem:[%s4082_s1 + $0xb8] sm:$0xff] }
 0x51e   :  { %3151 = vrcp.f32 %v1631_v24 }
 0x526   :  { %v3148_v20 = vpop.eup %3147 }
 0x527   :  { %v3150_v22 = vpop.eup %3149  ;;  %v1635_v23 = vmul.f32 %v3148_v20, %v3146_v19  ;;  %v2852_v19 = vld [vmem:[%s4082_s1 + $0xb0] sm:$0xff] }
 0x528   :  { %v1634_v63 = vmul.f32 %v3150_v22, %v3867_v16  ;;  %v3152_v28 = vpop.eup %3151 }
 0x52a   :  { %v1636_v25 = vadd.f32 %v1635_v23, %v1634_v63 }
 0x52c   :  { %3153 = vtanh.f32 %v1636_v25  ;;  %v3928_v27 = vsel %vm1646_vm12, %v1636_v25, %v3867_v16  ;;  %v2850_v16 = vld [vmem:[%s4082_s1 + $0xa0] sm:$0xff] }
 0x536   :  { %v3154_v29 = vpop.eup %3153 }
 0x537   :  { %v1638_v31 = vmul.f32 %v3154_v29, %v3152_v28 }
 0x539   :  { %v3934_v35 = vsel %vm1646_vm12, %v1638_v31, %v3873_v21  ;;  %v1651_v37 = vsel %vm1646_vm12, %v1638_v31, 0.0  ;;  %v2851_v21 = vld [vmem:[%s4082_s1 + $0xa8] sm:$0xff] }
 0x53a   :  { %v1652_v44 = vadd.f32 %v2848_v33, %v1651_v37  ;;  %v1660_v49 = vpack.c.bf16 %v3934_v35, %v3934_v35 }
 0x53c   :  { %2849 = vst [vmem:[%s4085_s6 + $0x20] sm:$0xff] %v1652_v44  ;;  %1886 = vmatmul.mubr.bf16.vlgmr.msra.gmra.mrb[20].mxu0 %v1660_v49  ;;  %1927 = vmatmul.mubr.bf16.vlgmr.msra.gmra.mrb[20].mxu1 %v1660_v49  ;;  %v1969_v49 = vpop.permute.xlu1 %1968 }
 0x53d   :  { %2178 = vmatpush1.bf16.msra.mxu0 %v3672_v46  ;;  %2219 = vmatpush1.bf16.msra.mxu1 %v3677_v47  ;;  %vm1970_vm13 = vcmp.eq.s32.totalorder %v1969_v49, 1 }
 0x53e   :  { %2179 = vmatprep.subr.bf16.mxu0 %v3686_v48  ;;  %2220 = vmatprep.subr.bf16.mxu1 %v3691_v50 }
 0x53f   :  { %2209 = vmatprep.mubr.bf16.mxu0 %v3203_v1  ;;  %2250 = vmatprep.mubr.bf16.mxu1 %v3203_v1 }
 0x541   :  { %2180 = vmatpush1.bf16.msra.mxu0 %v3696_v51  ;;  %2221 = vmatpush1.bf16.msra.mxu1 %v3701_v52 }
 0x542   :  { %2181 = vmatprep.subr.bf16.mxu0 %v3710_v32  ;;  %2222 = vmatprep.subr.bf16.mxu1 %v3715_v53 }
 0x545   :  { %2182 = vmatpush1.bf16.msra.mxu0 %v3720_v54  ;;  %2223 = vmatpush1.bf16.msra.mxu1 %v3725_v0 }
 0x546   :  { %2183 = vmatprep.subr.bf16.mxu0 %v3734_v6  ;;  %2224 = vmatprep.subr.bf16.mxu1 %v3739_v55 }
 0x549   :  { %2184 = vmatpush1.bf16.msra.mxu0 %v3744_v56  ;;  %2225 = vmatpush1.bf16.msra.mxu1 %v3749_v57 }
 0x54a   :  { %2185 = vmatprep.subr.bf16.mxu0 %v3758_v58  ;;  %2226 = vmatprep.subr.bf16.mxu1 %v3763_v59 }
 0x54d   :  { %2186 = vmatpush1.bf16.msra.mxu0 %v3768_v60  ;;  %2227 = vmatpush1.bf16.msra.mxu1 %v3773_v61 }
 0x54e   :  { %2187 = vmatprep.subr.bf16.mxu0 %v3780_v62  ;;  %2228 = vmatprep.subr.bf16.mxu1 %v3785_v26 }
 0x551   :  { %2188 = vmatpush1.bf16.msra.mxu0 %v3792_v2  ;;  %2229 = vmatpush1.bf16.msra.mxu1 %v3797_v3 }
 0x552   :  { %2189 = vmatprep.subr.bf16.mxu0 %v3804_v4  ;;  %2230 = vmatprep.subr.bf16.mxu1 %v3809_v5 }
 0x555   :  { %2190 = vmatpush1.bf16.msra.mxu0 %v3816_v7  ;;  %2231 = vmatpush1.bf16.msra.mxu1 %v3821_v8 }
 0x556   :  { %2191 = vmatprep.subr.bf16.mxu0 %v3828_v9  ;;  %2232 = vmatprep.subr.bf16.mxu1 %v3833_v10 }
 0x559   :  { %2192 = vmatpush1.bf16.msra.mxu0 %v3840_v11  ;;  %2233 = vmatpush1.bf16.msra.mxu1 %v3845_v12 }
 0x55a   :  { %2501 = vmatprep.subr.bf16.mxu0 %v3662_v43  ;;  %2542 = vmatprep.subr.bf16.mxu1 %v3667_v45 }
 0x60f   :  { %v1887_v30 = vpop.f32.mrb[20].mxu0  ;;  %v1928_v34 = vpop.f32.mrb[20].mxu1 }
 0x610   :  { %v1935_v36 = vadd.f32 %v2850_v16, %v1887_v30  ;;  %v1889_v38 = vpop.f32.mrb[21].mxu0  ;;  %v1930_v40 = vpop.f32.mrb[21].mxu1  ;;  %v1937_v22 = vadd.f32 %v2852_v19, %v1928_v34 }
 0x611   :  { %v1936_v41 = vadd.f32 %v2851_v21, %v1889_v38  ;;  %v1891_v42 = vpop.f32.mrb[22].mxu0  ;;  %v1932_v13 = vpop.f32.mrb[22].mxu1  ;;  %v1938_v18 = vadd.f32 %v2853_v17, %v1930_v40  ;;  %v2890_v38 = vld [vmem:[%s4084_s2 + $0x28] sm:$0xff] }
 0x612   :  { %v2886_v14 = vmul.f32 -1.442695, %v1935_v36  ;;  %v1892_v43 = vpop.f32.mrb[23].mxu0  ;;  %v1933_v15 = vpop.f32.mrb[23].mxu1 }
 0x613   :  { %v2887_v45 = vmul.f32 -1.442695, %v1936_v41  ;;  %v2888_v20 = vmul.f32 -1.442695, %v1938_v18 }
 0x614   :  { %3155 = vpow2.f32 %v2886_v14 }
 0x615   :  { %3157 = vpow2.f32 %v2887_v45  ;;  %v2932_v45 = vld [vmem:[%s4084_s2 + $0x30] sm:$0xff] }
 0x616   :  { %3159 = vpow2.f32 %v2888_v20 }
 0x617   :  { %3161 = vtanh.f32 %v1937_v22  ;;  %v2934_v22 = vld [vmem:[%s4082_s1 + $0xe0] sm:$0xff] }
 0x61e   :  { %v3156_v23 = vpop.eup %3155 }
 0x61f   :  { %v3158_v24 = vpop.eup %3157  ;;  %v1942_v63 = vadd.f32 1.0, %v3156_v23  ;;  %v2935_v23 = vld [vmem:[%s4082_s1 + $0xe8] sm:$0xff] }
 0x620   :  { %v1948_v39 = vadd.f32 1.0, %v3158_v24  ;;  %v3160_v25 = vpop.eup %3159 }
 0x621   :  { %3163 = vrcp.f32 %v1942_v63  ;;  %v3162_v28 = vpop.eup %3161  ;;  %v1955_v37 = vadd.f32 1.0, %v3160_v25 }
 0x622   :  { %3165 = vrcp.f32 %v1948_v39 }
 0x623   :  { %3167 = vrcp.f32 %v1955_v37 }
 0x62b   :  { %v3164_v29 = vpop.eup %3163 }
 0x62c   :  { %v3166_v31 = vpop.eup %3165  ;;  %v1959_v33 = vmul.f32 %v3164_v29, %v3162_v28 }
 0x62d   :  { %v1958_v44 = vmul.f32 %v3166_v31, %v3928_v27  ;;  %v3168_v30 = vpop.eup %3167 }
 0x62f   :  { %v1960_v16 = vadd.f32 %v1959_v33, %v1958_v44 }
 0x631   :  { %3169 = vtanh.f32 %v1960_v16  ;;  %v3989_v21 = vsel %vm1970_vm13, %v1960_v16, %v3928_v27 }
 0x63b   :  { %v3170_v34 = vpop.eup %3169 }
 0x63c   :  { %v1962_v36 = vmul.f32 %v3170_v34, %v3168_v30  ;;  %v2936_v34 = vld [vmem:[%s4082_s1 + $0xf0] sm:$0xff] }
 0x63e   :  { %v3995_v40 = vsel %vm1970_vm13, %v1962_v36, %v3934_v35  ;;  %v1975_v41 = vsel %vm1970_vm13, %v1962_v36, 0.0 }
 0x63f   :  { %v1976_v42 = vadd.f32 %v2890_v38, %v1975_v41  ;;  %v1984_v13 = vpack.c.bf16 %v3995_v40, %v3995_v40 }
 0x641   :  { %2891 = vst [vmem:[%s4085_s6 + $0x28] sm:$0xff] %v1976_v42  ;;  %2210 = vmatmul.mubr.bf16.vlgmr.msra.gmra.mrb[24].mxu0 %v1984_v13  ;;  %2251 = vmatmul.mubr.bf16.vlgmr.msra.gmra.mrb[24].mxu1 %v1984_v13 }
 0x642   :  { %2502 = vmatpush1.bf16.msra.mxu0 %v3672_v46  ;;  %2543 = vmatpush1.bf16.msra.mxu1 %v3677_v47  ;;  %v2893_v46 = vld [vmem:[%s4082_s1 + $0xc8] sm:$0xff] }
 0x643   :  { %2503 = vmatprep.subr.bf16.mxu0 %v3686_v48  ;;  %2544 = vmatprep.subr.bf16.mxu1 %v3691_v50 }
 0x644   :  { %2533 = vmatprep.mubr.bf16.mxu0 %v3203_v1  ;;  %2574 = vmatprep.mubr.bf16.mxu1 %v3203_v1  ;;  %v2892_v1 = vld [vmem:[%s4082_s1 + $0xc0] sm:$0xff] }
 0x646   :  { %2504 = vmatpush1.bf16.msra.mxu0 %v3696_v51  ;;  %2545 = vmatpush1.bf16.msra.mxu1 %v3701_v52 }
 0x647   :  { %2505 = vmatprep.subr.bf16.mxu0 %v3710_v32  ;;  %2546 = vmatprep.subr.bf16.mxu1 %v3715_v53 }
 0x64a   :  { %2506 = vmatpush1.bf16.msra.mxu0 %v3720_v54  ;;  %2547 = vmatpush1.bf16.msra.mxu1 %v3725_v0 }
 0x64b   :  { %2507 = vmatprep.subr.bf16.mxu0 %v3734_v6  ;;  %2548 = vmatprep.subr.bf16.mxu1 %v3739_v55 }
 0x64e   :  { %2508 = vmatpush1.bf16.msra.mxu0 %v3744_v56  ;;  %2549 = vmatpush1.bf16.msra.mxu1 %v3749_v57  ;;  %v2895_v57 = vld [vmem:[%s4082_s1 + $0xd8] sm:$0xff] }
 0x64f   :  { %2509 = vmatprep.subr.bf16.mxu0 %v3758_v58  ;;  %2550 = vmatprep.subr.bf16.mxu1 %v3763_v59  ;;  %v2894_v59 = vld [vmem:[%s4082_s1 + $0xd0] sm:$0xff] }
 0x652   :  { %2510 = vmatpush1.bf16.msra.mxu0 %v3768_v60  ;;  %2551 = vmatpush1.bf16.msra.mxu1 %v3773_v61 }
 0x653   :  { %2511 = vmatprep.subr.bf16.mxu0 %v3780_v62  ;;  %2552 = vmatprep.subr.bf16.mxu1 %v3785_v26 }
 0x656   :  { %2512 = vmatpush1.bf16.msra.mxu0 %v3792_v2  ;;  %2553 = vmatpush1.bf16.msra.mxu1 %v3797_v3 }
 0x657   :  { %2513 = vmatprep.subr.bf16.mxu0 %v3804_v4  ;;  %2554 = vmatprep.subr.bf16.mxu1 %v3809_v5 }
 0x65a   :  { %2514 = vmatpush1.bf16.msra.mxu0 %v3816_v7  ;;  %2555 = vmatpush1.bf16.msra.mxu1 %v3821_v8 }
 0x65b   :  { %2515 = vmatprep.subr.bf16.mxu0 %v3828_v9  ;;  %2556 = vmatprep.subr.bf16.mxu1 %v3833_v10 }
 0x65e   :  { %2516 = vmatpush1.bf16.msra.mxu0 %v3840_v11  ;;  %2557 = vmatpush1.bf16.msra.mxu1 %v3845_v12  ;;  %v2293_v11 = vpop.permute.xlu0 %2292 }
 0x65f   :  { %vm2294_vm14 = vcmp.eq.s32.totalorder %v2293_v11, 1 }
 0x714   :  { %v2211_v47 = vpop.f32.mrb[24].mxu0  ;;  %v2252_v48 = vpop.f32.mrb[24].mxu1 }
 0x715   :  { %v2259_v50 = vadd.f32 %v2892_v1, %v2211_v47  ;;  %v2213_v51 = vpop.f32.mrb[25].mxu0  ;;  %v2254_v52 = vpop.f32.mrb[25].mxu1  ;;  %v2261_v61 = vadd.f32 %v2894_v59, %v2252_v48 }
 0x716   :  { %v2260_v32 = vadd.f32 %v2893_v46, %v2213_v51  ;;  %v2215_v53 = vpop.f32.mrb[26].mxu0  ;;  %v2256_v54 = vpop.f32.mrb[26].mxu1  ;;  %v2262_v58 = vadd.f32 %v2895_v57, %v2254_v52 }
 0x717   :  { %v2928_v0 = vmul.f32 -1.442695, %v2259_v50  ;;  %v2216_v6 = vpop.f32.mrb[27].mxu0  ;;  %v2257_v55 = vpop.f32.mrb[27].mxu1 }
 0x718   :  { %v2929_v56 = vmul.f32 -1.442695, %v2260_v32  ;;  %v2930_v60 = vmul.f32 -1.442695, %v2262_v58  ;;  %v2617_v52 = vpop.permute.xlu1 %2616 }
 0x719   :  { %3171 = vpow2.f32 %v2928_v0  ;;  %vm2618_vm15 = vcmp.eq.s32.totalorder %v2617_v52, 1 }
 0x71a   :  { %3173 = vpow2.f32 %v2929_v56  ;;  %v2974_v56 = vld [vmem:[%s4084_s2 + $0x38] sm:$0xff] }
 0x71b   :  { %3175 = vpow2.f32 %v2930_v60 }
 0x71c   :  { %3177 = vtanh.f32 %v2261_v61 }
 0x723   :  { %v3172_v62 = vpop.eup %3171 }
 0x724   :  { %v3174_v26 = vpop.eup %3173  ;;  %v2266_v2 = vadd.f32 1.0, %v3172_v62 }
 0x725   :  { %v2272_v3 = vadd.f32 1.0, %v3174_v26  ;;  %v3176_v4 = vpop.eup %3175 }
 0x726   :  { %3179 = vrcp.f32 %v2266_v2  ;;  %v3178_v5 = vpop.eup %3177  ;;  %v2279_v10 = vadd.f32 1.0, %v3176_v4 }
 0x727   :  { %3181 = vrcp.f32 %v2272_v3 }
 0x728   :  { %3183 = vrcp.f32 %v2279_v10 }
 0x730   :  { %v3180_v7 = vpop.eup %3179 }
 0x731   :  { %v3182_v8 = vpop.eup %3181  ;;  %v2283_v9 = vmul.f32 %v3180_v7, %v3178_v5 }
 0x732   :  { %v2282_v12 = vmul.f32 %v3182_v8, %v3989_v21  ;;  %v3184_v14 = vpop.eup %3183 }
 0x734   :  { %v2284_v27 = vadd.f32 %v2283_v9, %v2282_v12 }
 0x736   :  { %3185 = vtanh.f32 %v2284_v27  ;;  %v2296_v35 = vsel %vm2294_vm14, %v2284_v27, %v3989_v21  ;;  %v2937_v21 = vld [vmem:[%s4082_s1 + $0xf8] sm:$0xff] }
 0x740   :  { %v3186_v43 = vpop.eup %3185 }
 0x741   :  { %v2286_v15 = vmul.f32 %v3186_v43, %v3184_v14 }
 0x743   :  { %v2295_v17 = vsel %vm2294_vm14, %v2286_v15, %v3995_v40  ;;  %v2299_v18 = vsel %vm2294_vm14, %v2286_v15, 0.0 }
 0x744   :  { %v2300_v19 = vadd.f32 %v2932_v45, %v2299_v18  ;;  %v2308_v20 = vpack.c.bf16 %v2295_v17, %v2295_v17 }
 0x746   :  { %2933 = vst [vmem:[%s4085_s6 + $0x30] sm:$0xff] %v2300_v19  ;;  %2534 = vmatmul.mubr.bf16.vlgmr.msra.gmra.mrb[28].mxu0 %v2308_v20  ;;  %2575 = vmatmul.mubr.bf16.vlgmr.msra.gmra.mrb[28].mxu1 %v2308_v20 }
 0x819   :  { %v2535_v24 = vpop.f32.mrb[28].mxu0  ;;  %v2576_v63 = vpop.f32.mrb[28].mxu1 }
 0x81a   :  { %v2583_v39 = vadd.f32 %v2934_v22, %v2535_v24  ;;  %v2537_v25 = vpop.f32.mrb[29].mxu0  ;;  %v2578_v28 = vpop.f32.mrb[29].mxu1  ;;  %v2585_v38 = vadd.f32 %v2936_v34, %v2576_v63 }
 0x81b   :  { %v2584_v29 = vadd.f32 %v2935_v23, %v2537_v25  ;;  %v2539_v31 = vpop.f32.mrb[30].mxu0  ;;  %v2580_v33 = vpop.f32.mrb[30].mxu1  ;;  %v2586_v30 = vadd.f32 %v2937_v21, %v2578_v28 }
 0x81c   :  { %v2970_v37 = vmul.f32 -1.442695, %v2583_v39  ;;  %v2540_v44 = vpop.f32.mrb[31].mxu0  ;;  %v2581_v49 = vpop.f32.mrb[31].mxu1 }
 0x81d   :  { %v2971_v16 = vmul.f32 -1.442695, %v2584_v29  ;;  %v2972_v36 = vmul.f32 -1.442695, %v2586_v30 }
 0x81e   :  { %3187 = vpow2.f32 %v2970_v37 }
 0x81f   :  { %3189 = vpow2.f32 %v2971_v16 }
 0x820   :  { %3191 = vpow2.f32 %v2972_v36 }
 0x821   :  { %3193 = vtanh.f32 %v2585_v38 }
 0x828   :  { %v3188_v40 = vpop.eup %3187 }
 0x829   :  { %v3190_v41 = vpop.eup %3189  ;;  %v2590_v42 = vadd.f32 1.0, %v3188_v40 }
 0x82a   :  { %v2596_v13 = vadd.f32 1.0, %v3190_v41  ;;  %v3192_v1 = vpop.eup %3191 }
 0x82b   :  { %3195 = vrcp.f32 %v2590_v42  ;;  %v3194_v46 = vpop.eup %3193  ;;  %v2603_v51 = vadd.f32 1.0, %v3192_v1 }
 0x82c   :  { %3197 = vrcp.f32 %v2596_v13 }
 0x82d   :  { %3199 = vrcp.f32 %v2603_v51 }
 0x835   :  { %v3196_v47 = vpop.eup %3195 }
 0x836   :  { %v3198_v48 = vpop.eup %3197  ;;  %v2607_v50 = vmul.f32 %v3196_v47, %v3194_v46 }
 0x837   :  { %v2606_v32 = vmul.f32 %v3198_v48, %v2296_v35  ;;  %v3200_v0 = vpop.eup %3199 }
 0x839   :  { %v2608_v53 = vadd.f32 %v2607_v50, %v2606_v32 }
 0x83b   :  { %3201 = vtanh.f32 %v2608_v53  ;;  %v2620_v54 = vsel %vm2618_vm15, %v2608_v53, %v2296_v35 }
 0x83c   :  { %2633 = vst [vmem:[%s4086_s8] sm:$0xff] %v2620_v54 }
 0x845   :  { %v3202_v6 = vpop.eup %3201 }
 0x846   :  { %v2610_v55 = vmul.f32 %v3202_v6, %v3200_v0 }
 0x848   :  { %v2619_v57 = vsel %vm2618_vm15, %v2610_v55, %v2295_v17  ;;  %v2623_v58 = vsel %vm2618_vm15, %v2610_v55, 0.0 }
 0x849   :  { %v2624_v59 = vadd.f32 %v2974_v56, %v2623_v58  ;;  %2632 = vst [vmem:[%s4087_s7] sm:$0xff] %v2619_v57 }
 0x84b   :  { %2975 = vst [vmem:[%s4085_s6 + $0x38] sm:$0xff] %v2624_v59 }

// kernel: residual_gru_forward.9
= control target key start
LH: loop header
LB: loop body
LE: loop exit
PB: predicated region body
PF: predicated region fallthrough
CT: control target
= control target key end

     0   :  { %v3236_v2 = vmov 0   ;;  %s4103_s0 = inlined_call_operand.vmem [shape: s32[8,1], index: 0, kind: input, shape index: {}]   ;;  %s4104_s1 = inlined_call_operand.vmem [shape: f32[8,8,512], index: 1, kind: input, shape index: {}]   ;;  %s4105_s2 = inlined_call_operand.vmem [shape: f32[8,8,128], index: 2, kind: input, shape index: {}]   ;;  %s4106_s3 = inlined_call_operand.vmem [shape: f32[8,128], index: 3, kind: input, shape index: {}]   ;;  %s4107_s4 = inlined_call_operand.vmem [shape: f32[8,128], index: 4, kind: input, shape index: {}]   ;;  %s4108_s5 = inlined_call_operand.vmem [shape: bf16[128,512], index: 5, kind: input, shape index: {}]   ;;  %s4109_s6 = inlined_call_operand.hbm [shape: f32[8,8,128], index: 6, kind: output, shape index: {0}]   ;;  %s4110_s7 = inlined_call_operand.vmem [shape: f32[8,128], index: 7, kind: output, shape index: {1}]   ;;  %s4111_s8 = inlined_call_operand.vmem [shape: f32[8,128], index: 8, kind: output, shape index: {2}]  }
   0x1   :  { %v3288_v0 = vld [vmem:[%s4108_s5 + $0x4] ss:$16 sps:$4 sm:$0xff]   ;;  %v3293_v1 = vld [vmem:[%s4108_s5] ss:$16 sps:$4 sm:$0xff]   ;;  %269 = vmatprep.mubr.bf16.mxu0 %v3236_v2  ;;  %310 = vmatprep.mubr.bf16.mxu1 %v3236_v2  ;;  %v3320_v6 = vld [vmem:[%s4108_s5 + $0xc] ss:$16 sps:$4 sm:$0xff]  }
   0x2   :  { %237 = vmatprep.subr.bf16.mxu0 %v3288_v0  ;;  %v3301_v3 = vld [vmem:[%s4108_s5 + $0x24] ss:$16 sps:$4 sm:$0xff]   ;;  %2986 = vset.pattern.permute.xlu0 %v3236_v2  ;;  %v3308_v4 = vld [vmem:[%s4108_s5 + $0x20] ss:$16 sps:$4 sm:$0xff]   ;;  %v3325_v7 = vld [vmem:[%s4108_s5 + $0x8] ss:$16 sps:$4 sm:$0xff]  }
   0x3   :  { %238 = vmatpush1.bf16.msra.mxu0 %v3293_v1  ;;  %2987 = vset.pattern.permute.xlu1 %v3236_v2  ;;  %v3315_v5 = vld [vmem:[%s4108_s5 + $0x44] ss:$16 sps:$4 sm:$0xff]   ;;  %v3331_v8 = vld [vmem:[%s4108_s5 + $0x40] ss:$16 sps:$4 sm:$0xff]   ;;  %v3344_v10 = vld [vmem:[%s4108_s5 + $0x2c] ss:$16 sps:$4 sm:$0xff]  }
   0x4   :  { %239 = vmatprep.subr.bf16.mxu0 %v3301_v3  ;;  %278 = vmatprep.subr.bf16.mxu1 %v3320_v6  ;;  %v3338_v9 = vld [vmem:[%s4108_s5 + $0x64] ss:$16 sps:$4 sm:$0xff]   ;;  %v3349_v11 = vld [vmem:[%s4108_s5 + $0x28] ss:$16 sps:$4 sm:$0xff]   ;;  %v3356_v12 = vld [vmem:[%s4108_s5 + $0x60] ss:$16 sps:$4 sm:$0xff]  }
   0x5   :  { %279 = vmatpush1.bf16.msra.mxu1 %v3325_v7  ;;  %v3361_v13 = vld [vmem:[%s4108_s5 + $0x84] ss:$16 sps:$4 sm:$0xff]   ;;  %v3366_v14 = vld [vmem:[%s4108_s5 + $0x4c] ss:$16 sps:$4 sm:$0xff]   ;;  %v3373_v15 = vld [vmem:[%s4108_s5 + $0x48] ss:$16 sps:$4 sm:$0xff]  }
   0x6   :  { %280 = vmatprep.subr.bf16.mxu1 %v3344_v10  ;;  %v3379_v16 = vld [vmem:[%s4108_s5 + $0x6c] ss:$16 sps:$4 sm:$0xff]   ;;  %v3385_v17 = vld [vmem:[%s4108_s5 + $0x80] ss:$16 sps:$4 sm:$0xff]   ;;  %v3391_v18 = vld [vmem:[%s4108_s5 + $0xa4] ss:$16 sps:$4 sm:$0xff]  }
   0x7   :  { %240 = vmatpush1.bf16.msra.mxu0 %v3308_v4  ;;  %v3397_v19 = vld [vmem:[%s4108_s5 + $0x68] ss:$16 sps:$4 sm:$0xff]   ;;  %v3403_v20 = vld [vmem:[%s4108_s5 + $0x8c] ss:$16 sps:$4 sm:$0xff]   ;;  %v3408_v21 = vld [vmem:[%s4108_s5 + $0xa0] ss:$16 sps:$4 sm:$0xff]  }
   0x8   :  { %241 = vmatprep.subr.bf16.mxu0 %v3315_v5  ;;  %v3414_v22 = vld [vmem:[%s4108_s5 + $0xc4] ss:$16 sps:$4 sm:$0xff]   ;;  %v3421_v23 = vld [vmem:[%s4108_s5 + $0x88] ss:$16 sps:$4 sm:$0xff]   ;;  %v3426_v24 = vld [vmem:[%s4108_s5 + $0xc0] ss:$16 sps:$4 sm:$0xff]  }
   0x9   :  { %281 = vmatpush1.bf16.msra.mxu1 %v3349_v11  ;;  %v3432_v25 = vld [vmem:[%s4108_s5 + $0xac] ss:$16 sps:$4 sm:$0xff]   ;;  %v3437_v26 = vld [vmem:[%s4103_s0] sm:$0xff]  ;;  %v3447_v28 = vld [vmem:[%s4108_s5 + $0xa8] ss:$16 sps:$4 sm:$0xff]  }
   0xa   :  { %282 = vmatprep.subr.bf16.mxu1 %v3366_v14  ;;  %v3442_v27 = vld [vmem:[%s4108_s5 + $0xe4] ss:$16 sps:$4 sm:$0xff]   ;;  %vm2694_vm0 = vcmp.gt.s32.totalorder %v3437_v26, 0  ;;  %v3454_v29 = vld [vmem:[%s4108_s5 + $0xcc] ss:$16 sps:$4 sm:$0xff]   ;;  %vm2734_vm1 = vcmp.gt.s32.totalorder %v3437_v26, 1 }
   0xb   :  { %242 = vmatpush1.bf16.msra.mxu0 %v3331_v8  ;;  %v349_v30 = vsel %vm2694_vm0, 1, %v3236_v2  ;;  %v3463_v31 = vld [vmem:[%s4108_s5 + $0xe0] ss:$16 sps:$4 sm:$0xff]   ;;  %v3474_v33 = vld [vmem:[%s4108_s5 + $0xc8] ss:$16 sps:$4 sm:$0xff]   ;;  %v671_v34 = vsel %vm2734_vm1, 1, %v3236_v2 }
   0xc   :  { %243 = vmatprep.subr.bf16.mxu0 %v3338_v9  ;;  %v3468_v32 = vld [vmem:[%s4106_s3] sm:$0xff]  ;;  %351 = vperm.xlu0 %2986, %v349_v30   ;;  %v3481_v35 = vld [vmem:[%s4108_s5 + $0xec] ss:$16 sps:$4 sm:$0xff]   ;;  %vm2857_vm2 = vcmp.gt.s32.totalorder %v3437_v26, 4  ;;  %v3492_v37 = vld [vmem:[%s4108_s5 + $0xe8] ss:$16 sps:$4 sm:$0xff]  }
   0xd   :  { %283 = vmatpush1.bf16.msra.mxu1 %v3373_v15  ;;  %v44_v36 = vpack.c.bf16 %v3468_v32, %v3468_v32  ;;  %v1643_v38 = vsel %vm2857_vm2, 1, %v3236_v2  ;;  %vm2939_vm3 = vcmp.gt.s32.totalorder %v3437_v26, 6 }
   0xe   :  { %284 = vmatprep.subr.bf16.mxu1 %v3379_v16 }
   0xf   :  { %244 = vmatpush1.bf16.msra.mxu0 %v3356_v12 }
  0x10   :  { %245 = vmatprep.subr.bf16.mxu0 %v3361_v13  ;;  %673 = vperm.xlu0 %2986, %v671_v34  }
  0x11   :  { %285 = vmatpush1.bf16.msra.mxu1 %v3397_v19 }
  0x12   :  { %286 = vmatprep.subr.bf16.mxu1 %v3403_v20 }
  0x13   :  { %246 = vmatpush1.bf16.msra.mxu0 %v3385_v17 }
  0x14   :  { %247 = vmatprep.subr.bf16.mxu0 %v3391_v18  ;;  %1645 = vperm.xlu0 %2986, %v1643_v38  }
  0x15   :  { %287 = vmatpush1.bf16.msra.mxu1 %v3421_v23 }
  0x16   :  { %288 = vmatprep.subr.bf16.mxu1 %v3432_v25 }
  0x17   :  { %248 = vmatpush1.bf16.msra.mxu0 %v3408_v21 }
  0x18   :  { %249 = vmatprep.subr.bf16.mxu0 %v3414_v22 }
  0x19   :  { %289 = vmatpush1.bf16.msra.mxu1 %v3447_v28 }
  0x1a   :  { %290 = vmatprep.subr.bf16.mxu1 %v3454_v29 }
  0x1b   :  { %250 = vmatpush1.bf16.msra.mxu0 %v3426_v24 }
  0x1c   :  { %251 = vmatprep.subr.bf16.mxu0 %v3442_v27 }
  0x1d   :  { %291 = vmatpush1.bf16.msra.mxu1 %v3474_v33 }
  0x1e   :  { %292 = vmatprep.subr.bf16.mxu1 %v3481_v35 }
  0x1f   :  { %252 = vmatpush1.bf16.msra.mxu0 %v3463_v31 }
  0x20   :  { %558 = vmatprep.subr.bf16.mxu0 %v3288_v0 }
  0x21   :  { %14 = vsyncpa [#allocation5], 0  ;;  %v2291_v39 = vsel %vm2939_vm3, 1, %v3236_v2  ;;  %293 = vmatpush1.bf16.msra.mxu1 %v3492_v37  ;;  %v40_v40 = vld [vmem:[%s4104_s1] sm:$0xff]  ;;  %v41_v41 = vld [vmem:[%s4104_s1 + $0x8] sm:$0xff]  ;;  %vm2775_vm5 = vcmp.gt.s32.totalorder %v3437_v26, 2 }
  0x22   :  { %270 = vmatmul.mubr.bf16.vlgmr.msra.gmra.mrb[0].mxu0 %v44_v36  ;;  %2293 = vperm.xlu0 %2986, %v2291_v39   ;;  %v43_v50 = vld [vmem:[%s4104_s1 + $0x18] sm:$0xff]  ;;  %v42_v56 = vld [vmem:[%s4104_s1 + $0x10] sm:$0xff]  ;;  %v34_v34 = vld [vmem:[%s4107_s4] sm:$0xff]  ;;  %vm2816_vm6 = vcmp.gt.s32.totalorder %v3437_v26, 3  ;;  %vm2898_vm7 = vcmp.gt.s32.totalorder %v3437_v26, 5  ;;  %vm2980_vm8 = vcmp.gt.s32.totalorder %v3437_v26, 7 }
  0x23   :  { %559 = vmatpush1.bf16.msra.mxu0 %v3293_v1  ;;  %590 = vmatprep.mubr.bf16.mxu0 %v3236_v2  ;;  %s3237_s23 = smov [#allocation4]  }
  0x24   :  { %560 = vmatprep.subr.bf16.mxu0 %v3301_v3  ;;  %599 = vmatprep.subr.bf16.mxu1 %v3320_v6  ;;  %s2640_s24 = sshll.u32 %s3237_s23, 4  ;;  %s2641_s24 = int_to_ptr.vmem [resolvable:$true] %s2640_s24 }
  0x25   :  { %311 = vmatmul.mubr.bf16.vlgmr.msra.gmra.mrb[0].mxu1 %v44_v36  ;;  %s3212_s26 = scalar_lea.vmem %s2641_s24, 1024  ;;  %p3217_p1 = scmp.lt.s32.totalorder %s2641_s24, %s2641_s24 }
  0x26   :  { %600 = vmatpush1.bf16.msra.mxu1 %v3325_v7  ;;  %631 = vmatprep.mubr.bf16.mxu1 %v3236_v2  ;;  %p3213_p0 = scmp.ne.s32.totalorder %s2641_s24, %s3212_s26  ;;  %p3218_p2 = scmp.lt.s32.totalorder %s3212_s26, %s3212_s26 }
  0x27   :  { %561 = vmatpush1.bf16.msra.mxu0 %v3308_v4  ;;  %601 = vmatprep.subr.bf16.mxu1 %v3344_v10 }
  0x28   :  { %562 = vmatprep.subr.bf16.mxu0 %v3315_v5  ;;  %p3219_p3 = por %p3218_p2, %p3217_p1 }
  0x2a   :  { %602 = vmatpush1.bf16.msra.mxu1 %v3349_v11  ;;  %p3220_p4 = pnand %p3219_p3, %p3213_p0 }
  0x2b   :  { %563 = vmatpush1.bf16.msra.mxu0 %v3331_v8  ;;  %603 = vmatprep.subr.bf16.mxu1 %v3366_v14 }
  0x2c   :  { %564 = vmatprep.subr.bf16.mxu0 %v3338_v9 }
  0x2e   :  { %604 = vmatpush1.bf16.msra.mxu1 %v3373_v15 }
  0x2f   :  { %565 = vmatpush1.bf16.msra.mxu0 %v3356_v12  ;;  %605 = vmatprep.subr.bf16.mxu1 %v3379_v16 }
  0x30   :  { %566 = vmatprep.subr.bf16.mxu0 %v3361_v13 }
  0x32   :  { %606 = vmatpush1.bf16.msra.mxu1 %v3397_v19 }
  0x33   :  { %567 = vmatpush1.bf16.msra.mxu0 %v3385_v17  ;;  %607 = vmatprep.subr.bf16.mxu1 %v3403_v20 }
  0x34   :  { %568 = vmatprep.subr.bf16.mxu0 %v3391_v18 }
  0x36   :  { %608 = vmatpush1.bf16.msra.mxu1 %v3421_v23 }
  0x37   :  { %569 = vmatpush1.bf16.msra.mxu0 %v3408_v21  ;;  %609 = vmatprep.subr.bf16.mxu1 %v3432_v25 }
  0x38   :  { %570 = vmatprep.subr.bf16.mxu0 %v3414_v22 }
  0x3a   :  { %610 = vmatpush1.bf16.msra.mxu1 %v3447_v28 }
  0x3b   :  { %571 = vmatpush1.bf16.msra.mxu0 %v3426_v24  ;;  %611 = vmatprep.subr.bf16.mxu1 %v3454_v29 }
  0x3c   :  { %572 = vmatprep.subr.bf16.mxu0 %v3442_v27 }
  0x3e   :  { %612 = vmatpush1.bf16.msra.mxu1 %v3474_v33 }
  0x3f   :  { %573 = vmatpush1.bf16.msra.mxu0 %v3463_v31  ;;  %613 = vmatprep.subr.bf16.mxu1 %v3481_v35 }
  0x40   :  { %882 = vmatprep.subr.bf16.mxu0 %v3288_v0 }
  0x42   :  { %614 = vmatpush1.bf16.msra.mxu1 %v3492_v37 }
  0x43   :  { %923 = vmatprep.subr.bf16.mxu1 %v3320_v6 }
  0x8b   :  { %v352_v39 = vpop.permute.xlu0 %351 }
  0x8c   :  { %vm353_vm4 = vcmp.eq.s32.totalorder %v352_v39, 1 }
  0xf5   :  { %v271_v42 = vpop.f32.mrb[0].mxu0 }
  0xf6   :  { %v319_v43 = vadd.f32 %v271_v42, %v40_v40  ;;  %v273_v44 = vpop.f32.mrb[1].mxu0 }
  0xf7   :  { %v320_v45 = vadd.f32 %v273_v44, %v41_v41  ;;  %v275_v46 = vpop.f32.mrb[2].mxu0 }
  0xf8   :  { %v2691_v47 = vmul.f32 -1.442695, %v319_v43  ;;  %v276_v48 = vpop.f32.mrb[3].mxu0  ;;  %v312_v51 = vpop.f32.mrb[0].mxu1 }
  0xf9   :  { %v2692_v49 = vmul.f32 -1.442695, %v320_v45  ;;  %v314_v52 = vpop.f32.mrb[1].mxu1  ;;  %v321_v58 = vadd.f32 %v312_v51, %v42_v56 }
  0xfa   :  { %3084 = vpow2.f32 %v2691_v47  ;;  %v322_v53 = vadd.f32 %v314_v52, %v43_v50  ;;  %v316_v54 = vpop.f32.mrb[2].mxu1  ;;  %v356_v47 = vld [vmem:[%s4105_s2] sm:$0xff] }
  0xfb   :  { %3086 = vpow2.f32 %v2692_v49  ;;  %v317_v55 = vpop.f32.mrb[3].mxu1  ;;  %v1967_v54 = vsel %vm2898_vm7, 1, %v3236_v2 }
  0xfc   :  { %v2693_v57 = vmul.f32 -1.442695, %v322_v53  ;;  %v1319_v53 = vsel %vm2816_vm6, 1, %v3236_v2  ;;  %v2696_v55 = vld [vmem:[%s4104_s1 + $0x28] sm:$0xff] }
  0xfe   :  { %3088 = vpow2.f32 %v2693_v57 }
  0xff   :  { %3090 = vtanh.f32 %v321_v58 }
 0x104   :  { %v3085_v59 = vpop.eup %3084 }
 0x105   :  { %v3087_v60 = vpop.eup %3086  ;;  %v326_v61 = vadd.f32 1.0, %v3085_v59 }
 0x106   :  { %v332_v62 = vadd.f32 1.0, %v3087_v60 }
 0x107   :  { %3092 = vrcp.f32 %v326_v61 }
 0x108   :  { %3094 = vrcp.f32 %v332_v62  ;;  %v3089_v63 = vpop.eup %3088 }
 0x109   :  { %v3091_v30 = vpop.eup %3090  ;;  %v339_v38 = vadd.f32 1.0, %v3089_v63 }
 0x10b   :  { %3096 = vrcp.f32 %v339_v38  ;;  %v2698_v38 = vld [vmem:[%s4104_s1 + $0x38] sm:$0xff] }
 0x111   :  { %v3093_v36 = vpop.eup %3092 }
 0x112   :  { %v3095_v40 = vpop.eup %3094  ;;  %v343_v41 = vmul.f32 %v3093_v36, %v3091_v30 }
 0x113   :  { %v342_v42 = vmul.f32 %v3095_v40, %v34_v34  ;;  %v2697_v40 = vld [vmem:[%s4104_s1 + $0x30] sm:$0xff] }
 0x115   :  { %v344_v43 = vadd.f32 %v343_v41, %v342_v42  ;;  %v3097_v45 = vpop.eup %3096 }
 0x117   :  { %3098 = vtanh.f32 %v344_v43  ;;  %v3552_v44 = vsel %vm353_vm4, %v344_v43, %v34_v34 }
 0x121   :  { %v3099_v46 = vpop.eup %3098 }
 0x122   :  { %v346_v48 = vmul.f32 %v3099_v46, %v3097_v45 }
 0x124   :  { %v3558_v49 = vsel %vm353_vm4, %v346_v48, %v3468_v32  ;;  %v357_v50 = vsel %vm353_vm4, %v346_v48, 0.0  ;;  %v995_v32 = vsel %vm2775_vm5, 1, %v3236_v2 }
 0x125   :  { %v358_v51 = vadd.f32 %v357_v50, %v356_v47  ;;  %v365_v52 = vpack.c.bf16 %v3558_v49, %v3558_v49  ;;  %997 = vperm.xlu1 %2987, %v995_v32  }
 0x127   :  { %359 = vst [vmem:[#allocation4] sm:$0xff] %v358_v51  ;;  %591 = vmatmul.mubr.bf16.vlgmr.msra.gmra.mrb[4].mxu0 %v365_v52  ;;  %632 = vmatmul.mubr.bf16.vlgmr.msra.gmra.mrb[4].mxu1 %v365_v52 }
 0x128   :  { %883 = vmatpush1.bf16.msra.mxu0 %v3293_v1  ;;  %924 = vmatpush1.bf16.msra.mxu1 %v3325_v7 }
 0x129   :  { %884 = vmatprep.subr.bf16.mxu0 %v3301_v3  ;;  %925 = vmatprep.subr.bf16.mxu1 %v3344_v10 }
 0x12a   :  { %914 = vmatprep.mubr.bf16.mxu0 %v3236_v2  ;;  %955 = vmatprep.mubr.bf16.mxu1 %v3236_v2 }
 0x12b   :  { %1321 = vperm.xlu1 %2987, %v1319_v53  }
 0x12c   :  { %885 = vmatpush1.bf16.msra.mxu0 %v3308_v4  ;;  %926 = vmatpush1.bf16.msra.mxu1 %v3349_v11 }
 0x12d   :  { %886 = vmatprep.subr.bf16.mxu0 %v3315_v5  ;;  %927 = vmatprep.subr.bf16.mxu1 %v3366_v14 }
 0x12f   :  { %1969 = vperm.xlu1 %2987, %v1967_v54  }
 0x130   :  { %887 = vmatpush1.bf16.msra.mxu0 %v3331_v8  ;;  %928 = vmatpush1.bf16.msra.mxu1 %v3373_v15 }
 0x131   :  { %888 = vmatprep.subr.bf16.mxu0 %v3338_v9  ;;  %929 = vmatprep.subr.bf16.mxu1 %v3379_v16 }
 0x134   :  { %889 = vmatpush1.bf16.msra.mxu0 %v3356_v12  ;;  %930 = vmatpush1.bf16.msra.mxu1 %v3397_v19 }
 0x135   :  { %890 = vmatprep.subr.bf16.mxu0 %v3361_v13  ;;  %931 = vmatprep.subr.bf16.mxu1 %v3403_v20 }
 0x138   :  { %891 = vmatpush1.bf16.msra.mxu0 %v3385_v17  ;;  %932 = vmatpush1.bf16.msra.mxu1 %v3421_v23 }
 0x139   :  { %892 = vmatprep.subr.bf16.mxu0 %v3391_v18  ;;  %933 = vmatprep.subr.bf16.mxu1 %v3432_v25 }
 0x13c   :  { %893 = vmatpush1.bf16.msra.mxu0 %v3408_v21  ;;  %934 = vmatpush1.bf16.msra.mxu1 %v3447_v28 }
 0x13d   :  { %894 = vmatprep.subr.bf16.mxu0 %v3414_v22  ;;  %935 = vmatprep.subr.bf16.mxu1 %v3454_v29 }
 0x140   :  { %895 = vmatpush1.bf16.msra.mxu0 %v3426_v24  ;;  %936 = vmatpush1.bf16.msra.mxu1 %v3474_v33 }
 0x141   :  { %896 = vmatprep.subr.bf16.mxu0 %v3442_v27  ;;  %937 = vmatprep.subr.bf16.mxu1 %v3481_v35 }
 0x144   :  { %897 = vmatpush1.bf16.msra.mxu0 %v3463_v31  ;;  %938 = vmatpush1.bf16.msra.mxu1 %v3492_v37 }
 0x145   :  { %1206 = vmatprep.subr.bf16.mxu0 %v3288_v0  ;;  %1247 = vmatprep.subr.bf16.mxu1 %v3320_v6  ;;  %v2615_v0 = vsel %vm2980_vm8, 1, %v3236_v2  ;;  %v2695_v6 = vld [vmem:[%s4104_s1 + $0x20] sm:$0xff] }
 0x146   :  { %2617 = vperm.xlu1 %2987, %v2615_v0   ;;  %v674_v0 = vpop.permute.xlu0 %673 }
 0x147   :  { %vm675_vm9 = vcmp.eq.s32.totalorder %v674_v0, 1  ;;  %v3752_v0 = vld [vmem:[%s4108_s5 + $0x48] ss:$16 sps:$4 sm:$0xff]  }
 0x1fa   :  { %v592_v56 = vpop.f32.mrb[4].mxu0  ;;  %v633_v57 = vpop.f32.mrb[4].mxu1 }
 0x1fb   :  { %v640_v58 = vadd.f32 %v2695_v6, %v592_v56  ;;  %v594_v59 = vpop.f32.mrb[5].mxu0  ;;  %v635_v60 = vpop.f32.mrb[5].mxu1  ;;  %v642_v42 = vadd.f32 %v2697_v40, %v633_v57 }
 0x1fc   :  { %v641_v61 = vadd.f32 %v2696_v55, %v594_v59  ;;  %v596_v62 = vpop.f32.mrb[6].mxu0  ;;  %v637_v26 = vpop.f32.mrb[6].mxu1  ;;  %v643_v39 = vadd.f32 %v2698_v38, %v635_v60  ;;  %v2735_v59 = vld [vmem:[%s4105_s2 + $0x8] sm:$0xff] }
 0x1fd   :  { %v2731_v63 = vmul.f32 -1.442695, %v640_v58  ;;  %v597_v30 = vpop.f32.mrb[7].mxu0  ;;  %v638_v34 = vpop.f32.mrb[7].mxu1 }
 0x1fe   :  { %v2732_v36 = vmul.f32 -1.442695, %v641_v61  ;;  %v2733_v41 = vmul.f32 -1.442695, %v643_v39 }
 0x1ff   :  { %3100 = vpow2.f32 %v2731_v63 }
 0x200   :  { %3102 = vpow2.f32 %v2732_v36  ;;  %v2776_v36 = vld [vmem:[%s4105_s2 + $0x10] sm:$0xff] }
 0x201   :  { %3104 = vpow2.f32 %v2733_v41 }
 0x202   :  { %3106 = vtanh.f32 %v642_v42 }
 0x209   :  { %v3101_v43 = vpop.eup %3100 }
 0x20a   :  { %v3103_v45 = vpop.eup %3102  ;;  %v647_v46 = vadd.f32 1.0, %v3101_v43  ;;  %v3689_v43 = vld [vmem:[%s4108_s5 + $0x4] ss:$16 sps:$4 sm:$0xff]  }
 0x20b   :  { %v653_v47 = vadd.f32 1.0, %v3103_v45  ;;  %v3105_v48 = vpop.eup %3104  ;;  %v3694_v45 = vld [vmem:[%s4108_s5 + $0xc] ss:$16 sps:$4 sm:$0xff]  }
 0x20c   :  { %3108 = vrcp.f32 %v647_v46  ;;  %v3107_v50 = vpop.eup %3106  ;;  %v660_v53 = vadd.f32 1.0, %v3105_v48  ;;  %v3699_v46 = vld [vmem:[%s4108_s5] ss:$16 sps:$4 sm:$0xff]   ;;  %v3713_v48 = vld [vmem:[%s4108_s5 + $0x24] ss:$16 sps:$4 sm:$0xff]  }
 0x20d   :  { %3110 = vrcp.f32 %v653_v47  ;;  %v3704_v47 = vld [vmem:[%s4108_s5 + $0x8] ss:$16 sps:$4 sm:$0xff]  }
 0x20e   :  { %3112 = vrcp.f32 %v660_v53  ;;  %v3742_v53 = vld [vmem:[%s4108_s5 + $0x4c] ss:$16 sps:$4 sm:$0xff]  }
 0x216   :  { %v3109_v51 = vpop.eup %3108 }
 0x217   :  { %v3111_v52 = vpop.eup %3110  ;;  %v664_v32 = vmul.f32 %v3109_v51, %v3107_v50  ;;  %v3718_v50 = vld [vmem:[%s4108_s5 + $0x2c] ss:$16 sps:$4 sm:$0xff]   ;;  %v3723_v51 = vld [vmem:[%s4108_s5 + $0x20] ss:$16 sps:$4 sm:$0xff]  }
 0x218   :  { %v663_v54 = vmul.f32 %v3111_v52, %v3552_v44  ;;  %v3113_v56 = vpop.eup %3112  ;;  %v3728_v52 = vld [vmem:[%s4108_s5 + $0x28] ss:$16 sps:$4 sm:$0xff]  }
 0x21a   :  { %v665_v6 = vadd.f32 %v664_v32, %v663_v54  ;;  %v3737_v32 = vld [vmem:[%s4108_s5 + $0x44] ss:$16 sps:$4 sm:$0xff]   ;;  %v3747_v54 = vld [vmem:[%s4108_s5 + $0x40] ss:$16 sps:$4 sm:$0xff]  }
 0x21c   :  { %3114 = vtanh.f32 %v665_v6  ;;  %v3618_v55 = vsel %vm675_vm9, %v665_v6, %v3552_v44  ;;  %v3761_v6 = vld [vmem:[%s4108_s5 + $0x64] ss:$16 sps:$4 sm:$0xff]  }
 0x226   :  { %v3115_v57 = vpop.eup %3114 }
 0x227   :  { %v667_v58 = vmul.f32 %v3115_v57, %v3113_v56  ;;  %v3771_v56 = vld [vmem:[%s4108_s5 + $0x60] ss:$16 sps:$4 sm:$0xff]   ;;  %v3776_v57 = vld [vmem:[%s4108_s5 + $0x68] ss:$16 sps:$4 sm:$0xff]  }
 0x229   :  { %v3624_v60 = vsel %vm675_vm9, %v667_v58, %v3558_v49  ;;  %v680_v61 = vsel %vm675_vm9, %v667_v58, 0.0  ;;  %v3785_v58 = vld [vmem:[%s4108_s5 + $0x84] ss:$16 sps:$4 sm:$0xff]  }
 0x22a   :  { %v681_v62 = vadd.f32 %v2735_v59, %v680_v61  ;;  %v689_v26 = vpack.c.bf16 %v3624_v60, %v3624_v60  ;;  %v3790_v59 = vld [vmem:[%s4108_s5 + $0x8c] ss:$16 sps:$4 sm:$0xff]   ;;  %v3800_v61 = vld [vmem:[%s4108_s5 + $0x88] ss:$16 sps:$4 sm:$0xff]  }
 0x22c   :  { %683 = vst [vmem:[#allocation4 + $0x8] sm:$0xff] %v681_v62  ;;  %915 = vmatmul.mubr.bf16.vlgmr.msra.gmra.mrb[8].mxu0 %v689_v26  ;;  %956 = vmatmul.mubr.bf16.vlgmr.msra.gmra.mrb[8].mxu1 %v689_v26  ;;  %v3807_v62 = vld [vmem:[%s4108_s5 + $0xa4] ss:$16 sps:$4 sm:$0xff]   ;;  %v3812_v26 = vld [vmem:[%s4108_s5 + $0xac] ss:$16 sps:$4 sm:$0xff]  }
 0x22d   :  { %1207 = vmatpush1.bf16.msra.mxu0 %v3293_v1  ;;  %1248 = vmatpush1.bf16.msra.mxu1 %v3325_v7  ;;  %v2736_v1 = vld [vmem:[%s4104_s1 + $0x40] sm:$0xff] }
 0x22e   :  { %1208 = vmatprep.subr.bf16.mxu0 %v3301_v3  ;;  %1249 = vmatprep.subr.bf16.mxu1 %v3344_v10  ;;  %v2737_v3 = vld [vmem:[%s4104_s1 + $0x48] sm:$0xff] }
 0x22f   :  { %1238 = vmatprep.mubr.bf16.mxu0 %v3236_v2  ;;  %1279 = vmatprep.mubr.bf16.mxu1 %v3236_v2 }
 0x231   :  { %1209 = vmatpush1.bf16.msra.mxu0 %v3308_v4  ;;  %1250 = vmatpush1.bf16.msra.mxu1 %v3349_v11 }
 0x232   :  { %1210 = vmatprep.subr.bf16.mxu0 %v3315_v5  ;;  %1251 = vmatprep.subr.bf16.mxu1 %v3366_v14 }
 0x235   :  { %1211 = vmatpush1.bf16.msra.mxu0 %v3331_v8  ;;  %1252 = vmatpush1.bf16.msra.mxu1 %v3373_v15 }
 0x236   :  { %1212 = vmatprep.subr.bf16.mxu0 %v3338_v9  ;;  %1253 = vmatprep.subr.bf16.mxu1 %v3379_v16 }
 0x239   :  { %1213 = vmatpush1.bf16.msra.mxu0 %v3356_v12  ;;  %1254 = vmatpush1.bf16.msra.mxu1 %v3397_v19  ;;  %v2738_v19 = vld [vmem:[%s4104_s1 + $0x50] sm:$0xff] }
 0x23a   :  { %1214 = vmatprep.subr.bf16.mxu0 %v3361_v13  ;;  %1255 = vmatprep.subr.bf16.mxu1 %v3403_v20 }
 0x23d   :  { %1215 = vmatpush1.bf16.msra.mxu0 %v3385_v17  ;;  %1256 = vmatpush1.bf16.msra.mxu1 %v3421_v23  ;;  %v2739_v17 = vld [vmem:[%s4104_s1 + $0x58] sm:$0xff] }
 0x23e   :  { %1216 = vmatprep.subr.bf16.mxu0 %v3391_v18  ;;  %1257 = vmatprep.subr.bf16.mxu1 %v3432_v25 }
 0x241   :  { %1217 = vmatpush1.bf16.msra.mxu0 %v3408_v21  ;;  %1258 = vmatpush1.bf16.msra.mxu1 %v3447_v28 }
 0x242   :  { %1218 = vmatprep.subr.bf16.mxu0 %v3414_v22  ;;  %1259 = vmatprep.subr.bf16.mxu1 %v3454_v29 }
 0x245   :  { %1219 = vmatpush1.bf16.msra.mxu0 %v3426_v24  ;;  %1260 = vmatpush1.bf16.msra.mxu1 %v3474_v33 }
 0x246   :  { %1220 = vmatprep.subr.bf16.mxu0 %v3442_v27  ;;  %1261 = vmatprep.subr.bf16.mxu1 %v3481_v35 }
 0x249   :  { %1221 = vmatpush1.bf16.msra.mxu0 %v3463_v31  ;;  %1262 = vmatpush1.bf16.msra.mxu1 %v3492_v37  ;;  %v998_v31 = vpop.permute.xlu1 %997 }
 0x24a   :  { %vm999_vm10 = vcmp.eq.s32.totalorder %v998_v31, 1  ;;  %1530 = vmatprep.subr.bf16.mxu0 %v3689_v43  ;;  %1571 = vmatprep.subr.bf16.mxu1 %v3694_v45  ;;  %v2779_v31 = vld [vmem:[%s4104_s1 + $0x70] sm:$0xff] }
 0x2ff   :  { %v916_v4 = vpop.f32.mrb[8].mxu0  ;;  %v957_v5 = vpop.f32.mrb[8].mxu1 }
 0x300   :  { %v964_v7 = vadd.f32 %v2736_v1, %v916_v4  ;;  %v918_v8 = vpop.f32.mrb[9].mxu0  ;;  %v959_v9 = vpop.f32.mrb[9].mxu1  ;;  %v966_v21 = vadd.f32 %v2738_v19, %v957_v5  ;;  %v3819_v1 = vld [vmem:[%s4108_s5 + $0xa0] ss:$16 sps:$4 sm:$0xff]   ;;  %v3831_v4 = vld [vmem:[%s4108_s5 + $0xc4] ss:$16 sps:$4 sm:$0xff]  }
 0x301   :  { %v965_v10 = vadd.f32 %v2737_v3, %v918_v8  ;;  %v920_v11 = vpop.f32.mrb[10].mxu0  ;;  %v961_v12 = vpop.f32.mrb[10].mxu1  ;;  %v967_v18 = vadd.f32 %v2739_v17, %v959_v9  ;;  %v3824_v3 = vld [vmem:[%s4108_s5 + $0xa8] ss:$16 sps:$4 sm:$0xff]   ;;  %v3836_v5 = vld [vmem:[%s4108_s5 + $0xcc] ss:$16 sps:$4 sm:$0xff]  }
 0x302   :  { %v2772_v13 = vmul.f32 -1.442695, %v964_v7  ;;  %v921_v14 = vpop.f32.mrb[11].mxu0  ;;  %v962_v15 = vpop.f32.mrb[11].mxu1  ;;  %v3843_v7 = vld [vmem:[%s4108_s5 + $0xc0] ss:$16 sps:$4 sm:$0xff]  }
 0x303   :  { %v2773_v16 = vmul.f32 -1.442695, %v965_v10  ;;  %v2774_v20 = vmul.f32 -1.442695, %v967_v18  ;;  %v3848_v8 = vld [vmem:[%s4108_s5 + $0xc8] ss:$16 sps:$4 sm:$0xff]  }
 0x304   :  { %3116 = vpow2.f32 %v2772_v13  ;;  %v3855_v9 = vld [vmem:[%s4108_s5 + $0xe4] ss:$16 sps:$4 sm:$0xff]   ;;  %v3860_v10 = vld [vmem:[%s4108_s5 + $0xec] ss:$16 sps:$4 sm:$0xff]   ;;  %v3867_v11 = vld [vmem:[%s4108_s5 + $0xe0] ss:$16 sps:$4 sm:$0xff]  }
 0x305   :  { %3118 = vpow2.f32 %v2773_v16  ;;  %v3872_v12 = vld [vmem:[%s4108_s5 + $0xe8] ss:$16 sps:$4 sm:$0xff]   ;;  %v2777_v13 = vld [vmem:[%s4104_s1 + $0x60] sm:$0xff] }
 0x306   :  { %3120 = vpow2.f32 %v2774_v20  ;;  %v2778_v14 = vld [vmem:[%s4104_s1 + $0x68] sm:$0xff] }
 0x307   :  { %3122 = vtanh.f32 %v966_v21 }
 0x30e   :  { %v3117_v22 = vpop.eup %3116 }
 0x30f   :  { %v3119_v23 = vpop.eup %3118  ;;  %v971_v24 = vadd.f32 1.0, %v3117_v22 }
 0x310   :  { %v977_v25 = vadd.f32 1.0, %v3119_v23  ;;  %v3121_v27 = vpop.eup %3120 }
 0x311   :  { %3124 = vrcp.f32 %v971_v24  ;;  %v3123_v28 = vpop.eup %3122  ;;  %v984_v35 = vadd.f32 1.0, %v3121_v27 }
 0x312   :  { %3126 = vrcp.f32 %v977_v25 }
 0x313   :  { %3128 = vrcp.f32 %v984_v35 }
 0x31b   :  { %v3125_v29 = vpop.eup %3124 }
 0x31c   :  { %v3127_v33 = vpop.eup %3126  ;;  %v988_v37 = vmul.f32 %v3125_v29, %v3123_v28  ;;  %v2780_v28 = vld [vmem:[%s4104_s1 + $0x78] sm:$0xff] }
 0x31d   :  { %v987_v44 = vmul.f32 %v3127_v33, %v3618_v55  ;;  %v3129_v30 = vpop.eup %3128 }
 0x31f   :  { %v989_v49 = vadd.f32 %v988_v37, %v987_v44 }
 0x321   :  { %3130 = vtanh.f32 %v989_v49  ;;  %v3674_v63 = vsel %vm999_vm10, %v989_v49, %v3618_v55  ;;  %v3766_v55 = vld [vmem:[%s4108_s5 + $0x6c] ss:$16 sps:$4 sm:$0xff]  }
 0x32b   :  { %v3131_v34 = vpop.eup %3130 }
 0x32c   :  { %v991_v38 = vmul.f32 %v3131_v34, %v3129_v30 }
 0x32e   :  { %v3680_v39 = vsel %vm999_vm10, %v991_v38, %v3624_v60  ;;  %v1004_v40 = vsel %vm999_vm10, %v991_v38, 0.0  ;;  %v3795_v60 = vld [vmem:[%s4108_s5 + $0x80] ss:$16 sps:$4 sm:$0xff]  }
 0x32f   :  { %v1005_v41 = vadd.f32 %v2776_v36, %v1004_v40  ;;  %v1013_v42 = vpack.c.bf16 %v3680_v39, %v3680_v39 }
 0x331   :  { %1007 = vst [vmem:[#allocation4 + $0x10] sm:$0xff] %v1005_v41  ;;  %1239 = vmatmul.mubr.bf16.vlgmr.msra.gmra.mrb[12].mxu0 %v1013_v42  ;;  %1280 = vmatmul.mubr.bf16.vlgmr.msra.gmra.mrb[12].mxu1 %v1013_v42 }
 0x332   :  { %1562 = vmatprep.mubr.bf16.mxu0 %v3236_v2  ;;  %1603 = vmatprep.mubr.bf16.mxu1 %v3236_v2 }
 0x333   :  { %1531 = vmatpush1.bf16.msra.mxu0 %v3699_v46  ;;  %1572 = vmatpush1.bf16.msra.mxu1 %v3704_v47 }
 0x334   :  { %1532 = vmatprep.subr.bf16.mxu0 %v3713_v48  ;;  %1573 = vmatprep.subr.bf16.mxu1 %v3718_v50 }
 0x337   :  { %1533 = vmatpush1.bf16.msra.mxu0 %v3723_v51  ;;  %1574 = vmatpush1.bf16.msra.mxu1 %v3728_v52 }
 0x338   :  { %1534 = vmatprep.subr.bf16.mxu0 %v3737_v32  ;;  %1575 = vmatprep.subr.bf16.mxu1 %v3742_v53 }
 0x33b   :  { %1535 = vmatpush1.bf16.msra.mxu0 %v3747_v54  ;;  %1576 = vmatpush1.bf16.msra.mxu1 %v3752_v0 }
 0x33c   :  { %1536 = vmatprep.subr.bf16.mxu0 %v3761_v6  ;;  %1577 = vmatprep.subr.bf16.mxu1 %v3766_v55 }
 0x33f   :  { %1537 = vmatpush1.bf16.msra.mxu0 %v3771_v56  ;;  %1578 = vmatpush1.bf16.msra.mxu1 %v3776_v57 }
 0x340   :  { %1538 = vmatprep.subr.bf16.mxu0 %v3785_v58  ;;  %1579 = vmatprep.subr.bf16.mxu1 %v3790_v59 }
 0x343   :  { %1539 = vmatpush1.bf16.msra.mxu0 %v3795_v60  ;;  %1580 = vmatpush1.bf16.msra.mxu1 %v3800_v61 }
 0x344   :  { %1540 = vmatprep.subr.bf16.mxu0 %v3807_v62  ;;  %1581 = vmatprep.subr.bf16.mxu1 %v3812_v26 }
 0x347   :  { %1541 = vmatpush1.bf16.msra.mxu0 %v3819_v1  ;;  %1582 = vmatpush1.bf16.msra.mxu1 %v3824_v3 }
 0x348   :  { %1542 = vmatprep.subr.bf16.mxu0 %v3831_v4  ;;  %1583 = vmatprep.subr.bf16.mxu1 %v3836_v5 }
 0x34b   :  { %1543 = vmatpush1.bf16.msra.mxu0 %v3843_v7  ;;  %1584 = vmatpush1.bf16.msra.mxu1 %v3848_v8 }
 0x34c   :  { %1544 = vmatprep.subr.bf16.mxu0 %v3855_v9  ;;  %1585 = vmatprep.subr.bf16.mxu1 %v3860_v10 }
 0x34f   :  { %1545 = vmatpush1.bf16.msra.mxu0 %v3867_v11  ;;  %1586 = vmatpush1.bf16.msra.mxu1 %v3872_v12 }
 0x350   :  { %1854 = vmatprep.subr.bf16.mxu0 %v3689_v43  ;;  %1895 = vmatprep.subr.bf16.mxu1 %v3694_v45 }
 0x404   :  { %v1240_v15 = vpop.f32.mrb[12].mxu0  ;;  %v1281_v16 = vpop.f32.mrb[12].mxu1 }
 0x405   :  { %v1288_v17 = vadd.f32 %v2777_v13, %v1240_v15  ;;  %v1242_v18 = vpop.f32.mrb[13].mxu0  ;;  %v1283_v19 = vpop.f32.mrb[13].mxu1  ;;  %v1290_v35 = vadd.f32 %v2779_v31, %v1281_v16 }
 0x406   :  { %v1289_v20 = vadd.f32 %v2778_v14, %v1242_v18  ;;  %v1244_v21 = vpop.f32.mrb[14].mxu0  ;;  %v1285_v22 = vpop.f32.mrb[14].mxu1  ;;  %v1291_v29 = vadd.f32 %v2780_v28, %v1283_v19 }
 0x407   :  { %v2813_v23 = vmul.f32 -1.442695, %v1288_v17  ;;  %v1245_v24 = vpop.f32.mrb[15].mxu0  ;;  %v1286_v25 = vpop.f32.mrb[15].mxu1 }
 0x408   :  { %v2814_v27 = vmul.f32 -1.442695, %v1289_v20  ;;  %v2815_v33 = vmul.f32 -1.442695, %v1291_v29  ;;  %v1322_v14 = vpop.permute.xlu1 %1321  ;;  %v2817_v20 = vld [vmem:[%s4105_s2 + $0x18] sm:$0xff] }
 0x409   :  { %3132 = vpow2.f32 %v2813_v23  ;;  %vm1323_vm11 = vcmp.eq.s32.totalorder %v1322_v14, 1 }
 0x40a   :  { %3134 = vpow2.f32 %v2814_v27 }
 0x40b   :  { %3136 = vpow2.f32 %v2815_v33 }
 0x40c   :  { %3138 = vtanh.f32 %v1290_v35 }
 0x413   :  { %v3133_v37 = vpop.eup %3132 }
 0x414   :  { %v3135_v44 = vpop.eup %3134  ;;  %v1295_v49 = vadd.f32 1.0, %v3133_v37 }
 0x415   :  { %v1301_v30 = vadd.f32 1.0, %v3135_v44  ;;  %v3137_v34 = vpop.eup %3136 }
 0x416   :  { %3140 = vrcp.f32 %v1295_v49  ;;  %v3139_v36 = vpop.eup %3138  ;;  %v1308_v42 = vadd.f32 1.0, %v3137_v34 }
 0x417   :  { %3142 = vrcp.f32 %v1301_v30 }
 0x418   :  { %3144 = vrcp.f32 %v1308_v42 }
 0x420   :  { %v3141_v38 = vpop.eup %3140 }
 0x421   :  { %v3143_v40 = vpop.eup %3142  ;;  %v1312_v41 = vmul.f32 %v3141_v38, %v3139_v36  ;;  %v2821_v36 = vld [vmem:[%s4104_s1 + $0x98] sm:$0xff] }
 0x422   :  { %v1311_v13 = vmul.f32 %v3143_v40, %v3674_v63  ;;  %v3145_v17 = vpop.eup %3144  ;;  %v2820_v40 = vld [vmem:[%s4104_s1 + $0x90] sm:$0xff] }
 0x424   :  { %v1313_v15 = vadd.f32 %v1312_v41, %v1311_v13 }
 0x426   :  { %3146 = vtanh.f32 %v1313_v15  ;;  %v3894_v16 = vsel %vm1323_vm11, %v1313_v15, %v3674_v63  ;;  %v2818_v63 = vld [vmem:[%s4104_s1 + $0x80] sm:$0xff] }
 0x430   :  { %v3147_v18 = vpop.eup %3146 }
 0x431   :  { %v1315_v19 = vmul.f32 %v3147_v18, %v3145_v17 }
 0x433   :  { %v3900_v21 = vsel %vm1323_vm11, %v1315_v19, %v3680_v39  ;;  %v1328_v22 = vsel %vm1323_vm11, %v1315_v19, 0.0  ;;  %v2819_v39 = vld [vmem:[%s4104_s1 + $0x88] sm:$0xff] }
 0x434   :  { %v1329_v23 = vadd.f32 %v2817_v20, %v1328_v22  ;;  %v1337_v24 = vpack.c.bf16 %v3900_v21, %v3900_v21 }
 0x436   :  { %1331 = vst [vmem:[#allocation4 + $0x18] sm:$0xff] %v1329_v23  ;;  %1563 = vmatmul.mubr.bf16.vlgmr.msra.gmra.mrb[16].mxu0 %v1337_v24  ;;  %1604 = vmatmul.mubr.bf16.vlgmr.msra.gmra.mrb[16].mxu1 %v1337_v24 }
 0x437   :  { %1855 = vmatpush1.bf16.msra.mxu0 %v3699_v46  ;;  %1896 = vmatpush1.bf16.msra.mxu1 %v3704_v47 }
 0x438   :  { %1856 = vmatprep.subr.bf16.mxu0 %v3713_v48  ;;  %1897 = vmatprep.subr.bf16.mxu1 %v3718_v50 }
 0x439   :  { %1886 = vmatprep.mubr.bf16.mxu0 %v3236_v2  ;;  %1927 = vmatprep.mubr.bf16.mxu1 %v3236_v2 }
 0x43b   :  { %1857 = vmatpush1.bf16.msra.mxu0 %v3723_v51  ;;  %1898 = vmatpush1.bf16.msra.mxu1 %v3728_v52 }
 0x43c   :  { %1858 = vmatprep.subr.bf16.mxu0 %v3737_v32  ;;  %1899 = vmatprep.subr.bf16.mxu1 %v3742_v53 }
 0x43f   :  { %1859 = vmatpush1.bf16.msra.mxu0 %v3747_v54  ;;  %1900 = vmatpush1.bf16.msra.mxu1 %v3752_v0 }
 0x440   :  { %1860 = vmatprep.subr.bf16.mxu0 %v3761_v6  ;;  %1901 = vmatprep.subr.bf16.mxu1 %v3766_v55 }
 0x443   :  { %1861 = vmatpush1.bf16.msra.mxu0 %v3771_v56  ;;  %1902 = vmatpush1.bf16.msra.mxu1 %v3776_v57 }
 0x444   :  { %1862 = vmatprep.subr.bf16.mxu0 %v3785_v58  ;;  %1903 = vmatprep.subr.bf16.mxu1 %v3790_v59 }
 0x447   :  { %1863 = vmatpush1.bf16.msra.mxu0 %v3795_v60  ;;  %1904 = vmatpush1.bf16.msra.mxu1 %v3800_v61 }
 0x448   :  { %1864 = vmatprep.subr.bf16.mxu0 %v3807_v62  ;;  %1905 = vmatprep.subr.bf16.mxu1 %v3812_v26 }
 0x44b   :  { %1865 = vmatpush1.bf16.msra.mxu0 %v3819_v1  ;;  %1906 = vmatpush1.bf16.msra.mxu1 %v3824_v3 }
 0x44c   :  { %1866 = vmatprep.subr.bf16.mxu0 %v3831_v4  ;;  %1907 = vmatprep.subr.bf16.mxu1 %v3836_v5 }
 0x44f   :  { %1867 = vmatpush1.bf16.msra.mxu0 %v3843_v7  ;;  %1908 = vmatpush1.bf16.msra.mxu1 %v3848_v8 }
 0x450   :  { %1868 = vmatprep.subr.bf16.mxu0 %v3855_v9  ;;  %1909 = vmatprep.subr.bf16.mxu1 %v3860_v10 }
 0x453   :  { %1869 = vmatpush1.bf16.msra.mxu0 %v3867_v11  ;;  %1910 = vmatpush1.bf16.msra.mxu1 %v3872_v12 }
 0x454   :  { %2178 = vmatprep.subr.bf16.mxu0 %v3689_v43  ;;  %2219 = vmatprep.subr.bf16.mxu1 %v3694_v45 }
 0x509   :  { %v1564_v25 = vpop.f32.mrb[16].mxu0  ;;  %v1605_v27 = vpop.f32.mrb[16].mxu1 }
 0x50a   :  { %v1612_v28 = vadd.f32 %v2818_v63, %v1564_v25  ;;  %v1566_v29 = vpop.f32.mrb[17].mxu0  ;;  %v1607_v31 = vpop.f32.mrb[17].mxu1  ;;  %v1614_v42 = vadd.f32 %v2820_v40, %v1605_v27 }
 0x50b   :  { %v1613_v33 = vadd.f32 %v2819_v39, %v1566_v29  ;;  %v1568_v35 = vpop.f32.mrb[18].mxu0  ;;  %v1609_v37 = vpop.f32.mrb[18].mxu1  ;;  %v1615_v38 = vadd.f32 %v2821_v36, %v1607_v31 }
 0x50c   :  { %v2854_v44 = vmul.f32 -1.442695, %v1612_v28  ;;  %v1569_v49 = vpop.f32.mrb[19].mxu0  ;;  %v1610_v30 = vpop.f32.mrb[19].mxu1 }
 0x50d   :  { %v2855_v34 = vmul.f32 -1.442695, %v1613_v33  ;;  %v2856_v41 = vmul.f32 -1.442695, %v1615_v38  ;;  %v1646_v39 = vpop.permute.xlu0 %1645  ;;  %v2858_v33 = vld [vmem:[%s4105_s2 + $0x20] sm:$0xff] }
 0x50e   :  { %3148 = vpow2.f32 %v2854_v44  ;;  %vm1647_vm12 = vcmp.eq.s32.totalorder %v1646_v39, 1 }
 0x50f   :  { %3150 = vpow2.f32 %v2855_v34 }
 0x510   :  { %3152 = vpow2.f32 %v2856_v41 }
 0x511   :  { %3154 = vtanh.f32 %v1614_v42 }
 0x518   :  { %v3149_v13 = vpop.eup %3148 }
 0x519   :  { %v3151_v14 = vpop.eup %3150  ;;  %v1619_v15 = vadd.f32 1.0, %v3149_v13 }
 0x51a   :  { %v1625_v17 = vadd.f32 1.0, %v3151_v14  ;;  %v3153_v18 = vpop.eup %3152 }
 0x51b   :  { %3156 = vrcp.f32 %v1619_v15  ;;  %v3155_v19 = vpop.eup %3154  ;;  %v1632_v24 = vadd.f32 1.0, %v3153_v18 }
 0x51c   :  { %3158 = vrcp.f32 %v1625_v17  ;;  %v2862_v17 = vld [vmem:[%s4104_s1 + $0xb8] sm:$0xff] }
 0x51d   :  { %3160 = vrcp.f32 %v1632_v24 }
 0x525   :  { %v3157_v20 = vpop.eup %3156 }
 0x526   :  { %v3159_v22 = vpop.eup %3158  ;;  %v1636_v23 = vmul.f32 %v3157_v20, %v3155_v19  ;;  %v2861_v19 = vld [vmem:[%s4104_s1 + $0xb0] sm:$0xff] }
 0x527   :  { %v1635_v63 = vmul.f32 %v3159_v22, %v3894_v16  ;;  %v3161_v28 = vpop.eup %3160 }
 0x529   :  { %v1637_v25 = vadd.f32 %v1636_v23, %v1635_v63 }
 0x52b   :  { %3162 = vtanh.f32 %v1637_v25  ;;  %v3952_v27 = vsel %vm1647_vm12, %v1637_v25, %v3894_v16  ;;  %v2859_v16 = vld [vmem:[%s4104_s1 + $0xa0] sm:$0xff] }
 0x535   :  { %v3163_v29 = vpop.eup %3162 }
 0x536   :  { %v1639_v31 = vmul.f32 %v3163_v29, %v3161_v28 }
 0x538   :  { %v3958_v35 = vsel %vm1647_vm12, %v1639_v31, %v3900_v21  ;;  %v1652_v37 = vsel %vm1647_vm12, %v1639_v31, 0.0  ;;  %v2860_v21 = vld [vmem:[%s4104_s1 + $0xa8] sm:$0xff] }
 0x539   :  { %v1653_v44 = vadd.f32 %v2858_v33, %v1652_v37  ;;  %v1661_v49 = vpack.c.bf16 %v3958_v35, %v3958_v35 }
 0x53b   :  { %1655 = vst [vmem:[#allocation4 + $0x20] sm:$0xff] %v1653_v44  ;;  %1887 = vmatmul.mubr.bf16.vlgmr.msra.gmra.mrb[20].mxu0 %v1661_v49  ;;  %1928 = vmatmul.mubr.bf16.vlgmr.msra.gmra.mrb[20].mxu1 %v1661_v49  ;;  %v1970_v49 = vpop.permute.xlu1 %1969 }
 0x53c   :  { %2179 = vmatpush1.bf16.msra.mxu0 %v3699_v46  ;;  %2220 = vmatpush1.bf16.msra.mxu1 %v3704_v47  ;;  %vm1971_vm13 = vcmp.eq.s32.totalorder %v1970_v49, 1 }
 0x53d   :  { %2180 = vmatprep.subr.bf16.mxu0 %v3713_v48  ;;  %2221 = vmatprep.subr.bf16.mxu1 %v3718_v50 }
 0x53e   :  { %2210 = vmatprep.mubr.bf16.mxu0 %v3236_v2  ;;  %2251 = vmatprep.mubr.bf16.mxu1 %v3236_v2 }
 0x540   :  { %2181 = vmatpush1.bf16.msra.mxu0 %v3723_v51  ;;  %2222 = vmatpush1.bf16.msra.mxu1 %v3728_v52 }
 0x541   :  { %2182 = vmatprep.subr.bf16.mxu0 %v3737_v32  ;;  %2223 = vmatprep.subr.bf16.mxu1 %v3742_v53 }
 0x544   :  { %2183 = vmatpush1.bf16.msra.mxu0 %v3747_v54  ;;  %2224 = vmatpush1.bf16.msra.mxu1 %v3752_v0 }
 0x545   :  { %2184 = vmatprep.subr.bf16.mxu0 %v3761_v6  ;;  %2225 = vmatprep.subr.bf16.mxu1 %v3766_v55 }
 0x548   :  { %2185 = vmatpush1.bf16.msra.mxu0 %v3771_v56  ;;  %2226 = vmatpush1.bf16.msra.mxu1 %v3776_v57 }
 0x549   :  { %2186 = vmatprep.subr.bf16.mxu0 %v3785_v58  ;;  %2227 = vmatprep.subr.bf16.mxu1 %v3790_v59 }
 0x54c   :  { %2187 = vmatpush1.bf16.msra.mxu0 %v3795_v60  ;;  %2228 = vmatpush1.bf16.msra.mxu1 %v3800_v61 }
 0x54d   :  { %2188 = vmatprep.subr.bf16.mxu0 %v3807_v62  ;;  %2229 = vmatprep.subr.bf16.mxu1 %v3812_v26 }
 0x550   :  { %2189 = vmatpush1.bf16.msra.mxu0 %v3819_v1  ;;  %2230 = vmatpush1.bf16.msra.mxu1 %v3824_v3 }
 0x551   :  { %2190 = vmatprep.subr.bf16.mxu0 %v3831_v4  ;;  %2231 = vmatprep.subr.bf16.mxu1 %v3836_v5 }
 0x554   :  { %2191 = vmatpush1.bf16.msra.mxu0 %v3843_v7  ;;  %2232 = vmatpush1.bf16.msra.mxu1 %v3848_v8 }
 0x555   :  { %2192 = vmatprep.subr.bf16.mxu0 %v3855_v9  ;;  %2233 = vmatprep.subr.bf16.mxu1 %v3860_v10 }
 0x558   :  { %2193 = vmatpush1.bf16.msra.mxu0 %v3867_v11  ;;  %2234 = vmatpush1.bf16.msra.mxu1 %v3872_v12 }
 0x559   :  { %2502 = vmatprep.subr.bf16.mxu0 %v3689_v43  ;;  %2543 = vmatprep.subr.bf16.mxu1 %v3694_v45 }
 0x60e   :  { %v1888_v30 = vpop.f32.mrb[20].mxu0  ;;  %v1929_v34 = vpop.f32.mrb[20].mxu1 }
 0x60f   :  { %v1936_v36 = vadd.f32 %v2859_v16, %v1888_v30  ;;  %v1890_v38 = vpop.f32.mrb[21].mxu0  ;;  %v1931_v40 = vpop.f32.mrb[21].mxu1  ;;  %v1938_v22 = vadd.f32 %v2861_v19, %v1929_v34 }
 0x610   :  { %v1937_v41 = vadd.f32 %v2860_v21, %v1890_v38  ;;  %v1892_v42 = vpop.f32.mrb[22].mxu0  ;;  %v1933_v13 = vpop.f32.mrb[22].mxu1  ;;  %v1939_v18 = vadd.f32 %v2862_v17, %v1931_v40  ;;  %v2899_v38 = vld [vmem:[%s4105_s2 + $0x28] sm:$0xff] }
 0x611   :  { %v2895_v14 = vmul.f32 -1.442695, %v1936_v36  ;;  %v1893_v43 = vpop.f32.mrb[23].mxu0  ;;  %v1934_v15 = vpop.f32.mrb[23].mxu1 }
 0x612   :  { %v2896_v45 = vmul.f32 -1.442695, %v1937_v41  ;;  %v2897_v20 = vmul.f32 -1.442695, %v1939_v18 }
 0x613   :  { %3164 = vpow2.f32 %v2895_v14 }
 0x614   :  { %3166 = vpow2.f32 %v2896_v45  ;;  %v2940_v45 = vld [vmem:[%s4105_s2 + $0x30] sm:$0xff] }
 0x615   :  { %3168 = vpow2.f32 %v2897_v20 }
 0x616   :  { %3170 = vtanh.f32 %v1938_v22  ;;  %v2941_v22 = vld [vmem:[%s4104_s1 + $0xe0] sm:$0xff] }
 0x61d   :  { %v3165_v23 = vpop.eup %3164 }
 0x61e   :  { %v3167_v24 = vpop.eup %3166  ;;  %v1943_v63 = vadd.f32 1.0, %v3165_v23  ;;  %v2942_v23 = vld [vmem:[%s4104_s1 + $0xe8] sm:$0xff] }
 0x61f   :  { %v1949_v39 = vadd.f32 1.0, %v3167_v24  ;;  %v3169_v25 = vpop.eup %3168 }
 0x620   :  { %3172 = vrcp.f32 %v1943_v63  ;;  %v3171_v28 = vpop.eup %3170  ;;  %v1956_v37 = vadd.f32 1.0, %v3169_v25 }
 0x621   :  { %3174 = vrcp.f32 %v1949_v39 }
 0x622   :  { %3176 = vrcp.f32 %v1956_v37 }
 0x62a   :  { %v3173_v29 = vpop.eup %3172 }
 0x62b   :  { %v3175_v31 = vpop.eup %3174  ;;  %v1960_v33 = vmul.f32 %v3173_v29, %v3171_v28 }
 0x62c   :  { %v1959_v44 = vmul.f32 %v3175_v31, %v3952_v27  ;;  %v3177_v30 = vpop.eup %3176 }
 0x62e   :  { %v1961_v16 = vadd.f32 %v1960_v33, %v1959_v44 }
 0x630   :  { %3178 = vtanh.f32 %v1961_v16  ;;  %v4010_v21 = vsel %vm1971_vm13, %v1961_v16, %v3952_v27 }
 0x63a   :  { %v3179_v34 = vpop.eup %3178 }
 0x63b   :  { %v1963_v36 = vmul.f32 %v3179_v34, %v3177_v30  ;;  %v2943_v34 = vld [vmem:[%s4104_s1 + $0xf0] sm:$0xff] }
 0x63d   :  { %v4016_v40 = vsel %vm1971_vm13, %v1963_v36, %v3958_v35  ;;  %v1976_v41 = vsel %vm1971_vm13, %v1963_v36, 0.0 }
 0x63e   :  { %v1977_v42 = vadd.f32 %v2899_v38, %v1976_v41  ;;  %v1985_v13 = vpack.c.bf16 %v4016_v40, %v4016_v40 }
 0x640   :  { %1979 = vst [vmem:[#allocation4 + $0x28] sm:$0xff] %v1977_v42  ;;  %2211 = vmatmul.mubr.bf16.vlgmr.msra.gmra.mrb[24].mxu0 %v1985_v13  ;;  %2252 = vmatmul.mubr.bf16.vlgmr.msra.gmra.mrb[24].mxu1 %v1985_v13 }
 0x641   :  { %2503 = vmatpush1.bf16.msra.mxu0 %v3699_v46  ;;  %2544 = vmatpush1.bf16.msra.mxu1 %v3704_v47  ;;  %v2901_v46 = vld [vmem:[%s4104_s1 + $0xc8] sm:$0xff] }
 0x642   :  { %2504 = vmatprep.subr.bf16.mxu0 %v3713_v48  ;;  %2545 = vmatprep.subr.bf16.mxu1 %v3718_v50 }
 0x643   :  { %2534 = vmatprep.mubr.bf16.mxu0 %v3236_v2  ;;  %2575 = vmatprep.mubr.bf16.mxu1 %v3236_v2  ;;  %v2900_v2 = vld [vmem:[%s4104_s1 + $0xc0] sm:$0xff] }
 0x645   :  { %2505 = vmatpush1.bf16.msra.mxu0 %v3723_v51  ;;  %2546 = vmatpush1.bf16.msra.mxu1 %v3728_v52 }
 0x646   :  { %2506 = vmatprep.subr.bf16.mxu0 %v3737_v32  ;;  %2547 = vmatprep.subr.bf16.mxu1 %v3742_v53 }
 0x649   :  { %2507 = vmatpush1.bf16.msra.mxu0 %v3747_v54  ;;  %2548 = vmatpush1.bf16.msra.mxu1 %v3752_v0 }
 0x64a   :  { %2508 = vmatprep.subr.bf16.mxu0 %v3761_v6  ;;  %2549 = vmatprep.subr.bf16.mxu1 %v3766_v55 }
 0x64d   :  { %2509 = vmatpush1.bf16.msra.mxu0 %v3771_v56  ;;  %2550 = vmatpush1.bf16.msra.mxu1 %v3776_v57  ;;  %v2903_v57 = vld [vmem:[%s4104_s1 + $0xd8] sm:$0xff] }
 0x64e   :  { %2510 = vmatprep.subr.bf16.mxu0 %v3785_v58  ;;  %2551 = vmatprep.subr.bf16.mxu1 %v3790_v59  ;;  %v2902_v59 = vld [vmem:[%s4104_s1 + $0xd0] sm:$0xff] }
 0x651   :  { %2511 = vmatpush1.bf16.msra.mxu0 %v3795_v60  ;;  %2552 = vmatpush1.bf16.msra.mxu1 %v3800_v61 }
 0x652   :  { %2512 = vmatprep.subr.bf16.mxu0 %v3807_v62  ;;  %2553 = vmatprep.subr.bf16.mxu1 %v3812_v26 }
 0x655   :  { %2513 = vmatpush1.bf16.msra.mxu0 %v3819_v1  ;;  %2554 = vmatpush1.bf16.msra.mxu1 %v3824_v3 }
 0x656   :  { %2514 = vmatprep.subr.bf16.mxu0 %v3831_v4  ;;  %2555 = vmatprep.subr.bf16.mxu1 %v3836_v5 }
 0x659   :  { %2515 = vmatpush1.bf16.msra.mxu0 %v3843_v7  ;;  %2556 = vmatpush1.bf16.msra.mxu1 %v3848_v8 }
 0x65a   :  { %2516 = vmatprep.subr.bf16.mxu0 %v3855_v9  ;;  %2557 = vmatprep.subr.bf16.mxu1 %v3860_v10 }
 0x65d   :  { %2517 = vmatpush1.bf16.msra.mxu0 %v3867_v11  ;;  %2558 = vmatpush1.bf16.msra.mxu1 %v3872_v12  ;;  %v2294_v11 = vpop.permute.xlu0 %2293 }
 0x65e   :  { %vm2295_vm14 = vcmp.eq.s32.totalorder %v2294_v11, 1 }
 0x713   :  { %v2212_v47 = vpop.f32.mrb[24].mxu0  ;;  %v2253_v48 = vpop.f32.mrb[24].mxu1 }
 0x714   :  { %v2260_v50 = vadd.f32 %v2900_v2, %v2212_v47  ;;  %v2214_v51 = vpop.f32.mrb[25].mxu0  ;;  %v2255_v52 = vpop.f32.mrb[25].mxu1  ;;  %v2262_v61 = vadd.f32 %v2902_v59, %v2253_v48 }
 0x715   :  { %v2261_v32 = vadd.f32 %v2901_v46, %v2214_v51  ;;  %v2216_v53 = vpop.f32.mrb[26].mxu0  ;;  %v2257_v54 = vpop.f32.mrb[26].mxu1  ;;  %v2263_v58 = vadd.f32 %v2903_v57, %v2255_v52 }
 0x716   :  { %v2936_v0 = vmul.f32 -1.442695, %v2260_v50  ;;  %v2217_v6 = vpop.f32.mrb[27].mxu0  ;;  %v2258_v55 = vpop.f32.mrb[27].mxu1 }
 0x717   :  { %v2937_v56 = vmul.f32 -1.442695, %v2261_v32  ;;  %v2938_v60 = vmul.f32 -1.442695, %v2263_v58  ;;  %v2618_v52 = vpop.permute.xlu1 %2617 }
 0x718   :  { %3180 = vpow2.f32 %v2936_v0  ;;  %vm2619_vm15 = vcmp.eq.s32.totalorder %v2618_v52, 1 }
 0x719   :  { %3182 = vpow2.f32 %v2937_v56  ;;  %v2981_v56 = vld [vmem:[%s4105_s2 + $0x38] sm:$0xff] }
 0x71a   :  { %3184 = vpow2.f32 %v2938_v60 }
 0x71b   :  { %3186 = vtanh.f32 %v2262_v61 }
 0x722   :  { %v3181_v62 = vpop.eup %3180 }
 0x723   :  { %v3183_v26 = vpop.eup %3182  ;;  %v2267_v1 = vadd.f32 1.0, %v3181_v62 }
 0x724   :  { %v2273_v3 = vadd.f32 1.0, %v3183_v26  ;;  %v3185_v4 = vpop.eup %3184 }
 0x725   :  { %3188 = vrcp.f32 %v2267_v1  ;;  %v3187_v5 = vpop.eup %3186  ;;  %v2280_v10 = vadd.f32 1.0, %v3185_v4 }
 0x726   :  { %3190 = vrcp.f32 %v2273_v3 }
 0x727   :  { %3192 = vrcp.f32 %v2280_v10 }
 0x72f   :  { %v3189_v7 = vpop.eup %3188 }
 0x730   :  { %v3191_v8 = vpop.eup %3190  ;;  %v2284_v9 = vmul.f32 %v3189_v7, %v3187_v5 }
 0x731   :  { %v2283_v12 = vmul.f32 %v3191_v8, %v4010_v21  ;;  %v3193_v14 = vpop.eup %3192 }
 0x733   :  { %v2285_v27 = vadd.f32 %v2284_v9, %v2283_v12 }
 0x735   :  { %3194 = vtanh.f32 %v2285_v27  ;;  %v2297_v35 = vsel %vm2295_vm14, %v2285_v27, %v4010_v21  ;;  %v2944_v21 = vld [vmem:[%s4104_s1 + $0xf8] sm:$0xff] }
 0x73f   :  { %v3195_v43 = vpop.eup %3194 }
 0x740   :  { %v2287_v15 = vmul.f32 %v3195_v43, %v3193_v14 }
 0x742   :  { %v2296_v17 = vsel %vm2295_vm14, %v2287_v15, %v4016_v40  ;;  %v2300_v18 = vsel %vm2295_vm14, %v2287_v15, 0.0 }
 0x743   :  { %v2301_v19 = vadd.f32 %v2940_v45, %v2300_v18  ;;  %v2309_v20 = vpack.c.bf16 %v2296_v17, %v2296_v17 }
 0x745   :  { %2303 = vst [vmem:[#allocation4 + $0x30] sm:$0xff] %v2301_v19  ;;  %2535 = vmatmul.mubr.bf16.vlgmr.msra.gmra.mrb[28].mxu0 %v2309_v20  ;;  %2576 = vmatmul.mubr.bf16.vlgmr.msra.gmra.mrb[28].mxu1 %v2309_v20 }
 0x818   :  { %v2536_v24 = vpop.f32.mrb[28].mxu0  ;;  %v2577_v63 = vpop.f32.mrb[28].mxu1 }
 0x819   :  { %v2584_v39 = vadd.f32 %v2941_v22, %v2536_v24  ;;  %v2538_v25 = vpop.f32.mrb[29].mxu0  ;;  %v2579_v28 = vpop.f32.mrb[29].mxu1  ;;  %v2586_v38 = vadd.f32 %v2943_v34, %v2577_v63 }
 0x81a   :  { %v2585_v29 = vadd.f32 %v2942_v23, %v2538_v25  ;;  %v2540_v31 = vpop.f32.mrb[30].mxu0  ;;  %v2581_v33 = vpop.f32.mrb[30].mxu1  ;;  %v2587_v30 = vadd.f32 %v2944_v21, %v2579_v28 }
 0x81b   :  { %v2977_v37 = vmul.f32 -1.442695, %v2584_v39  ;;  %v2541_v44 = vpop.f32.mrb[31].mxu0  ;;  %v2582_v49 = vpop.f32.mrb[31].mxu1 }
 0x81c   :  { %v2978_v16 = vmul.f32 -1.442695, %v2585_v29  ;;  %v2979_v36 = vmul.f32 -1.442695, %v2587_v30 }
 0x81d   :  { %3196 = vpow2.f32 %v2977_v37 }
 0x81e   :  { %3198 = vpow2.f32 %v2978_v16 }
 0x81f   :  { %3200 = vpow2.f32 %v2979_v36 }
 0x820   :  { %3202 = vtanh.f32 %v2586_v38 }
 0x827   :  { %v3197_v40 = vpop.eup %3196 }
 0x828   :  { %v3199_v41 = vpop.eup %3198  ;;  %v2591_v42 = vadd.f32 1.0, %v3197_v40 }
 0x829   :  { %v2597_v13 = vadd.f32 1.0, %v3199_v41  ;;  %v3201_v2 = vpop.eup %3200 }
 0x82a   :  { %3204 = vrcp.f32 %v2591_v42  ;;  %v3203_v46 = vpop.eup %3202  ;;  %v2604_v51 = vadd.f32 1.0, %v3201_v2 }
 0x82b   :  { %3206 = vrcp.f32 %v2597_v13 }
 0x82c   :  { %3208 = vrcp.f32 %v2604_v51 }
 0x834   :  { %v3205_v47 = vpop.eup %3204 }
 0x835   :  { %v3207_v48 = vpop.eup %3206  ;;  %v2608_v50 = vmul.f32 %v3205_v47, %v3203_v46 }
 0x836   :  { %v2607_v32 = vmul.f32 %v3207_v48, %v2297_v35  ;;  %v3209_v0 = vpop.eup %3208 }
 0x838   :  { %v2609_v53 = vadd.f32 %v2608_v50, %v2607_v32 }
 0x83a   :  { %3210 = vtanh.f32 %v2609_v53  ;;  %v2621_v54 = vsel %vm2619_vm15, %v2609_v53, %v2297_v35 }
 0x83b   :  { %2634 = vst [vmem:[%s4111_s8] sm:$0xff] %v2621_v54 }
 0x844   :  { %v3211_v6 = vpop.eup %3210 }
 0x845   :  { %v2611_v55 = vmul.f32 %v3211_v6, %v3209_v0 }
 0x847   :  { %v2620_v57 = vsel %vm2619_vm15, %v2611_v55, %v2296_v17  ;;  %v2624_v58 = vsel %vm2619_vm15, %v2611_v55, 0.0 }
 0x848   :  { %v2625_v59 = vadd.f32 %v2981_v56, %v2624_v58  ;;  %2633 = vst [vmem:[%s4110_s7] sm:$0xff] %v2620_v57 }
 0x84a   :  { %2627 = vst [vmem:[#allocation4 + $0x38] sm:$0xff] %v2625_v59 }
 0x84b   :  { %3223 = shalt.err (!%p3220_p4)
}
 0x84c   :  { %s3224_s5 = scalar_lea.hbm %s4109_s6, 1024 }
 0x84d   :  { %p3225_p5 = scmp.ne.s32.totalorder %s4109_s6, %s3224_s5  ;;  %p3228_p6 = scmp.lt.u32.totalorder %s3224_s5, %s4109_s6 }
 0x84f   :  { %p3230_p7 = pnand %p3228_p6, %p3225_p5 }
 0x851   :  { %3233 = shalt.err (!%p3230_p7)
}
 0x852   :  { %s3238_s7 = smov 128   ;;  %s3239_s9 = smov 8  }
 0x853   :  { %2646 = dma.vmem_to_hbm [thread:$0]  %s2641_s24, 1024, %s4109_s6, [#allocation5], %s3238_s7, %s3238_s7, %s3239_s9  }
 0x854   :  { %3234 = dma.done.wait [#allocation5], 1024  }
 0x855   :  { %3235 = vsyncadd [#allocation5], 4294966272 }
 0x856   :  { %2658 = vsyncpa [#allocation5], 1 }

</bundles_post_ra>
